<compile_context>
chip_gen: v7x
topology: tpu7x:2x2x1
jax: 0.10.0
libtpu: 0.0.40
codegen_flags: <defaults>
</compile_context>

<pallas_src>
import functools
import math

import jax
import jax.numpy as jnp
from jax import lax
from jax.experimental import pallas as pl
from jax.experimental.pallas import tpu as pltpu

_NEG_INF = -1e30


@functools.lru_cache(maxsize=None)
def _vmem_limit():
    """Generation-aware VMEM limit: ~3/4 of physical VMEM, capped at 100 MiB."""
    cap = 64 << 20
    try:  # pragma: no cover - best effort hardware query
        cap = int(getattr(pltpu.get_tpu_info(), "vmem_capacity_bytes", cap))
    except Exception:
        pass
    return int(min(cap * 3 // 4, 100 << 20))


def _round_up(x, m):
    return ((x + m - 1) // m) * m


def _round_rows(n):
    """Pad row counts to sublane (8) granularity; to 128 once large enough."""
    return _round_up(n, 8) if n <= 128 else _round_up(n, 128)


def _pick_tile(dim, candidates):
    """Largest candidate that evenly divides `dim`, else the full dim (legal)."""
    for c in candidates:
        if dim % c == 0:
            return c
    return dim


def _ln(z, g, b, eps):
    mu = jnp.mean(z, axis=-1, keepdims=True)
    var = jnp.mean(jnp.square(z - mu), axis=-1, keepdims=True)
    return (z - mu) * lax.rsqrt(var + eps) * g + b


# ----------------------------- Pallas kernels ------------------------------

def _matmul_kernel(x_ref, w_ref, b_ref, o_ref, *scratch, act, out_f32):
    # f32 output: accumulate directly into the resident output block.
    acc = o_ref if out_f32 else scratch[0]

    @pl.when(pl.program_id(2) == 0)
    def _():
        acc[...] = jnp.zeros_like(acc)

    acc[...] += jnp.dot(x_ref[...].astype(jnp.bfloat16), w_ref[...],
                        preferred_element_type=jnp.float32)

    @pl.when(pl.program_id(2) == pl.num_programs(2) - 1)
    def _():
        y = acc[...] + b_ref[...]
        if act == "relu":
            y = jnp.maximum(y, 0.0)
        o_ref[...] = y.astype(o_ref.dtype)


def linear(x, w_t, b, act=None, out_dtype=jnp.float32):
    """y = act(x @ w_t + b).  Tiled over (M, N, K); bf16 MXU, f32 accumulation."""
    m, k = x.shape
    n = w_t.shape[1]
    tm = _pick_tile(m, (512, 256, 128))
    tn = _pick_tile(n, (256, 128))
    tk = _pick_tile(k, (512, 256, 128))
    out_f32 = jnp.dtype(out_dtype) == jnp.dtype(jnp.float32)
    scratch = [] if out_f32 else [pltpu.VMEM((tm, tn), jnp.float32)]
    return pl.pallas_call(
        functools.partial(_matmul_kernel, act=act, out_f32=out_f32),
        grid=(m // tm, n // tn, k // tk),
        out_shape=jax.ShapeDtypeStruct((m, n), out_dtype),
        in_specs=[
            pl.BlockSpec((tm, tk), lambda i, j, kk: (i, kk)),
            pl.BlockSpec((tk, tn), lambda i, j, kk: (kk, j)),
            pl.BlockSpec((1, tn), lambda i, j, kk: (0, j)),
        ],
        out_specs=pl.BlockSpec((tm, tn), lambda i, j, kk: (i, j)),
        scratch_shapes=scratch,
        compiler_params=pltpu.CompilerParams(
            dimension_semantics=("parallel", "parallel", "arbitrary"),
            vmem_limit_bytes=_vmem_limit()),
    )(x, w_t, b.reshape(1, n))


def _linear_res_ln_kernel(x_ref, w_ref, b_ref, res_ref, g_ref, be_ref, o_ref, *, eps):
    y = jnp.dot(x_ref[...].astype(jnp.bfloat16), w_ref[...],
                preferred_element_type=jnp.float32) + b_ref[...]
    o_ref[...] = _ln(y + res_ref[...], g_ref[...], be_ref[...], eps)


def linear_res_ln(x, w_t, b, res, gamma, beta, eps=1e-5):
    """LayerNorm(res + (x @ w_t + b)).  Rows tiled; K/N kept whole (E-sized)."""
    m, k = x.shape
    n = w_t.shape[1]
    tm = _pick_tile(m, (512, 256, 128))
    return pl.pallas_call(
        functools.partial(_linear_res_ln_kernel, eps=eps),
        grid=(m // tm,),
        out_shape=jax.ShapeDtypeStruct((m, n), jnp.float32),
        in_specs=[
            pl.BlockSpec((tm, k), lambda i: (i, 0)),
            pl.BlockSpec((k, n), lambda i: (0, 0)),
            pl.BlockSpec((1, n), lambda i: (0, 0)),
            pl.BlockSpec((tm, n), lambda i: (i, 0)),
            pl.BlockSpec((1, n), lambda i: (0, 0)),
            pl.BlockSpec((1, n), lambda i: (0, 0)),
        ],
        out_specs=pl.BlockSpec((tm, n), lambda i: (i, 0)),
        compiler_params=pltpu.CompilerParams(
            dimension_semantics=("parallel",), vmem_limit_bytes=_vmem_limit()),
    )(x, w_t, b.reshape(1, n), res, gamma.reshape(1, n), beta.reshape(1, n))


def _ffn_ln_kernel(x_ref, w1_ref, b1_ref, w2_ref, b2_ref, g_ref, be_ref, o_ref, *, eps):
    x = x_ref[...]
    h = jnp.dot(x.astype(jnp.bfloat16), w1_ref[...],
                preferred_element_type=jnp.float32) + b1_ref[...]
    h = jnp.maximum(h, 0.0)
    y = jnp.dot(h.astype(jnp.bfloat16), w2_ref[...],
                preferred_element_type=jnp.float32) + b2_ref[...]
    o_ref[...] = _ln(x + y, g_ref[...], be_ref[...], eps)


def ffn_ln(x, w1_t, b1, w2_t, b2, gamma, beta, eps=1e-5):
    """LayerNorm(x + FF2(relu(FF1(x)))); the (tm, dff) intermediate stays in VMEM."""
    m, e = x.shape
    dff = w1_t.shape[1]
    tm = _pick_tile(m, (512, 256, 128))
    return pl.pallas_call(
        functools.partial(_ffn_ln_kernel, eps=eps),
        grid=(m // tm,),
        out_shape=jax.ShapeDtypeStruct((m, e), jnp.float32),
        in_specs=[
            pl.BlockSpec((tm, e), lambda i: (i, 0)),
            pl.BlockSpec((e, dff), lambda i: (0, 0)),
            pl.BlockSpec((1, dff), lambda i: (0, 0)),
            pl.BlockSpec((dff, e), lambda i: (0, 0)),
            pl.BlockSpec((1, e), lambda i: (0, 0)),
            pl.BlockSpec((1, e), lambda i: (0, 0)),
            pl.BlockSpec((1, e), lambda i: (0, 0)),
        ],
        out_specs=pl.BlockSpec((tm, e), lambda i: (i, 0)),
        compiler_params=pltpu.CompilerParams(
            dimension_semantics=("parallel",), vmem_limit_bytes=_vmem_limit()),
    )(x, w1_t, b1.reshape(1, dff), w2_t, b2.reshape(1, e),
      gamma.reshape(1, e), beta.reshape(1, e))


def _layernorm_kernel(x_ref, g_ref, b_ref, o_ref, *, eps):
    o_ref[...] = _ln(x_ref[...], g_ref[...], b_ref[...], eps)


def layernorm(x, gamma, beta, eps=1e-5):
    m, d = x.shape
    tm = _pick_tile(m, (512, 256, 128))
    return pl.pallas_call(
        functools.partial(_layernorm_kernel, eps=eps),
        grid=(m // tm,),
        out_shape=jax.ShapeDtypeStruct((m, d), jnp.float32),
        in_specs=[
            pl.BlockSpec((tm, d), lambda i: (i, 0)),
            pl.BlockSpec((1, d), lambda i: (0, 0)),
            pl.BlockSpec((1, d), lambda i: (0, 0)),
        ],
        out_specs=pl.BlockSpec((tm, d), lambda i: (i, 0)),
        compiler_params=pltpu.CompilerParams(dimension_semantics=("parallel",)),
    )(x, gamma.reshape(1, d), beta.reshape(1, d))


def _mha_kernel(*refs, dh, gh, scale, has_bias):
    if has_bias:
        q_ref, k_ref, v_ref, bias_ref, o_ref = refs
    else:
        q_ref, k_ref, v_ref, o_ref = refs
    outs = []
    for g in range(gh):                                   # heads within this group
        sl = pl.ds(g * dh, dh)
        q = q_ref[:, sl].astype(jnp.bfloat16)             # (tq, dh)
        k = k_ref[:, sl].astype(jnp.bfloat16)             # (Lk, dh)
        v = v_ref[:, sl].astype(jnp.bfloat16)             # (Lk, dh)
        s = lax.dot_general(q, k, (((1,), (1,)), ((), ())),
                            preferred_element_type=jnp.float32) * scale
        if has_bias:
            s = s + bias_ref[...]                         # (1, Lk) key-padding bias
        m = jnp.max(s, axis=-1, keepdims=True)
        ex = jnp.exp(s - m)
        p = ex * pl.reciprocal(jnp.sum(ex, axis=-1, keepdims=True), approx=True)
        outs.append(jnp.dot(p.astype(jnp.bfloat16), v,
                            preferred_element_type=jnp.float32))
    # Single lane-dense store of the full head-group block.
    full = outs[0] if gh == 1 else jnp.concatenate(outs, axis=-1)
    o_ref[...] = full.astype(o_ref.dtype)


def mha_core(q_arr, k_arr, v_arr, nhead, e, *, q_col=0, k_col=0, v_col=0,
             key_bias=None, out_dtype=jnp.bfloat16):
    """Multi-head attention.  q/k/v may all point into the same packed tensor;
    the q/k/v regions are selected by BlockSpec column offsets.  Grid iterates
    (head-group, query-tile); K/V blocks stay resident across query tiles."""
    lq = q_arr.shape[0]
    lk = k_arr.shape[0]
    dh = e // nhead
    scale = 1.0 / math.sqrt(dh)
    gh = max(1, min(nhead, 128 // dh)) if dh < 128 else 1
    while nhead % gh:
        gh -= 1
    gw = gh * dh                                   # lanes per head group
    n_groups = e // gw
    tq = _pick_tile(lq, (256, 128))                # query-row tile
    q_blk, k_blk, v_blk = q_col // gw, k_col // gw, v_col // gw
    has_bias = key_bias is not None

    in_specs = [
        pl.BlockSpec((tq, gw), lambda j, i: (i, q_blk + j)),
        pl.BlockSpec((lk, gw), lambda j, i: (0, k_blk + j)),
        pl.BlockSpec((lk, gw), lambda j, i: (0, v_blk + j)),
    ]
    args = [q_arr, k_arr, v_arr]
    if has_bias:
        in_specs.append(pl.BlockSpec((1, lk), lambda j, i: (0, 0)))
        args.append(key_bias)

    return pl.pallas_call(
        functools.partial(_mha_kernel, dh=dh, gh=gh, scale=scale, has_bias=has_bias),
        grid=(n_groups, lq // tq),
        out_shape=jax.ShapeDtypeStruct((lq, e), out_dtype),
        in_specs=in_specs,
        out_specs=pl.BlockSpec((tq, gw), lambda j, i: (i, j)),
        compiler_params=pltpu.CompilerParams(
            dimension_semantics=("parallel", "parallel"),
            vmem_limit_bytes=_vmem_limit()),
    )(*args)


# --------------------------- transformer (glue) -----------------------------

def _self_attention_block(x, p, nhead, ln_g, ln_b, key_bias=None):
    e = x.shape[-1]
    # Fused in_proj -> packed (L, 3E) bf16; q/k/v picked by column offset.
    qkv = linear(x, p["in_w_t"], p["in_b"], out_dtype=jnp.bfloat16)
    attn = mha_core(qkv, qkv, qkv, nhead, e, q_col=0, k_col=e, v_col=2 * e,
                    key_bias=key_bias)
    # out-proj + residual-add + LayerNorm fused in one kernel.
    return linear_res_ln(attn, p["out_w_t"], p["out_b"], x, ln_g, ln_b)


def _cross_attention_block(x, memory, p, nhead, ln_g, ln_b, key_bias=None):
    e = x.shape[-1]
    q = linear(x, p["q_w_t"], p["q_b"], out_dtype=jnp.bfloat16)
    kv = linear(memory, p["kv_w_t"], p["kv_b"], out_dtype=jnp.bfloat16)
    attn = mha_core(q, kv, kv, nhead, e, q_col=0, k_col=0, v_col=e,
                    key_bias=key_bias)
    return linear_res_ln(attn, p["out_w_t"], p["out_b"], x, ln_g, ln_b)


def _encoder_layer(x, p, nhead, key_bias):
    x = _self_attention_block(x, p["self_attn"], nhead, p["ln1_g"], p["ln1_b"],
                              key_bias=key_bias)
    x = ffn_ln(x, p["ff1_w_t"], p["ff1_b"], p["ff2_w_t"], p["ff2_b"],
               p["ln2_g"], p["ln2_b"])
    return x


def _decoder_layer(x, memory, p, nhead, key_bias):
    x = _self_attention_block(x, p["self_attn"], nhead, p["ln1_g"], p["ln1_b"],
                              key_bias=key_bias)
    x = _cross_attention_block(x, memory, p["cross_attn"], nhead,
                               p["ln2_g"], p["ln2_b"], key_bias=key_bias)
    x = ffn_ln(x, p["ff1_w_t"], p["ff1_b"], p["ff2_w_t"], p["ff2_b"],
               p["ln3_g"], p["ln3_b"])
    return x


def _transformer(src, tgt, tp, nhead, key_bias):
    # `key_bias` (None when no padding rows) masks:
    #   - padded src keys (encoder self-attn + cross-attn memory keys),
    #   - decoder target keys >= n (the original tgt_key_padding_mask).
    mem = src
    for lp in tp["enc_layers"]:
        mem = _encoder_layer(mem, lp, nhead, key_bias)
    mem = layernorm(mem, tp["enc_norm_g"], tp["enc_norm_b"])
    out = tgt
    for lp in tp["dec_layers"]:
        out = _decoder_layer(out, mem, lp, nhead, key_bias)
    out = layernorm(out, tp["dec_norm_g"], tp["dec_norm_b"])
    return out


def _forward_impl(params, x, *, num_preds, nhead, n_cls, n_box):
    if x.ndim > 2:
        x = x.reshape(x.shape[0], -1)            # torch.flatten(x, start_dim=1)
    e = params["query_pos"].shape[-1]
    n_total = sum(num_preds)
    if n_total == 0:
        return (jnp.zeros((0, n_cls), jnp.float32),
                jnp.zeros((0, n_box), jnp.float32))

    # Pad total rows so the embedding / head matmuls get aligned row tiles.
    m_pad = _round_rows(n_total)
    x = jnp.pad(x.astype(jnp.float32), ((0, m_pad - n_total), (0, 0)))
    h = linear(x, params["src_w_t"], params["src_b"])          # (m_pad, E) f32

    outs, start = [], 0
    for n in num_preds:                          # per-image transformer pass
        if n == 0:
            outs.append(jnp.zeros((0, e), jnp.float32))
            continue
        n_pad = _round_rows(n)
        src = h[start:start + n]
        start += n
        if n_pad > n:
            src = jnp.pad(src, ((0, n_pad - n), (0, 0)))
            # f32 additive key-padding bias: 0 for real rows, -1e30 for padding.
            bias = jnp.where(jnp.arange(n_pad) < n, 0.0, _NEG_INF)
            bias = bias.astype(jnp.float32).reshape(1, n_pad)
        else:
            bias = None
        # Decoder target truncated to the first n_pad query rows — rows >= n
        # never influence rows < n (mask only masks keys), so outputs match.
        tgt = params["query_pos"][:n_pad]
        y = _transformer(src, tgt, params["transformer"], nhead, bias)
        outs.append(y[:n])

    enc = jnp.concatenate(outs, axis=0)                        # (n_total, E)
    enc = jnp.pad(enc, ((0, m_pad - n_total), (0, 0)))
    # Fused, lane-dense (padded-to-128) cls+bbox head; split outside.
    head = linear(enc, params["head_w_t"], params["head_b"])   # (m_pad, pad_n)
    scores = head[:n_total, :n_cls]
    deltas = head[:n_total, n_cls:n_cls + n_box]
    return scores, deltas


# ------------------------------ parameter init ------------------------------

def _xavier(key, out_dim, in_dim):
    bound = math.sqrt(6.0 / (in_dim + out_dim))
    w = jax.random.uniform(key, (out_dim, in_dim), jnp.float32, -bound, bound)
    return w.T.astype(jnp.bfloat16)              # stored transposed (in, out), bf16


def _init_self_mha(key, e):
    k_in, k_out = jax.random.split(key)
    return {
        "in_w_t": _xavier(k_in, 3 * e, e),
        "in_b": jnp.zeros((3 * e,), jnp.float32),
        "out_w_t": _xavier(k_out, e, e),
        "out_b": jnp.zeros((e,), jnp.float32),
    }


def _init_cross_mha(key, e):
    k_in, k_out = jax.random.split(key)
    w_in = _xavier(k_in, 3 * e, e)               # (e, 3e)
    return {
        "q_w_t": w_in[:, :e],
        "kv_w_t": w_in[:, e:],
        "q_b": jnp.zeros((e,), jnp.float32),
        "kv_b": jnp.zeros((2 * e,), jnp.float32),
        "out_w_t": _xavier(k_out, e, e),
        "out_b": jnp.zeros((e,), jnp.float32),
    }


def _init_encoder_layer(key, e, dff):
    k_a, k_f1, k_f2 = jax.random.split(key, 3)
    return {
        "self_attn": _init_self_mha(k_a, e),
        "ff1_w_t": _xavier(k_f1, dff, e), "ff1_b": jnp.zeros((dff,), jnp.float32),
        "ff2_w_t": _xavier(k_f2, e, dff), "ff2_b": jnp.zeros((e,), jnp.float32),
        "ln1_g": jnp.ones((e,), jnp.float32), "ln1_b": jnp.zeros((e,), jnp.float32),
        "ln2_g": jnp.ones((e,), jnp.float32), "ln2_b": jnp.zeros((e,), jnp.float32),
    }


def _init_decoder_layer(key, e, dff):
    k_sa, k_ca, k_f1, k_f2 = jax.random.split(key, 4)
    return {
        "self_attn": _init_self_mha(k_sa, e),
        "cross_attn": _init_cross_mha(k_ca, e),
        "ff1_w_t": _xavier(k_f1, dff, e), "ff1_b": jnp.zeros((dff,), jnp.float32),
        "ff2_w_t": _xavier(k_f2, e, dff), "ff2_b": jnp.zeros((e,), jnp.float32),
        "ln1_g": jnp.ones((e,), jnp.float32), "ln1_b": jnp.zeros((e,), jnp.float32),
        "ln2_g": jnp.ones((e,), jnp.float32), "ln2_b": jnp.zeros((e,), jnp.float32),
        "ln3_g": jnp.ones((e,), jnp.float32), "ln3_b": jnp.zeros((e,), jnp.float32),
    }


class FastRCNN2TransformerLayersPallas:
    """JAX/Pallas re-implementation of FastRCNN2TransformerLayers.forward.

    `proposals` are represented by the list of per-image proposal counts
    (len(p) per image), which is all the PyTorch forward uses them for.
    """

    def __init__(self, input_size, num_classes, cls_agnostic_bbox_reg, box_dim=4,
                 hidden_dim=256, seq_len=1024, num_encoder=4, nhead=8,
                 dim_feedforward=2048, key=None):
        if not isinstance(input_size, int):
            input_size = int(math.prod(input_size))
        num_bbox_reg_classes = 1 if cls_agnostic_bbox_reg else num_classes
        self.hidden_dim = hidden_dim
        self.seq_len = seq_len
        self.nhead = nhead
        self.n_cls = num_classes + 1
        self.n_box = num_bbox_reg_classes * box_dim
        if key is None:
            key = jax.random.PRNGKey(0)
        keys = jax.random.split(key, 4 + 2 * num_encoder)

        e = hidden_dim
        # cls_score (std=0.01) + bbox_pred (std=0.001), fused into one padded,
        # lane-dense head weight (zero columns beyond n_cls+n_box).
        cls_w = 0.01 * jax.random.normal(keys[1], (self.n_cls, e), jnp.float32)
        bbox_w = 0.001 * jax.random.normal(keys[2], (self.n_box, e), jnp.float32)
        pad_out = _round_up(self.n_cls + self.n_box, 128)
        head_w = jnp.zeros((pad_out, e), jnp.float32)
        head_w = head_w.at[:self.n_cls].set(cls_w)
        head_w = head_w.at[self.n_cls:self.n_cls + self.n_box].set(bbox_w)

        params = {
            # src_embedding: normal(std=0.01) weight (stored bf16), zero bias
            "src_w_t": (0.01 * jax.random.normal(
                keys[0], (e, input_size), jnp.float32)).T.astype(jnp.bfloat16),
            "src_b": jnp.zeros((e,), jnp.float32),
            "head_w_t": head_w.T.astype(jnp.bfloat16),
            "head_b": jnp.zeros((pad_out,), jnp.float32),
            # query_pos ~ U[0, 1)
            "query_pos": jax.random.uniform(keys[3], (seq_len, e), jnp.float32),
            "transformer": {
                "enc_layers": [_init_encoder_layer(keys[4 + i], e, dim_feedforward)
                               for i in range(num_encoder)],
                "dec_layers": [_init_decoder_layer(keys[4 + num_encoder + i], e,
                                                   dim_feedforward)
                               for i in range(num_encoder)],
                "enc_norm_g": jnp.ones((e,), jnp.float32),
                "enc_norm_b": jnp.zeros((e,), jnp.float32),
                "dec_norm_g": jnp.ones((e,), jnp.float32),
                "dec_norm_b": jnp.zeros((e,), jnp.float32),
            },
        }
        self.params = params
        self._jit_forward = jax.jit(
            _forward_impl, static_argnames=("num_preds", "nhead", "n_cls", "n_box"))

    def __call__(self, x, num_preds_per_image):
        num_preds = tuple(int(n) for n in num_preds_per_image)
        if num_preds and max(num_preds) > self.seq_len:
            raise ValueError("per-image proposal count exceeds seq_len")
        return self._jit_forward(self.params, x, num_preds=num_preds,
                                 nhead=self.nhead, n_cls=self.n_cls,
                                 n_box=self.n_box)


# ----------------------------------- main -----------------------------------

if __name__ == "__main__":
    key = jax.random.PRNGKey(0)
    k_x, k_m = jax.random.split(key)

    num_classes = 4
    box_dim = 4
    C, H, W = 4, 8, 8                       # ROI feature shape (per proposal), NCHW
    num_preds_per_image = [5, 4]            # "proposals": counts per image
    n_total = sum(num_preds_per_image)

    # x: (N_total, C, H, W) — same as PyTorch ROI-pooled features before flatten.
    x = jax.random.normal(k_x, (n_total, C, H, W), jnp.float32)

    # Reduced transformer hyper-parameters for a fast, small example
    # (original module hard-codes hidden_dim=256, seq_len=1024, 4+4 layers,
    #  nhead=8, dim_feedforward=2048 — the compute graph here is identical).
    model = FastRCNN2TransformerLayersPallas(
        input_size=(C, H, W),
        num_classes=num_classes,
        cls_agnostic_bbox_reg=False,
        box_dim=box_dim,
        hidden_dim=128, seq_len=128, num_encoder=2, nhead=8, dim_feedforward=256,
        key=k_m,
    )

    scores, proposal_deltas = model(x, num_preds_per_image)
    jax.block_until_ready((scores, proposal_deltas))

    assert scores.shape == (n_total, num_classes + 1)
    assert proposal_deltas.shape == (n_total, num_classes * box_dim)
    assert scores.dtype == jnp.float32 and proposal_deltas.dtype == jnp.float32
    assert bool(jnp.all(jnp.isfinite(scores))) and bool(jnp.all(jnp.isfinite(proposal_deltas)))
    print("KERNEL_OK")
</pallas_src>

<mosaic_0001>
module attributes {stable_mosaic.version = 11 : i64} {
  func.func @_matmul_kernel(%arg0: i32, %arg1: i32, %arg2: i32, %arg3: memref<16x256xf32, #tpu.memory_space<vmem>>, %arg4: memref<256x128xbf16, #tpu.memory_space<vmem>>, %arg5: memref<1x128xf32, #tpu.memory_space<vmem>>, %arg6: memref<16x128xf32, #tpu.memory_space<vmem>>) attributes {dimension_semantics = [#tpu.dimension_semantics<parallel>, #tpu.dimension_semantics<parallel>, #tpu.dimension_semantics<arbitrary>], iteration_bounds = array<i64: 1, 1, 1>, scalar_prefetch = 0 : i64, scratch_operands = 0 : i64, tpu.core_type = #tpu.core_type<tc>, window_params = [{transform_indices = @transform_0, window_bounds = array<i64: 16, 256>}, {transform_indices = @transform_1, window_bounds = array<i64: 256, 128>}, {transform_indices = @transform_2, window_bounds = array<i64: 1, 128>}, {transform_indices = @transform_3, window_bounds = array<i64: 16, 128>}]} {
    %c0_i32 = arith.constant 0 : i32
    %0 = arith.cmpi eq, %arg2, %c0_i32 : i32
    %1 = arith.extui %0 : i1 to i32
    %c0_i32_0 = arith.constant 0 : i32
    %2 = arith.cmpi ne, %1, %c0_i32_0 : i32
    scf.if %2 {
      %cst_10 = arith.constant 0.000000e+00 : f32
      %13 = vector.broadcast %cst_10 : f32 to vector<16x128xf32>
      %c0_11 = arith.constant 0 : index
      %c0_12 = arith.constant 0 : index
      %14 = vector.load %arg6[%c0_11, %c0_12] : memref<16x128xf32, #tpu.memory_space<vmem>>, vector<16x128xf32>
      tpu.vector_store %arg6[%c0_11, %c0_12], %13 {strides = array<i32>} : memref<16x128xf32, #tpu.memory_space<vmem>>, vector<16x128xf32>,
    } else {
    }
    %c0 = arith.constant 0 : index
    %c0_1 = arith.constant 0 : index
    %3 = vector.load %arg6[%c0, %c0_1] : memref<16x128xf32, #tpu.memory_space<vmem>>, vector<16x128xf32>
    %c0_2 = arith.constant 0 : index
    %c0_3 = arith.constant 0 : index
    %4 = vector.load %arg3[%c0_2, %c0_3] : memref<16x256xf32, #tpu.memory_space<vmem>>, vector<16x256xf32>
    %5 = arith.truncf %4 : vector<16x256xf32> to vector<16x256xbf16>
    %c0_4 = arith.constant 0 : index
    %c0_5 = arith.constant 0 : index
    %6 = vector.load %arg4[%c0_4, %c0_5] : memref<256x128xbf16, #tpu.memory_space<vmem>>, vector<256x128xbf16>
    %cst = arith.constant dense<0.000000e+00> : vector<16x128xf32>
    %7 = tpu.matmul %5, %6, %cst {dimension_numbers = #tpu.dot_dimension_numbers<[1], [0], [0], [1], [0, 0, 1, 1], [], []>} : vector<16x256xbf16>, vector<256x128xbf16>, vector<16x128xf32> -> vector<16x128xf32>
    %8 = arith.addf %3, %7 : vector<16x128xf32>
    %c0_6 = arith.constant 0 : index
    %c0_7 = arith.constant 0 : index
    %9 = vector.load %arg6[%c0_6, %c0_7] : memref<16x128xf32, #tpu.memory_space<vmem>>, vector<16x128xf32>
    tpu.vector_store %arg6[%c0_6, %c0_7], %8 {strides = array<i32>} : memref<16x128xf32, #tpu.memory_space<vmem>>, vector<16x128xf32>,
    %c0_i32_8 = arith.constant 0 : i32
    %10 = arith.cmpi eq, %arg2, %c0_i32_8 : i32
    %11 = arith.extui %10 : i1 to i32
    %c0_i32_9 = arith.constant 0 : i32
    %12 = arith.cmpi ne, %11, %c0_i32_9 : i32
    scf.if %12 {
      %c0_10 = arith.constant 0 : index
      %c0_11 = arith.constant 0 : index
      %13 = vector.load %arg6[%c0_10, %c0_11] : memref<16x128xf32, #tpu.memory_space<vmem>>, vector<16x128xf32>
      %c0_12 = arith.constant 0 : index
      %c0_13 = arith.constant 0 : index
      %14 = vector.load %arg5[%c0_12, %c0_13] : memref<1x128xf32, #tpu.memory_space<vmem>>, vector<1x128xf32>
      %15 = vector.broadcast %14 : vector<1x128xf32> to vector<16x128xf32>
      %16 = arith.addf %13, %15 : vector<16x128xf32>
      %c0_14 = arith.constant 0 : index
      %c0_15 = arith.constant 0 : index
      %17 = vector.load %arg6[%c0_14, %c0_15] : memref<16x128xf32, #tpu.memory_space<vmem>>, vector<16x128xf32>
      tpu.vector_store %arg6[%c0_14, %c0_15], %16 {strides = array<i32>} : memref<16x128xf32, #tpu.memory_space<vmem>>, vector<16x128xf32>,
    } else {
    }
    return
  }
  func.func @transform_0(%arg0: i32, %arg1: i32, %arg2: i32) -> (i32, i32) {
    %c0_i32 = arith.constant 0 : i32
    return %arg0, %arg2 : i32, i32
  }
  func.func @transform_1(%arg0: i32, %arg1: i32, %arg2: i32) -> (i32, i32) {
    %c0_i32 = arith.constant 0 : i32
    return %arg2, %arg1 : i32, i32
  }
  func.func @transform_2(%arg0: i32, %arg1: i32, %arg2: i32) -> (i32, i32) {
    %c0_i32 = arith.constant 0 : i32
    %c0_i32_0 = arith.constant 0 : i32
    return %c0_i32, %arg1 : i32, i32
  }
  func.func @transform_3(%arg0: i32, %arg1: i32, %arg2: i32) -> (i32, i32) {
    %c0_i32 = arith.constant 0 : i32
    return %arg0, %arg1 : i32, i32
  }
}

module attributes {stable_mosaic.version = 11 : i64} {
  func.func @_matmul_kernel(%arg0: i32, %arg1: i32, %arg2: i32, %arg3: memref<8x128xf32, #tpu.memory_space<vmem>>, %arg4: memref<128x128xbf16, #tpu.memory_space<vmem>>, %arg5: memref<1x128xf32, #tpu.memory_space<vmem>>, %arg6: memref<8x128xbf16, #tpu.memory_space<vmem>>, %arg7: memref<8x128xf32, #tpu.memory_space<vmem>>) attributes {dimension_semantics = [#tpu.dimension_semantics<parallel>, #tpu.dimension_semantics<parallel>, #tpu.dimension_semantics<arbitrary>], iteration_bounds = array<i64: 1, 3, 1>, scalar_prefetch = 0 : i64, scratch_operands = 1 : i64, tpu.core_type = #tpu.core_type<tc>, window_params = [{transform_indices = @transform_0, window_bounds = array<i64: 8, 128>}, {transform_indices = @transform_1, window_bounds = array<i64: 128, 128>}, {transform_indices = @transform_2, window_bounds = array<i64: 1, 128>}, {transform_indices = @transform_3, window_bounds = array<i64: 8, 128>}]} {
    %c0_i32 = arith.constant 0 : i32
    %0 = arith.cmpi eq, %arg2, %c0_i32 : i32
    %1 = arith.extui %0 : i1 to i32
    %c0_i32_0 = arith.constant 0 : i32
    %2 = arith.cmpi ne, %1, %c0_i32_0 : i32
    scf.if %2 {
      %cst_10 = arith.constant 0.000000e+00 : f32
      %13 = vector.broadcast %cst_10 : f32 to vector<8x128xf32>
      %c0_11 = arith.constant 0 : index
      %c0_12 = arith.constant 0 : index
      %14 = vector.load %arg7[%c0_11, %c0_12] : memref<8x128xf32, #tpu.memory_space<vmem>>, vector<8x128xf32>
      tpu.vector_store %arg7[%c0_11, %c0_12], %13 {strides = array<i32>} : memref<8x128xf32, #tpu.memory_space<vmem>>, vector<8x128xf32>,
    } else {
    }
    %c0 = arith.constant 0 : index
    %c0_1 = arith.constant 0 : index
    %3 = vector.load %arg7[%c0, %c0_1] : memref<8x128xf32, #tpu.memory_space<vmem>>, vector<8x128xf32>
    %c0_2 = arith.constant 0 : index
    %c0_3 = arith.constant 0 : index
    %4 = vector.load %arg3[%c0_2, %c0_3] : memref<8x128xf32, #tpu.memory_space<vmem>>, vector<8x128xf32>
    %5 = arith.truncf %4 : vector<8x128xf32> to vector<8x128xbf16>
    %c0_4 = arith.constant 0 : index
    %c0_5 = arith.constant 0 : index
    %6 = vector.load %arg4[%c0_4, %c0_5] : memref<128x128xbf16, #tpu.memory_space<vmem>>, vector<128x128xbf16>
    %cst = arith.constant dense<0.000000e+00> : vector<8x128xf32>
    %7 = tpu.matmul %5, %6, %cst {dimension_numbers = #tpu.dot_dimension_numbers<[1], [0], [0], [1], [0, 0, 1, 1], [], []>} : vector<8x128xbf16>, vector<128x128xbf16>, vector<8x128xf32> -> vector<8x128xf32>
    %8 = arith.addf %3, %7 : vector<8x128xf32>
    %c0_6 = arith.constant 0 : index
    %c0_7 = arith.constant 0 : index
    %9 = vector.load %arg7[%c0_6, %c0_7] : memref<8x128xf32, #tpu.memory_space<vmem>>, vector<8x128xf32>
    tpu.vector_store %arg7[%c0_6, %c0_7], %8 {strides = array<i32>} : memref<8x128xf32, #tpu.memory_space<vmem>>, vector<8x128xf32>,
    %c0_i32_8 = arith.constant 0 : i32
    %10 = arith.cmpi eq, %arg2, %c0_i32_8 : i32
    %11 = arith.extui %10 : i1 to i32
    %c0_i32_9 = arith.constant 0 : i32
    %12 = arith.cmpi ne, %11, %c0_i32_9 : i32
    scf.if %12 {
      %c0_10 = arith.constant 0 : index
      %c0_11 = arith.constant 0 : index
      %13 = vector.load %arg7[%c0_10, %c0_11] : memref<8x128xf32, #tpu.memory_space<vmem>>, vector<8x128xf32>
      %c0_12 = arith.constant 0 : index
      %c0_13 = arith.constant 0 : index
      %14 = vector.load %arg5[%c0_12, %c0_13] : memref<1x128xf32, #tpu.memory_space<vmem>>, vector<1x128xf32>
      %15 = vector.broadcast %14 : vector<1x128xf32> to vector<8x128xf32>
      %16 = arith.addf %13, %15 : vector<8x128xf32>
      %17 = arith.truncf %16 : vector<8x128xf32> to vector<8x128xbf16>
      %c0_14 = arith.constant 0 : index
      %c0_15 = arith.constant 0 : index
      %18 = vector.load %arg6[%c0_14, %c0_15] : memref<8x128xbf16, #tpu.memory_space<vmem>>, vector<8x128xbf16>
      tpu.vector_store %arg6[%c0_14, %c0_15], %17 {strides = array<i32>} : memref<8x128xbf16, #tpu.memory_space<vmem>>, vector<8x128xbf16>,
    } else {
    }
    return
  }
  func.func @transform_0(%arg0: i32, %arg1: i32, %arg2: i32) -> (i32, i32) {
    %c0_i32 = arith.constant 0 : i32
    return %arg0, %arg2 : i32, i32
  }
  func.func @transform_1(%arg0: i32, %arg1: i32, %arg2: i32) -> (i32, i32) {
    %c0_i32 = arith.constant 0 : i32
    return %arg2, %arg1 : i32, i32
  }
  func.func @transform_2(%arg0: i32, %arg1: i32, %arg2: i32) -> (i32, i32) {
    %c0_i32 = arith.constant 0 : i32
    %c0_i32_0 = arith.constant 0 : i32
    return %c0_i32, %arg1 : i32, i32
  }
  func.func @transform_3(%arg0: i32, %arg1: i32, %arg2: i32) -> (i32, i32) {
    %c0_i32 = arith.constant 0 : i32
    return %arg0, %arg1 : i32, i32
  }
}

module attributes {stable_mosaic.version = 11 : i64} {
  func.func @_mha_kernel(%arg0: i32, %arg1: i32, %arg2: memref<8x128xbf16, #tpu.memory_space<vmem>>, %arg3: memref<8x128xbf16, #tpu.memory_space<vmem>>, %arg4: memref<8x128xbf16, #tpu.memory_space<vmem>>, %arg5: memref<1x8xf32, #tpu.memory_space<vmem>>, %arg6: memref<8x128xbf16, #tpu.memory_space<vmem>>) attributes {dimension_semantics = [#tpu.dimension_semantics<parallel>, #tpu.dimension_semantics<parallel>], iteration_bounds = array<i64: 1, 1>, scalar_prefetch = 0 : i64, scratch_operands = 0 : i64, tpu.core_type = #tpu.core_type<tc>, window_params = [{transform_indices = @transform_0, window_bounds = array<i64: 8, 128>}, {transform_indices = @transform_1, window_bounds = array<i64: 8, 128>}, {transform_indices = @transform_2, window_bounds = array<i64: 8, 128>}, {pipeline_mode = #tpu.pipeline_mode<synchronous>, transform_indices = @transform_3, window_bounds = array<i64: 1, 8>}, {transform_indices = @transform_4, window_bounds = array<i64: 8, 128>}]} {
    %c0 = arith.constant 0 : index
    %c0_0 = arith.constant 0 : index
    %0 = vector.load %arg2[%c0, %c0_0] : memref<8x128xbf16, #tpu.memory_space<vmem>>, vector<8x16xbf16>
    %c0_1 = arith.constant 0 : index
    %c0_2 = arith.constant 0 : index
    %1 = vector.load %arg3[%c0_1, %c0_2] : memref<8x128xbf16, #tpu.memory_space<vmem>>, vector<8x16xbf16>
    %c0_3 = arith.constant 0 : index
    %c0_4 = arith.constant 0 : index
    %2 = vector.load %arg4[%c0_3, %c0_4] : memref<8x128xbf16, #tpu.memory_space<vmem>>, vector<8x16xbf16>
    %cst = arith.constant dense<0.000000e+00> : vector<8x8xf32>
    %3 = tpu.matmul %0, %1, %cst {dimension_numbers = #tpu.dot_dimension_numbers<[1], [1], [0], [0], [0, 0, 1, 0], [], []>} : vector<8x16xbf16>, vector<8x16xbf16>, vector<8x8xf32> -> vector<8x8xf32>
    %cst_5 = arith.constant 2.500000e-01 : f32
    %4 = vector.broadcast %cst_5 : f32 to vector<8x8xf32>
    %5 = arith.mulf %3, %4 : vector<8x8xf32>
    %c0_6 = arith.constant 0 : index
    %c0_7 = arith.constant 0 : index
    %6 = vector.load %arg5[%c0_6, %c0_7] : memref<1x8xf32, #tpu.memory_space<vmem>>, vector<1x8xf32>
    %7 = vector.broadcast %6 : vector<1x8xf32> to vector<8x8xf32>
    %8 = arith.addf %5, %7 : vector<8x8xf32>
    %cst_8 = arith.constant dense<0xFF800000> : vector<8xf32>
    %9 = vector.multi_reduction <maximumf>, %8, %cst_8 [1] : vector<8x8xf32> to vector<8xf32>
    %10 = vector.shape_cast %9 : vector<8xf32> to vector<8x1xf32>
    %11 = vector.broadcast %10 : vector<8x1xf32> to vector<8x8xf32>
    %12 = arith.subf %8, %11 : vector<8x8xf32>
    %13 = math.exp %12 : vector<8x8xf32>
    %cst_9 = arith.constant dense<0.000000e+00> : vector<8xf32>
    %14 = vector.multi_reduction <add>, %13, %cst_9 [1] : vector<8x8xf32> to vector<8xf32>
    %15 = vector.shape_cast %14 : vector<8xf32> to vector<8x1xf32>
    %16 = tpu.reciprocal %15 {approx = true} : vector<8x1xf32> -> vector<8x1xf32>
    %17 = vector.broadcast %16 : vector<8x1xf32> to vector<8x8xf32>
    %18 = arith.mulf %13, %17 : vector<8x8xf32>
    %19 = arith.truncf %18 : vector<8x8xf32> to vector<8x8xbf16>
    %cst_10 = arith.constant dense<0.000000e+00> : vector<8x16xf32>
    %20 = tpu.matmul %19, %2, %cst_10 {dimension_numbers = #tpu.dot_dimension_numbers<[1], [0], [0], [1], [0, 0, 1, 1], [], []>} : vector<8x8xbf16>, vector<8x16xbf16>, vector<8x16xf32> -> vector<8x16xf32>
    %c0_11 = arith.constant 0 : index
    %c16 = arith.constant 16 : index
    %21 = vector.load %arg2[%c0_11, %c16] : memref<8x128xbf16, #tpu.memory_space<vmem>>, vector<8x16xbf16>
    %c0_12 = arith.constant 0 : index
    %c16_13 = arith.constant 16 : index
    %22 = vector.load %arg3[%c0_12, %c16_13] : memref<8x128xbf16, #tpu.memory_space<vmem>>, vector<8x16xbf16>
    %c0_14 = arith.constant 0 : index
    %c16_15 = arith.constant 16 : index
    %23 = vector.load %arg4[%c0_14, %c16_15] : memref<8x128xbf16, #tpu.memory_space<vmem>>, vector<8x16xbf16>
    %cst_16 = arith.constant dense<0.000000e+00> : vector<8x8xf32>
    %24 = tpu.matmul %21, %22, %cst_16 {dimension_numbers = #tpu.dot_dimension_numbers<[1], [1], [0], [0], [0, 0, 1, 0], [], []>} : vector<8x16xbf16>, vector<8x16xbf16>, vector<8x8xf32> -> vector<8x8xf32>
    %cst_17 = arith.constant 2.500000e-01 : f32
    %25 = vector.broadcast %cst_17 : f32 to vector<8x8xf32>
    %26 = arith.mulf %24, %25 : vector<8x8xf32>
    %c0_18 = arith.constant 0 : index
    %c0_19 = arith.constant 0 : index
    %27 = vector.load %arg5[%c0_18, %c0_19] : memref<1x8xf32, #tpu.memory_space<vmem>>, vector<1x8xf32>
    %28 = vector.broadcast %27 : vector<1x8xf32> to vector<8x8xf32>
    %29 = arith.addf %26, %28 : vector<8x8xf32>
    %cst_20 = arith.constant dense<0xFF800000> : vector<8xf32>
    %30 = vector.multi_reduction <maximumf>, %29, %cst_20 [1] : vector<8x8xf32> to vector<8xf32>
    %31 = vector.shape_cast %30 : vector<8xf32> to vector<8x1xf32>
    %32 = vector.broadcast %31 : vector<8x1xf32> to vector<8x8xf32>
    %33 = arith.subf %29, %32 : vector<8x8xf32>
    %34 = math.exp %33 : vector<8x8xf32>
    %cst_21 = arith.constant dense<0.000000e+00> : vector<8xf32>
    %35 = vector.multi_reduction <add>, %34, %cst_21 [1] : vector<8x8xf32> to vector<8xf32>
    %36 = vector.shape_cast %35 : vector<8xf32> to vector<8x1xf32>
    %37 = tpu.reciprocal %36 {approx = true} : vector<8x1xf32> -> vector<8x1xf32>
    %38 = vector.broadcast %37 : vector<8x1xf32> to vector<8x8xf32>
    %39 = arith.mulf %34, %38 : vector<8x8xf32>
    %40 = arith.truncf %39 : vector<8x8xf32> to vector<8x8xbf16>
    %cst_22 = arith.constant dense<0.000000e+00> : vector<8x16xf32>
    %41 = tpu.matmul %40, %23, %cst_22 {dimension_numbers = #tpu.dot_dimension_numbers<[1], [0], [0], [1], [0, 0, 1, 1], [], []>} : vector<8x8xbf16>, vector<8x16xbf16>, vector<8x16xf32> -> vector<8x16xf32>
    %c0_23 = arith.constant 0 : index
    %c32 = arith.constant 32 : index
    %42 = vector.load %arg2[%c0_23, %c32] : memref<8x128xbf16, #tpu.memory_space<vmem>>, vector<8x16xbf16>
    %c0_24 = arith.constant 0 : index
    %c32_25 = arith.constant 32 : index
    %43 = vector.load %arg3[%c0_24, %c32_25] : memref<8x128xbf16, #tpu.memory_space<vmem>>, vector<8x16xbf16>
    %c0_26 = arith.constant 0 : index
    %c32_27 = arith.constant 32 : index
    %44 = vector.load %arg4[%c0_26, %c32_27] : memref<8x128xbf16, #tpu.memory_space<vmem>>, vector<8x16xbf16>
    %cst_28 = arith.constant dense<0.000000e+00> : vector<8x8xf32>
    %45 = tpu.matmul %42, %43, %cst_28 {dimension_numbers = #tpu.dot_dimension_numbers<[1], [1], [0], [0], [0, 0, 1, 0], [], []>} : vector<8x16xbf16>, vector<8x16xbf16>, vector<8x8xf32> -> vector<8x8xf32>
    %cst_29 = arith.constant 2.500000e-01 : f32
    %46 = vector.broadcast %cst_29 : f32 to vector<8x8xf32>
    %47 = arith.mulf %45, %46 : vector<8x8xf32>
    %c0_30 = arith.constant 0 : index
    %c0_31 = arith.constant 0 : index
    %48 = vector.load %arg5[%c0_30, %c0_31] : memref<1x8xf32, #tpu.memory_space<vmem>>, vector<1x8xf32>
    %49 = vector.broadcast %48 : vector<1x8xf32> to vector<8x8xf32>
    %50 = arith.addf %47, %49 : vector<8x8xf32>
    %cst_32 = arith.constant dense<0xFF800000> : vector<8xf32>
    %51 = vector.multi_reduction <maximumf>, %50, %cst_32 [1] : vector<8x8xf32> to vector<8xf32>
    %52 = vector.shape_cast %51 : vector<8xf32> to vector<8x1xf32>
    %53 = vector.broadcast %52 : vector<8x1xf32> to vector<8x8xf32>
    %54 = arith.subf %50, %53 : vector<8x8xf32>
    %55 = math.exp %54 : vector<8x8xf32>
    %cst_33 = arith.constant dense<0.000000e+00> : vector<8xf32>
    %56 = vector.multi_reduction <add>, %55, %cst_33 [1] : vector<8x8xf32> to vector<8xf32>
    %57 = vector.shape_cast %56 : vector<8xf32> to vector<8x1xf32>
    %58 = tpu.reciprocal %57 {approx = true} : vector<8x1xf32> -> vector<8x1xf32>
    %59 = vector.broadcast %58 : vector<8x1xf32> to vector<8x8xf32>
    %60 = arith.mulf %55, %59 : vector<8x8xf32>
    %61 = arith.truncf %60 : vector<8x8xf32> to vector<8x8xbf16>
    %cst_34 = arith.constant dense<0.000000e+00> : vector<8x16xf32>
    %62 = tpu.matmul %61, %44, %cst_34 {dimension_numbers = #tpu.dot_dimension_numbers<[1], [0], [0], [1], [0, 0, 1, 1], [], []>} : vector<8x8xbf16>, vector<8x16xbf16>, vector<8x16xf32> -> vector<8x16xf32>
    %c0_35 = arith.constant 0 : index
    %c48 = arith.constant 48 : index
    %63 = vector.load %arg2[%c0_35, %c48] : memref<8x128xbf16, #tpu.memory_space<vmem>>, vector<8x16xbf16>
    %c0_36 = arith.constant 0 : index
    %c48_37 = arith.constant 48 : index
    %64 = vector.load %arg3[%c0_36, %c48_37] : memref<8x128xbf16, #tpu.memory_space<vmem>>, vector<8x16xbf16>
    %c0_38 = arith.constant 0 : index
    %c48_39 = arith.constant 48 : index
    %65 = vector.load %arg4[%c0_38, %c48_39] : memref<8x128xbf16, #tpu.memory_space<vmem>>, vector<8x16xbf16>
    %cst_40 = arith.constant dense<0.000000e+00> : vector<8x8xf32>
    %66 = tpu.matmul %63, %64, %cst_40 {dimension_numbers = #tpu.dot_dimension_numbers<[1], [1], [0], [0], [0, 0, 1, 0], [], []>} : vector<8x16xbf16>, vector<8x16xbf16>, vector<8x8xf32> -> vector<8x8xf32>
    %cst_41 = arith.constant 2.500000e-01 : f32
    %67 = vector.broadcast %cst_41 : f32 to vector<8x8xf32>
    %68 = arith.mulf %66, %67 : vector<8x8xf32>
    %c0_42 = arith.constant 0 : index
    %c0_43 = arith.constant 0 : index
    %69 = vector.load %arg5[%c0_42, %c0_43] : memref<1x8xf32, #tpu.memory_space<vmem>>, vector<1x8xf32>
    %70 = vector.broadcast %69 : vector<1x8xf32> to vector<8x8xf32>
    %71 = arith.addf %68, %70 : vector<8x8xf32>
    %cst_44 = arith.constant dense<0xFF800000> : vector<8xf32>
    %72 = vector.multi_reduction <maximumf>, %71, %cst_44 [1] : vector<8x8xf32> to vector<8xf32>
    %73 = vector.shape_cast %72 : vector<8xf32> to vector<8x1xf32>
    %74 = vector.broadcast %73 : vector<8x1xf32> to vector<8x8xf32>
    %75 = arith.subf %71, %74 : vector<8x8xf32>
    %76 = math.exp %75 : vector<8x8xf32>
    %cst_45 = arith.constant dense<0.000000e+00> : vector<8xf32>
    %77 = vector.multi_reduction <add>, %76, %cst_45 [1] : vector<8x8xf32> to vector<8xf32>
    %78 = vector.shape_cast %77 : vector<8xf32> to vector<8x1xf32>
    %79 = tpu.reciprocal %78 {approx = true} : vector<8x1xf32> -> vector<8x1xf32>
    %80 = vector.broadcast %79 : vector<8x1xf32> to vector<8x8xf32>
    %81 = arith.mulf %76, %80 : vector<8x8xf32>
    %82 = arith.truncf %81 : vector<8x8xf32> to vector<8x8xbf16>
    %cst_46 = arith.constant dense<0.000000e+00> : vector<8x16xf32>
    %83 = tpu.matmul %82, %65, %cst_46 {dimension_numbers = #tpu.dot_dimension_numbers<[1], [0], [0], [1], [0, 0, 1, 1], [], []>} : vector<8x8xbf16>, vector<8x16xbf16>, vector<8x16xf32> -> vector<8x16xf32>
    %c0_47 = arith.constant 0 : index
    %c64 = arith.constant 64 : index
    %84 = vector.load %arg2[%c0_47, %c64] : memref<8x128xbf16, #tpu.memory_space<vmem>>, vector<8x16xbf16>
    %c0_48 = arith.constant 0 : index
    %c64_49 = arith.constant 64 : index
    %85 = vector.load %arg3[%c0_48, %c64_49] : memref<8x128xbf16, #tpu.memory_space<vmem>>, vector<8x16xbf16>
    %c0_50 = arith.constant 0 : index
    %c64_51 = arith.constant 64 : index
    %86 = vector.load %arg4[%c0_50, %c64_51] : memref<8x128xbf16, #tpu.memory_space<vmem>>, vector<8x16xbf16>
    %cst_52 = arith.constant dense<0.000000e+00> : vector<8x8xf32>
    %87 = tpu.matmul %84, %85, %cst_52 {dimension_numbers = #tpu.dot_dimension_numbers<[1], [1], [0], [0], [0, 0, 1, 0], [], []>} : vector<8x16xbf16>, vector<8x16xbf16>, vector<8x8xf32> -> vector<8x8xf32>
    %cst_53 = arith.constant 2.500000e-01 : f32
    %88 = vector.broadcast %cst_53 : f32 to vector<8x8xf32>
    %89 = arith.mulf %87, %88 : vector<8x8xf32>
    %c0_54 = arith.constant 0 : index
    %c0_55 = arith.constant 0 : index
    %90 = vector.load %arg5[%c0_54, %c0_55] : memref<1x8xf32, #tpu.memory_space<vmem>>, vector<1x8xf32>
    %91 = vector.broadcast %90 : vector<1x8xf32> to vector<8x8xf32>
    %92 = arith.addf %89, %91 : vector<8x8xf32>
    %cst_56 = arith.constant dense<0xFF800000> : vector<8xf32>
    %93 = vector.multi_reduction <maximumf>, %92, %cst_56 [1] : vector<8x8xf32> to vector<8xf32>
    %94 = vector.shape_cast %93 : vector<8xf32> to vector<8x1xf32>
    %95 = vector.broadcast %94 : vector<8x1xf32> to vector<8x8xf32>
    %96 = arith.subf %92, %95 : vector<8x8xf32>
    %97 = math.exp %96 : vector<8x8xf32>
    %cst_57 = arith.constant dense<0.000000e+00> : vector<8xf32>
    %98 = vector.multi_reduction <add>, %97, %cst_57 [1] : vector<8x8xf32> to vector<8xf32>
    %99 = vector.shape_cast %98 : vector<8xf32> to vector<8x1xf32>
    %100 = tpu.reciprocal %99 {approx = true} : vector<8x1xf32> -> vector<8x1xf32>
    %101 = vector.broadcast %100 : vector<8x1xf32> to vector<8x8xf32>
    %102 = arith.mulf %97, %101 : vector<8x8xf32>
    %103 = arith.truncf %102 : vector<8x8xf32> to vector<8x8xbf16>
    %cst_58 = arith.constant dense<0.000000e+00> : vector<8x16xf32>
    %104 = tpu.matmul %103, %86, %cst_58 {dimension_numbers = #tpu.dot_dimension_numbers<[1], [0], [0], [1], [0, 0, 1, 1], [], []>} : vector<8x8xbf16>, vector<8x16xbf16>, vector<8x16xf32> -> vector<8x16xf32>
    %c0_59 = arith.constant 0 : index
    %c80 = arith.constant 80 : index
    %105 = vector.load %arg2[%c0_59, %c80] : memref<8x128xbf16, #tpu.memory_space<vmem>>, vector<8x16xbf16>
    %c0_60 = arith.constant 0 : index
    %c80_61 = arith.constant 80 : index
    %106 = vector.load %arg3[%c0_60, %c80_61] : memref<8x128xbf16, #tpu.memory_space<vmem>>, vector<8x16xbf16>
    %c0_62 = arith.constant 0 : index
    %c80_63 = arith.constant 80 : index
    %107 = vector.load %arg4[%c0_62, %c80_63] : memref<8x128xbf16, #tpu.memory_space<vmem>>, vector<8x16xbf16>
    %cst_64 = arith.constant dense<0.000000e+00> : vector<8x8xf32>
    %108 = tpu.matmul %105, %106, %cst_64 {dimension_numbers = #tpu.dot_dimension_numbers<[1], [1], [0], [0], [0, 0, 1, 0], [], []>} : vector<8x16xbf16>, vector<8x16xbf16>, vector<8x8xf32> -> vector<8x8xf32>
    %cst_65 = arith.constant 2.500000e-01 : f32
    %109 = vector.broadcast %cst_65 : f32 to vector<8x8xf32>
    %110 = arith.mulf %108, %109 : vector<8x8xf32>
    %c0_66 = arith.constant 0 : index
    %c0_67 = arith.constant 0 : index
    %111 = vector.load %arg5[%c0_66, %c0_67] : memref<1x8xf32, #tpu.memory_space<vmem>>, vector<1x8xf32>
    %112 = vector.broadcast %111 : vector<1x8xf32> to vector<8x8xf32>
    %113 = arith.addf %110, %112 : vector<8x8xf32>
    %cst_68 = arith.constant dense<0xFF800000> : vector<8xf32>
    %114 = vector.multi_reduction <maximumf>, %113, %cst_68 [1] : vector<8x8xf32> to vector<8xf32>
    %115 = vector.shape_cast %114 : vector<8xf32> to vector<8x1xf32>
    %116 = vector.broadcast %115 : vector<8x1xf32> to vector<8x8xf32>
    %117 = arith.subf %113, %116 : vector<8x8xf32>
    %118 = math.exp %117 : vector<8x8xf32>
    %cst_69 = arith.constant dense<0.000000e+00> : vector<8xf32>
    %119 = vector.multi_reduction <add>, %118, %cst_69 [1] : vector<8x8xf32> to vector<8xf32>
    %120 = vector.shape_cast %119 : vector<8xf32> to vector<8x1xf32>
    %121 = tpu.reciprocal %120 {approx = true} : vector<8x1xf32> -> vector<8x1xf32>
    %122 = vector.broadcast %121 : vector<8x1xf32> to vector<8x8xf32>
    %123 = arith.mulf %118, %122 : vector<8x8xf32>
    %124 = arith.truncf %123 : vector<8x8xf32> to vector<8x8xbf16>
    %cst_70 = arith.constant dense<0.000000e+00> : vector<8x16xf32>
    %125 = tpu.matmul %124, %107, %cst_70 {dimension_numbers = #tpu.dot_dimension_numbers<[1], [0], [0], [1], [0, 0, 1, 1], [], []>} : vector<8x8xbf16>, vector<8x16xbf16>, vector<8x16xf32> -> vector<8x16xf32>
    %c0_71 = arith.constant 0 : index
    %c96 = arith.constant 96 : index
    %126 = vector.load %arg2[%c0_71, %c96] : memref<8x128xbf16, #tpu.memory_space<vmem>>, vector<8x16xbf16>
    %c0_72 = arith.constant 0 : index
    %c96_73 = arith.constant 96 : index
    %127 = vector.load %arg3[%c0_72, %c96_73] : memref<8x128xbf16, #tpu.memory_space<vmem>>, vector<8x16xbf16>
    %c0_74 = arith.constant 0 : index
    %c96_75 = arith.constant 96 : index
    %128 = vector.load %arg4[%c0_74, %c96_75] : memref<8x128xbf16, #tpu.memory_space<vmem>>, vector<8x16xbf16>
    %cst_76 = arith.constant dense<0.000000e+00> : vector<8x8xf32>
    %129 = tpu.matmul %126, %127, %cst_76 {dimension_numbers = #tpu.dot_dimension_numbers<[1], [1], [0], [0], [0, 0, 1, 0], [], []>} : vector<8x16xbf16>, vector<8x16xbf16>, vector<8x8xf32> -> vector<8x8xf32>
    %cst_77 = arith.constant 2.500000e-01 : f32
    %130 = vector.broadcast %cst_77 : f32 to vector<8x8xf32>
    %131 = arith.mulf %129, %130 : vector<8x8xf32>
    %c0_78 = arith.constant 0 : index
    %c0_79 = arith.constant 0 : index
    %132 = vector.load %arg5[%c0_78, %c0_79] : memref<1x8xf32, #tpu.memory_space<vmem>>, vector<1x8xf32>
    %133 = vector.broadcast %132 : vector<1x8xf32> to vector<8x8xf32>
    %134 = arith.addf %131, %133 : vector<8x8xf32>
    %cst_80 = arith.constant dense<0xFF800000> : vector<8xf32>
    %135 = vector.multi_reduction <maximumf>, %134, %cst_80 [1] : vector<8x8xf32> to vector<8xf32>
    %136 = vector.shape_cast %135 : vector<8xf32> to vector<8x1xf32>
    %137 = vector.broadcast %136 : vector<8x1xf32> to vector<8x8xf32>
    %138 = arith.subf %134, %137 : vector<8x8xf32>
    %139 = math.exp %138 : vector<8x8xf32>
    %cst_81 = arith.constant dense<0.000000e+00> : vector<8xf32>
    %140 = vector.multi_reduction <add>, %139, %cst_81 [1] : vector<8x8xf32> to vector<8xf32>
    %141 = vector.shape_cast %140 : vector<8xf32> to vector<8x1xf32>
    %142 = tpu.reciprocal %141 {approx = true} : vector<8x1xf32> -> vector<8x1xf32>
    %143 = vector.broadcast %142 : vector<8x1xf32> to vector<8x8xf32>
    %144 = arith.mulf %139, %143 : vector<8x8xf32>
    %145 = arith.truncf %144 : vector<8x8xf32> to vector<8x8xbf16>
    %cst_82 = arith.constant dense<0.000000e+00> : vector<8x16xf32>
    %146 = tpu.matmul %145, %128, %cst_82 {dimension_numbers = #tpu.dot_dimension_numbers<[1], [0], [0], [1], [0, 0, 1, 1], [], []>} : vector<8x8xbf16>, vector<8x16xbf16>, vector<8x16xf32> -> vector<8x16xf32>
    %c0_83 = arith.constant 0 : index
    %c112 = arith.constant 112 : index
    %147 = vector.load %arg2[%c0_83, %c112] : memref<8x128xbf16, #tpu.memory_space<vmem>>, vector<8x16xbf16>
    %c0_84 = arith.constant 0 : index
    %c112_85 = arith.constant 112 : index
    %148 = vector.load %arg3[%c0_84, %c112_85] : memref<8x128xbf16, #tpu.memory_space<vmem>>, vector<8x16xbf16>
    %c0_86 = arith.constant 0 : index
    %c112_87 = arith.constant 112 : index
    %149 = vector.load %arg4[%c0_86, %c112_87] : memref<8x128xbf16, #tpu.memory_space<vmem>>, vector<8x16xbf16>
    %cst_88 = arith.constant dense<0.000000e+00> : vector<8x8xf32>
    %150 = tpu.matmul %147, %148, %cst_88 {dimension_numbers = #tpu.dot_dimension_numbers<[1], [1], [0], [0], [0, 0, 1, 0], [], []>} : vector<8x16xbf16>, vector<8x16xbf16>, vector<8x8xf32> -> vector<8x8xf32>
    %cst_89 = arith.constant 2.500000e-01 : f32
    %151 = vector.broadcast %cst_89 : f32 to vector<8x8xf32>
    %152 = arith.mulf %150, %151 : vector<8x8xf32>
    %c0_90 = arith.constant 0 : index
    %c0_91 = arith.constant 0 : index
    %153 = vector.load %arg5[%c0_90, %c0_91] : memref<1x8xf32, #tpu.memory_space<vmem>>, vector<1x8xf32>
    %154 = vector.broadcast %153 : vector<1x8xf32> to vector<8x8xf32>
    %155 = arith.addf %152, %154 : vector<8x8xf32>
    %cst_92 = arith.constant dense<0xFF800000> : vector<8xf32>
    %156 = vector.multi_reduction <maximumf>, %155, %cst_92 [1] : vector<8x8xf32> to vector<8xf32>
    %157 = vector.shape_cast %156 : vector<8xf32> to vector<8x1xf32>
    %158 = vector.broadcast %157 : vector<8x1xf32> to vector<8x8xf32>
    %159 = arith.subf %155, %158 : vector<8x8xf32>
    %160 = math.exp %159 : vector<8x8xf32>
    %cst_93 = arith.constant dense<0.000000e+00> : vector<8xf32>
    %161 = vector.multi_reduction <add>, %160, %cst_93 [1] : vector<8x8xf32> to vector<8xf32>
    %162 = vector.shape_cast %161 : vector<8xf32> to vector<8x1xf32>
    %163 = tpu.reciprocal %162 {approx = true} : vector<8x1xf32> -> vector<8x1xf32>
    %164 = vector.broadcast %163 : vector<8x1xf32> to vector<8x8xf32>
    %165 = arith.mulf %160, %164 : vector<8x8xf32>
    %166 = arith.truncf %165 : vector<8x8xf32> to vector<8x8xbf16>
    %cst_94 = arith.constant dense<0.000000e+00> : vector<8x16xf32>
    %167 = tpu.matmul %166, %149, %cst_94 {dimension_numbers = #tpu.dot_dimension_numbers<[1], [0], [0], [1], [0, 0, 1, 1], [], []>} : vector<8x8xbf16>, vector<8x16xbf16>, vector<8x16xf32> -> vector<8x16xf32>
    %168 = tpu.concatenate %20, %41, %62, %83, %104, %125, %146, %167 in 1 : vector<8x16xf32>, vector<8x16xf32>, vector<8x16xf32>, vector<8x16xf32>, vector<8x16xf32>, vector<8x16xf32>, vector<8x16xf32>, vector<8x16xf32> -> vector<8x128xf32>
    %169 = arith.truncf %168 : vector<8x128xf32> to vector<8x128xbf16>
    %c0_95 = arith.constant 0 : index
    %c0_96 = arith.constant 0 : index
    %170 = vector.load %arg6[%c0_95, %c0_96] : memref<8x128xbf16, #tpu.memory_space<vmem>>, vector<8x128xbf16>
    tpu.vector_store %arg6[%c0_95, %c0_96], %169 {strides = array<i32>} : memref<8x128xbf16, #tpu.memory_space<vmem>>, vector<8x128xbf16>,
    return
  }
  func.func @transform_0(%arg0: i32, %arg1: i32) -> (i32, i32) {
    %c0_i32 = arith.constant 0 : i32
    %0 = arith.addi %c0_i32, %arg0 : i32
    %c0_i32_0 = arith.constant 0 : i32
    return %arg1, %0 : i32, i32
  }
  func.func @transform_1(%arg0: i32, %arg1: i32) -> (i32, i32) {
    %c1_i32 = arith.constant 1 : i32
    %0 = arith.addi %c1_i32, %arg0 : i32
    %c0_i32 = arith.constant 0 : i32
    %c0_i32_0 = arith.constant 0 : i32
    return %c0_i32, %0 : i32, i32
  }
  func.func @transform_2(%arg0: i32, %arg1: i32) -> (i32, i32) {
    %c2_i32 = arith.constant 2 : i32
    %0 = arith.addi %c2_i32, %arg0 : i32
    %c0_i32 = arith.constant 0 : i32
    %c0_i32_0 = arith.constant 0 : i32
    return %c0_i32, %0 : i32, i32
  }
  func.func @transform_3(%arg0: i32, %arg1: i32) -> (i32, i32) {
    %c0_i32 = arith.constant 0 : i32
    %c0_i32_0 = arith.constant 0 : i32
    %c0_i32_1 = arith.constant 0 : i32
    return %c0_i32, %c0_i32_0 : i32, i32
  }
  func.func @transform_4(%arg0: i32, %arg1: i32) -> (i32, i32) {
    %c0_i32 = arith.constant 0 : i32
    return %arg1, %arg0 : i32, i32
  }
}

module attributes {stable_mosaic.version = 11 : i64} {
  func.func @_linear_res_ln_kernel(%arg0: i32, %arg1: memref<8x128xbf16, #tpu.memory_space<vmem>>, %arg2: memref<128x128xbf16, #tpu.memory_space<vmem>>, %arg3: memref<1x128xf32, #tpu.memory_space<vmem>>, %arg4: memref<8x128xf32, #tpu.memory_space<vmem>>, %arg5: memref<1x128xf32, #tpu.memory_space<vmem>>, %arg6: memref<1x128xf32, #tpu.memory_space<vmem>>, %arg7: memref<8x128xf32, #tpu.memory_space<vmem>>) attributes {dimension_semantics = [#tpu.dimension_semantics<parallel>], iteration_bounds = array<i64: 1>, scalar_prefetch = 0 : i64, scratch_operands = 0 : i64, tpu.core_type = #tpu.core_type<tc>, window_params = [{transform_indices = @transform_0, window_bounds = array<i64: 8, 128>}, {pipeline_mode = #tpu.pipeline_mode<synchronous>, transform_indices = @transform_1, window_bounds = array<i64: 128, 128>}, {pipeline_mode = #tpu.pipeline_mode<synchronous>, transform_indices = @transform_2, window_bounds = array<i64: 1, 128>}, {transform_indices = @transform_3, window_bounds = array<i64: 8, 128>}, {pipeline_mode = #tpu.pipeline_mode<synchronous>, transform_indices = @transform_4, window_bounds = array<i64: 1, 128>}, {pipeline_mode = #tpu.pipeline_mode<synchronous>, transform_indices = @transform_5, window_bounds = array<i64: 1, 128>}, {transform_indices = @transform_6, window_bounds = array<i64: 8, 128>}]} {
    %c0 = arith.constant 0 : index
    %c0_0 = arith.constant 0 : index
    %0 = vector.load %arg1[%c0, %c0_0] : memref<8x128xbf16, #tpu.memory_space<vmem>>, vector<8x128xbf16>
    %c0_1 = arith.constant 0 : index
    %c0_2 = arith.constant 0 : index
    %1 = vector.load %arg2[%c0_1, %c0_2] : memref<128x128xbf16, #tpu.memory_space<vmem>>, vector<128x128xbf16>
    %cst = arith.constant dense<0.000000e+00> : vector<8x128xf32>
    %2 = tpu.matmul %0, %1, %cst {dimension_numbers = #tpu.dot_dimension_numbers<[1], [0], [0], [1], [0, 0, 1, 1], [], []>} : vector<8x128xbf16>, vector<128x128xbf16>, vector<8x128xf32> -> vector<8x128xf32>
    %c0_3 = arith.constant 0 : index
    %c0_4 = arith.constant 0 : index
    %3 = vector.load %arg3[%c0_3, %c0_4] : memref<1x128xf32, #tpu.memory_space<vmem>>, vector<1x128xf32>
    %4 = vector.broadcast %3 : vector<1x128xf32> to vector<8x128xf32>
    %5 = arith.addf %2, %4 : vector<8x128xf32>
    %c0_5 = arith.constant 0 : index
    %c0_6 = arith.constant 0 : index
    %6 = vector.load %arg4[%c0_5, %c0_6] : memref<8x128xf32, #tpu.memory_space<vmem>>, vector<8x128xf32>
    %7 = arith.addf %5, %6 : vector<8x128xf32>
    %c0_7 = arith.constant 0 : index
    %c0_8 = arith.constant 0 : index
    %8 = vector.load %arg5[%c0_7, %c0_8] : memref<1x128xf32, #tpu.memory_space<vmem>>, vector<1x128xf32>
    %c0_9 = arith.constant 0 : index
    %c0_10 = arith.constant 0 : index
    %9 = vector.load %arg6[%c0_9, %c0_10] : memref<1x128xf32, #tpu.memory_space<vmem>>, vector<1x128xf32>
    %cst_11 = arith.constant dense<0.000000e+00> : vector<8xf32>
    %10 = vector.multi_reduction <add>, %7, %cst_11 [1] : vector<8x128xf32> to vector<8xf32>
    %11 = vector.shape_cast %10 : vector<8xf32> to vector<8x1xf32>
    %cst_12 = arith.constant 1.280000e+02 : f32
    %12 = vector.broadcast %cst_12 : f32 to vector<8x1xf32>
    %13 = arith.divf %11, %12 : vector<8x1xf32>
    %14 = vector.broadcast %13 : vector<8x1xf32> to vector<8x128xf32>
    %15 = arith.subf %7, %14 : vector<8x128xf32>
    %16 = arith.mulf %15, %15 : vector<8x128xf32>
    %cst_13 = arith.constant dense<0.000000e+00> : vector<8xf32>
    %17 = vector.multi_reduction <add>, %16, %cst_13 [1] : vector<8x128xf32> to vector<8xf32>
    %18 = vector.shape_cast %17 : vector<8xf32> to vector<8x1xf32>
    %cst_14 = arith.constant 1.280000e+02 : f32
    %19 = vector.broadcast %cst_14 : f32 to vector<8x1xf32>
    %20 = arith.divf %18, %19 : vector<8x1xf32>
    %21 = vector.broadcast %13 : vector<8x1xf32> to vector<8x128xf32>
    %22 = arith.subf %7, %21 : vector<8x128xf32>
    %cst_15 = arith.constant 9.99999974E-6 : f32
    %23 = vector.broadcast %cst_15 : f32 to vector<8x1xf32>
    %24 = arith.addf %20, %23 : vector<8x1xf32>
    %25 = math.rsqrt %24 : vector<8x1xf32>
    %26 = vector.broadcast %25 : vector<8x1xf32> to vector<8x128xf32>
    %27 = arith.mulf %22, %26 : vector<8x128xf32>
    %28 = vector.broadcast %8 : vector<1x128xf32> to vector<8x128xf32>
    %29 = arith.mulf %27, %28 : vector<8x128xf32>
    %30 = vector.broadcast %9 : vector<1x128xf32> to vector<8x128xf32>
    %31 = arith.addf %29, %30 : vector<8x128xf32>
    %c0_16 = arith.constant 0 : index
    %c0_17 = arith.constant 0 : index
    %32 = vector.load %arg7[%c0_16, %c0_17] : memref<8x128xf32, #tpu.memory_space<vmem>>, vector<8x128xf32>
    tpu.vector_store %arg7[%c0_16, %c0_17], %31 {strides = array<i32>} : memref<8x128xf32, #tpu.memory_space<vmem>>, vector<8x128xf32>,
    return
  }
  func.func @transform_0(%arg0: i32) -> (i32, i32) {
    %c0_i32 = arith.constant 0 : i32
    %c0_i32_0 = arith.constant 0 : i32
    return %arg0, %c0_i32 : i32, i32
  }
  func.func @transform_1(%arg0: i32) -> (i32, i32) {
    %c0_i32 = arith.constant 0 : i32
    %c0_i32_0 = arith.constant 0 : i32
    %c0_i32_1 = arith.constant 0 : i32
    return %c0_i32, %c0_i32_0 : i32, i32
  }
  func.func @transform_2(%arg0: i32) -> (i32, i32) {
    %c0_i32 = arith.constant 0 : i32
    %c0_i32_0 = arith.constant 0 : i32
    %c0_i32_1 = arith.constant 0 : i32
    return %c0_i32, %c0_i32_0 : i32, i32
  }
  func.func @transform_3(%arg0: i32) -> (i32, i32) {
    %c0_i32 = arith.constant 0 : i32
    %c0_i32_0 = arith.constant 0 : i32
    return %arg0, %c0_i32 : i32, i32
  }
  func.func @transform_4(%arg0: i32) -> (i32, i32) {
    %c0_i32 = arith.constant 0 : i32
    %c0_i32_0 = arith.constant 0 : i32
    %c0_i32_1 = arith.constant 0 : i32
    return %c0_i32, %c0_i32_0 : i32, i32
  }
  func.func @transform_5(%arg0: i32) -> (i32, i32) {
    %c0_i32 = arith.constant 0 : i32
    %c0_i32_0 = arith.constant 0 : i32
    %c0_i32_1 = arith.constant 0 : i32
    return %c0_i32, %c0_i32_0 : i32, i32
  }
  func.func @transform_6(%arg0: i32) -> (i32, i32) {
    %c0_i32 = arith.constant 0 : i32
    %c0_i32_0 = arith.constant 0 : i32
    return %arg0, %c0_i32 : i32, i32
  }
}

module attributes {stable_mosaic.version = 11 : i64} {
  func.func @_layernorm_kernel(%arg0: i32, %arg1: memref<8x128xf32, #tpu.memory_space<vmem>>, %arg2: memref<1x128xf32, #tpu.memory_space<vmem>>, %arg3: memref<1x128xf32, #tpu.memory_space<vmem>>, %arg4: memref<8x128xf32, #tpu.memory_space<vmem>>) attributes {dimension_semantics = [#tpu.dimension_semantics<parallel>], iteration_bounds = array<i64: 1>, scalar_prefetch = 0 : i64, scratch_operands = 0 : i64, tpu.core_type = #tpu.core_type<tc>, window_params = [{transform_indices = @transform_0, window_bounds = array<i64: 8, 128>}, {pipeline_mode = #tpu.pipeline_mode<synchronous>, transform_indices = @transform_1, window_bounds = array<i64: 1, 128>}, {pipeline_mode = #tpu.pipeline_mode<synchronous>, transform_indices = @transform_2, window_bounds = array<i64: 1, 128>}, {transform_indices = @transform_3, window_bounds = array<i64: 8, 128>}]} {
    %c0 = arith.constant 0 : index
    %c0_0 = arith.constant 0 : index
    %0 = vector.load %arg1[%c0, %c0_0] : memref<8x128xf32, #tpu.memory_space<vmem>>, vector<8x128xf32>
    %c0_1 = arith.constant 0 : index
    %c0_2 = arith.constant 0 : index
    %1 = vector.load %arg2[%c0_1, %c0_2] : memref<1x128xf32, #tpu.memory_space<vmem>>, vector<1x128xf32>
    %c0_3 = arith.constant 0 : index
    %c0_4 = arith.constant 0 : index
    %2 = vector.load %arg3[%c0_3, %c0_4] : memref<1x128xf32, #tpu.memory_space<vmem>>, vector<1x128xf32>
    %cst = arith.constant dense<0.000000e+00> : vector<8xf32>
    %3 = vector.multi_reduction <add>, %0, %cst [1] : vector<8x128xf32> to vector<8xf32>
    %4 = vector.shape_cast %3 : vector<8xf32> to vector<8x1xf32>
    %cst_5 = arith.constant 1.280000e+02 : f32
    %5 = vector.broadcast %cst_5 : f32 to vector<8x1xf32>
    %6 = arith.divf %4, %5 : vector<8x1xf32>
    %7 = vector.broadcast %6 : vector<8x1xf32> to vector<8x128xf32>
    %8 = arith.subf %0, %7 : vector<8x128xf32>
    %9 = arith.mulf %8, %8 : vector<8x128xf32>
    %cst_6 = arith.constant dense<0.000000e+00> : vector<8xf32>
    %10 = vector.multi_reduction <add>, %9, %cst_6 [1] : vector<8x128xf32> to vector<8xf32>
    %11 = vector.shape_cast %10 : vector<8xf32> to vector<8x1xf32>
    %cst_7 = arith.constant 1.280000e+02 : f32
    %12 = vector.broadcast %cst_7 : f32 to vector<8x1xf32>
    %13 = arith.divf %11, %12 : vector<8x1xf32>
    %14 = vector.broadcast %6 : vector<8x1xf32> to vector<8x128xf32>
    %15 = arith.subf %0, %14 : vector<8x128xf32>
    %cst_8 = arith.constant 9.99999974E-6 : f32
    %16 = vector.broadcast %cst_8 : f32 to vector<8x1xf32>
    %17 = arith.addf %13, %16 : vector<8x1xf32>
    %18 = math.rsqrt %17 : vector<8x1xf32>
    %19 = vector.broadcast %18 : vector<8x1xf32> to vector<8x128xf32>
    %20 = arith.mulf %15, %19 : vector<8x128xf32>
    %21 = vector.broadcast %1 : vector<1x128xf32> to vector<8x128xf32>
    %22 = arith.mulf %20, %21 : vector<8x128xf32>
    %23 = vector.broadcast %2 : vector<1x128xf32> to vector<8x128xf32>
    %24 = arith.addf %22, %23 : vector<8x128xf32>
    %c0_9 = arith.constant 0 : index
    %c0_10 = arith.constant 0 : index
    %25 = vector.load %arg4[%c0_9, %c0_10] : memref<8x128xf32, #tpu.memory_space<vmem>>, vector<8x128xf32>
    tpu.vector_store %arg4[%c0_9, %c0_10], %24 {strides = array<i32>} : memref<8x128xf32, #tpu.memory_space<vmem>>, vector<8x128xf32>,
    return
  }
  func.func @transform_0(%arg0: i32) -> (i32, i32) {
    %c0_i32 = arith.constant 0 : i32
    %c0_i32_0 = arith.constant 0 : i32
    return %arg0, %c0_i32 : i32, i32
  }
  func.func @transform_1(%arg0: i32) -> (i32, i32) {
    %c0_i32 = arith.constant 0 : i32
    %c0_i32_0 = arith.constant 0 : i32
    %c0_i32_1 = arith.constant 0 : i32
    return %c0_i32, %c0_i32_0 : i32, i32
  }
  func.func @transform_2(%arg0: i32) -> (i32, i32) {
    %c0_i32 = arith.constant 0 : i32
    %c0_i32_0 = arith.constant 0 : i32
    %c0_i32_1 = arith.constant 0 : i32
    return %c0_i32, %c0_i32_0 : i32, i32
  }
  func.func @transform_3(%arg0: i32) -> (i32, i32) {
    %c0_i32 = arith.constant 0 : i32
    %c0_i32_0 = arith.constant 0 : i32
    return %arg0, %c0_i32 : i32, i32
  }
}

module attributes {stable_mosaic.version = 11 : i64} {
  func.func @_ffn_ln_kernel(%arg0: i32, %arg1: memref<8x128xf32, #tpu.memory_space<vmem>>, %arg2: memref<128x256xbf16, #tpu.memory_space<vmem>>, %arg3: memref<1x256xf32, #tpu.memory_space<vmem>>, %arg4: memref<256x128xbf16, #tpu.memory_space<vmem>>, %arg5: memref<1x128xf32, #tpu.memory_space<vmem>>, %arg6: memref<1x128xf32, #tpu.memory_space<vmem>>, %arg7: memref<1x128xf32, #tpu.memory_space<vmem>>, %arg8: memref<8x128xf32, #tpu.memory_space<vmem>>) attributes {dimension_semantics = [#tpu.dimension_semantics<parallel>], iteration_bounds = array<i64: 1>, scalar_prefetch = 0 : i64, scratch_operands = 0 : i64, tpu.core_type = #tpu.core_type<tc>, window_params = [{transform_indices = @transform_0, window_bounds = array<i64: 8, 128>}, {pipeline_mode = #tpu.pipeline_mode<synchronous>, transform_indices = @transform_1, window_bounds = array<i64: 128, 256>}, {pipeline_mode = #tpu.pipeline_mode<synchronous>, transform_indices = @transform_2, window_bounds = array<i64: 1, 256>}, {pipeline_mode = #tpu.pipeline_mode<synchronous>, transform_indices = @transform_3, window_bounds = array<i64: 256, 128>}, {pipeline_mode = #tpu.pipeline_mode<synchronous>, transform_indices = @transform_4, window_bounds = array<i64: 1, 128>}, {pipeline_mode = #tpu.pipeline_mode<synchronous>, transform_indices = @transform_5, window_bounds = array<i64: 1, 128>}, {pipeline_mode = #tpu.pipeline_mode<synchronous>, transform_indices = @transform_6, window_bounds = array<i64: 1, 128>}, {transform_indices = @transform_7, window_bounds = array<i64: 8, 128>}]} {
    %c0 = arith.constant 0 : index
    %c0_0 = arith.constant 0 : index
    %0 = vector.load %arg1[%c0, %c0_0] : memref<8x128xf32, #tpu.memory_space<vmem>>, vector<8x128xf32>
    %1 = arith.truncf %0 : vector<8x128xf32> to vector<8x128xbf16>
    %c0_1 = arith.constant 0 : index
    %c0_2 = arith.constant 0 : index
    %2 = vector.load %arg2[%c0_1, %c0_2] : memref<128x256xbf16, #tpu.memory_space<vmem>>, vector<128x256xbf16>
    %cst = arith.constant dense<0.000000e+00> : vector<8x256xf32>
    %3 = tpu.matmul %1, %2, %cst {dimension_numbers = #tpu.dot_dimension_numbers<[1], [0], [0], [1], [0, 0, 1, 1], [], []>} : vector<8x128xbf16>, vector<128x256xbf16>, vector<8x256xf32> -> vector<8x256xf32>
    %c0_3 = arith.constant 0 : index
    %c0_4 = arith.constant 0 : index
    %4 = vector.load %arg3[%c0_3, %c0_4] : memref<1x256xf32, #tpu.memory_space<vmem>>, vector<1x256xf32>
    %5 = vector.broadcast %4 : vector<1x256xf32> to vector<8x256xf32>
    %6 = arith.addf %3, %5 : vector<8x256xf32>
    %cst_5 = arith.constant 0.000000e+00 : f32
    %7 = vector.broadcast %cst_5 : f32 to vector<8x256xf32>
    %8 = arith.maximumf %6, %7 : vector<8x256xf32>
    %9 = arith.truncf %8 : vector<8x256xf32> to vector<8x256xbf16>
    %c0_6 = arith.constant 0 : index
    %c0_7 = arith.constant 0 : index
    %10 = vector.load %arg4[%c0_6, %c0_7] : memref<256x128xbf16, #tpu.memory_space<vmem>>, vector<256x128xbf16>
    %cst_8 = arith.constant dense<0.000000e+00> : vector<8x128xf32>
    %11 = tpu.matmul %9, %10, %cst_8 {dimension_numbers = #tpu.dot_dimension_numbers<[1], [0], [0], [1], [0, 0, 1, 1], [], []>} : vector<8x256xbf16>, vector<256x128xbf16>, vector<8x128xf32> -> vector<8x128xf32>
    %c0_9 = arith.constant 0 : index
    %c0_10 = arith.constant 0 : index
    %12 = vector.load %arg5[%c0_9, %c0_10] : memref<1x128xf32, #tpu.memory_space<vmem>>, vector<1x128xf32>
    %13 = vector.broadcast %12 : vector<1x128xf32> to vector<8x128xf32>
    %14 = arith.addf %11, %13 : vector<8x128xf32>
    %15 = arith.addf %0, %14 : vector<8x128xf32>
    %c0_11 = arith.constant 0 : index
    %c0_12 = arith.constant 0 : index
    %16 = vector.load %arg6[%c0_11, %c0_12] : memref<1x128xf32, #tpu.memory_space<vmem>>, vector<1x128xf32>
    %c0_13 = arith.constant 0 : index
    %c0_14 = arith.constant 0 : index
    %17 = vector.load %arg7[%c0_13, %c0_14] : memref<1x128xf32, #tpu.memory_space<vmem>>, vector<1x128xf32>
    %cst_15 = arith.constant dense<0.000000e+00> : vector<8xf32>
    %18 = vector.multi_reduction <add>, %15, %cst_15 [1] : vector<8x128xf32> to vector<8xf32>
    %19 = vector.shape_cast %18 : vector<8xf32> to vector<8x1xf32>
    %cst_16 = arith.constant 1.280000e+02 : f32
    %20 = vector.broadcast %cst_16 : f32 to vector<8x1xf32>
    %21 = arith.divf %19, %20 : vector<8x1xf32>
    %22 = vector.broadcast %21 : vector<8x1xf32> to vector<8x128xf32>
    %23 = arith.subf %15, %22 : vector<8x128xf32>
    %24 = arith.mulf %23, %23 : vector<8x128xf32>
    %cst_17 = arith.constant dense<0.000000e+00> : vector<8xf32>
    %25 = vector.multi_reduction <add>, %24, %cst_17 [1] : vector<8x128xf32> to vector<8xf32>
    %26 = vector.shape_cast %25 : vector<8xf32> to vector<8x1xf32>
    %cst_18 = arith.constant 1.280000e+02 : f32
    %27 = vector.broadcast %cst_18 : f32 to vector<8x1xf32>
    %28 = arith.divf %26, %27 : vector<8x1xf32>
    %29 = vector.broadcast %21 : vector<8x1xf32> to vector<8x128xf32>
    %30 = arith.subf %15, %29 : vector<8x128xf32>
    %cst_19 = arith.constant 9.99999974E-6 : f32
    %31 = vector.broadcast %cst_19 : f32 to vector<8x1xf32>
    %32 = arith.addf %28, %31 : vector<8x1xf32>
    %33 = math.rsqrt %32 : vector<8x1xf32>
    %34 = vector.broadcast %33 : vector<8x1xf32> to vector<8x128xf32>
    %35 = arith.mulf %30, %34 : vector<8x128xf32>
    %36 = vector.broadcast %16 : vector<1x128xf32> to vector<8x128xf32>
    %37 = arith.mulf %35, %36 : vector<8x128xf32>
    %38 = vector.broadcast %17 : vector<1x128xf32> to vector<8x128xf32>
    %39 = arith.addf %37, %38 : vector<8x128xf32>
    %c0_20 = arith.constant 0 : index
    %c0_21 = arith.constant 0 : index
    %40 = vector.load %arg8[%c0_20, %c0_21] : memref<8x128xf32, #tpu.memory_space<vmem>>, vector<8x128xf32>
    tpu.vector_store %arg8[%c0_20, %c0_21], %39 {strides = array<i32>} : memref<8x128xf32, #tpu.memory_space<vmem>>, vector<8x128xf32>,
    return
  }
  func.func @transform_0(%arg0: i32) -> (i32, i32) {
    %c0_i32 = arith.constant 0 : i32
    %c0_i32_0 = arith.constant 0 : i32
    return %arg0, %c0_i32 : i32, i32
  }
  func.func @transform_1(%arg0: i32) -> (i32, i32) {
    %c0_i32 = arith.constant 0 : i32
    %c0_i32_0 = arith.constant 0 : i32
    %c0_i32_1 = arith.constant 0 : i32
    return %c0_i32, %c0_i32_0 : i32, i32
  }
  func.func @transform_2(%arg0: i32) -> (i32, i32) {
    %c0_i32 = arith.constant 0 : i32
    %c0_i32_0 = arith.constant 0 : i32
    %c0_i32_1 = arith.constant 0 : i32
    return %c0_i32, %c0_i32_0 : i32, i32
  }
  func.func @transform_3(%arg0: i32) -> (i32, i32) {
    %c0_i32 = arith.constant 0 : i32
    %c0_i32_0 = arith.constant 0 : i32
    %c0_i32_1 = arith.constant 0 : i32
    return %c0_i32, %c0_i32_0 : i32, i32
  }
  func.func @transform_4(%arg0: i32) -> (i32, i32) {
    %c0_i32 = arith.constant 0 : i32
    %c0_i32_0 = arith.constant 0 : i32
    %c0_i32_1 = arith.constant 0 : i32
    return %c0_i32, %c0_i32_0 : i32, i32
  }
  func.func @transform_5(%arg0: i32) -> (i32, i32) {
    %c0_i32 = arith.constant 0 : i32
    %c0_i32_0 = arith.constant 0 : i32
    %c0_i32_1 = arith.constant 0 : i32
    return %c0_i32, %c0_i32_0 : i32, i32
  }
  func.func @transform_6(%arg0: i32) -> (i32, i32) {
    %c0_i32 = arith.constant 0 : i32
    %c0_i32_0 = arith.constant 0 : i32
    %c0_i32_1 = arith.constant 0 : i32
    return %c0_i32, %c0_i32_0 : i32, i32
  }
  func.func @transform_7(%arg0: i32) -> (i32, i32) {
    %c0_i32 = arith.constant 0 : i32
    %c0_i32_0 = arith.constant 0 : i32
    return %arg0, %c0_i32 : i32, i32
  }
}

module attributes {stable_mosaic.version = 11 : i64} {
  func.func @_matmul_kernel(%arg0: i32, %arg1: i32, %arg2: i32, %arg3: memref<8x128xf32, #tpu.memory_space<vmem>>, %arg4: memref<128x256xbf16, #tpu.memory_space<vmem>>, %arg5: memref<1x256xf32, #tpu.memory_space<vmem>>, %arg6: memref<8x256xbf16, #tpu.memory_space<vmem>>, %arg7: memref<8x256xf32, #tpu.memory_space<vmem>>) attributes {dimension_semantics = [#tpu.dimension_semantics<parallel>, #tpu.dimension_semantics<parallel>, #tpu.dimension_semantics<arbitrary>], iteration_bounds = array<i64: 1, 1, 1>, scalar_prefetch = 0 : i64, scratch_operands = 1 : i64, tpu.core_type = #tpu.core_type<tc>, window_params = [{transform_indices = @transform_0, window_bounds = array<i64: 8, 128>}, {transform_indices = @transform_1, window_bounds = array<i64: 128, 256>}, {transform_indices = @transform_2, window_bounds = array<i64: 1, 256>}, {transform_indices = @transform_3, window_bounds = array<i64: 8, 256>}]} {
    %c0_i32 = arith.constant 0 : i32
    %0 = arith.cmpi eq, %arg2, %c0_i32 : i32
    %1 = arith.extui %0 : i1 to i32
    %c0_i32_0 = arith.constant 0 : i32
    %2 = arith.cmpi ne, %1, %c0_i32_0 : i32
    scf.if %2 {
      %cst_10 = arith.constant 0.000000e+00 : f32
      %13 = vector.broadcast %cst_10 : f32 to vector<8x256xf32>
      %c0_11 = arith.constant 0 : index
      %c0_12 = arith.constant 0 : index
      %14 = vector.load %arg7[%c0_11, %c0_12] : memref<8x256xf32, #tpu.memory_space<vmem>>, vector<8x256xf32>
      tpu.vector_store %arg7[%c0_11, %c0_12], %13 {strides = array<i32>} : memref<8x256xf32, #tpu.memory_space<vmem>>, vector<8x256xf32>,
    } else {
    }
    %c0 = arith.constant 0 : index
    %c0_1 = arith.constant 0 : index
    %3 = vector.load %arg7[%c0, %c0_1] : memref<8x256xf32, #tpu.memory_space<vmem>>, vector<8x256xf32>
    %c0_2 = arith.constant 0 : index
    %c0_3 = arith.constant 0 : index
    %4 = vector.load %arg3[%c0_2, %c0_3] : memref<8x128xf32, #tpu.memory_space<vmem>>, vector<8x128xf32>
    %5 = arith.truncf %4 : vector<8x128xf32> to vector<8x128xbf16>
    %c0_4 = arith.constant 0 : index
    %c0_5 = arith.constant 0 : index
    %6 = vector.load %arg4[%c0_4, %c0_5] : memref<128x256xbf16, #tpu.memory_space<vmem>>, vector<128x256xbf16>
    %cst = arith.constant dense<0.000000e+00> : vector<8x256xf32>
    %7 = tpu.matmul %5, %6, %cst {dimension_numbers = #tpu.dot_dimension_numbers<[1], [0], [0], [1], [0, 0, 1, 1], [], []>} : vector<8x128xbf16>, vector<128x256xbf16>, vector<8x256xf32> -> vector<8x256xf32>
    %8 = arith.addf %3, %7 : vector<8x256xf32>
    %c0_6 = arith.constant 0 : index
    %c0_7 = arith.constant 0 : index
    %9 = vector.load %arg7[%c0_6, %c0_7] : memref<8x256xf32, #tpu.memory_space<vmem>>, vector<8x256xf32>
    tpu.vector_store %arg7[%c0_6, %c0_7], %8 {strides = array<i32>} : memref<8x256xf32, #tpu.memory_space<vmem>>, vector<8x256xf32>,
    %c0_i32_8 = arith.constant 0 : i32
    %10 = arith.cmpi eq, %arg2, %c0_i32_8 : i32
    %11 = arith.extui %10 : i1 to i32
    %c0_i32_9 = arith.constant 0 : i32
    %12 = arith.cmpi ne, %11, %c0_i32_9 : i32
    scf.if %12 {
      %c0_10 = arith.constant 0 : index
      %c0_11 = arith.constant 0 : index
      %13 = vector.load %arg7[%c0_10, %c0_11] : memref<8x256xf32, #tpu.memory_space<vmem>>, vector<8x256xf32>
      %c0_12 = arith.constant 0 : index
      %c0_13 = arith.constant 0 : index
      %14 = vector.load %arg5[%c0_12, %c0_13] : memref<1x256xf32, #tpu.memory_space<vmem>>, vector<1x256xf32>
      %15 = vector.broadcast %14 : vector<1x256xf32> to vector<8x256xf32>
      %16 = arith.addf %13, %15 : vector<8x256xf32>
      %17 = arith.truncf %16 : vector<8x256xf32> to vector<8x256xbf16>
      %c0_14 = arith.constant 0 : index
      %c0_15 = arith.constant 0 : index
      %18 = vector.load %arg6[%c0_14, %c0_15] : memref<8x256xbf16, #tpu.memory_space<vmem>>, vector<8x256xbf16>
      tpu.vector_store %arg6[%c0_14, %c0_15], %17 {strides = array<i32>} : memref<8x256xbf16, #tpu.memory_space<vmem>>, vector<8x256xbf16>,
    } else {
    }
    return
  }
  func.func @transform_0(%arg0: i32, %arg1: i32, %arg2: i32) -> (i32, i32) {
    %c0_i32 = arith.constant 0 : i32
    return %arg0, %arg2 : i32, i32
  }
  func.func @transform_1(%arg0: i32, %arg1: i32, %arg2: i32) -> (i32, i32) {
    %c0_i32 = arith.constant 0 : i32
    return %arg2, %arg1 : i32, i32
  }
  func.func @transform_2(%arg0: i32, %arg1: i32, %arg2: i32) -> (i32, i32) {
    %c0_i32 = arith.constant 0 : i32
    %c0_i32_0 = arith.constant 0 : i32
    return %c0_i32, %arg1 : i32, i32
  }
  func.func @transform_3(%arg0: i32, %arg1: i32, %arg2: i32) -> (i32, i32) {
    %c0_i32 = arith.constant 0 : i32
    return %arg0, %arg1 : i32, i32
  }
}

module attributes {stable_mosaic.version = 11 : i64} {
  func.func @_matmul_kernel(%arg0: i32, %arg1: i32, %arg2: i32, %arg3: memref<8x128xf32, #tpu.memory_space<vmem>>, %arg4: memref<128x128xbf16, #tpu.memory_space<vmem>>, %arg5: memref<1x128xf32, #tpu.memory_space<vmem>>, %arg6: memref<8x128xbf16, #tpu.memory_space<vmem>>, %arg7: memref<8x128xf32, #tpu.memory_space<vmem>>) attributes {dimension_semantics = [#tpu.dimension_semantics<parallel>, #tpu.dimension_semantics<parallel>, #tpu.dimension_semantics<arbitrary>], iteration_bounds = array<i64: 1, 1, 1>, scalar_prefetch = 0 : i64, scratch_operands = 1 : i64, tpu.core_type = #tpu.core_type<tc>, window_params = [{transform_indices = @transform_0, window_bounds = array<i64: 8, 128>}, {transform_indices = @transform_1, window_bounds = array<i64: 128, 128>}, {transform_indices = @transform_2, window_bounds = array<i64: 1, 128>}, {transform_indices = @transform_3, window_bounds = array<i64: 8, 128>}]} {
    %c0_i32 = arith.constant 0 : i32
    %0 = arith.cmpi eq, %arg2, %c0_i32 : i32
    %1 = arith.extui %0 : i1 to i32
    %c0_i32_0 = arith.constant 0 : i32
    %2 = arith.cmpi ne, %1, %c0_i32_0 : i32
    scf.if %2 {
      %cst_10 = arith.constant 0.000000e+00 : f32
      %13 = vector.broadcast %cst_10 : f32 to vector<8x128xf32>
      %c0_11 = arith.constant 0 : index
      %c0_12 = arith.constant 0 : index
      %14 = vector.load %arg7[%c0_11, %c0_12] : memref<8x128xf32, #tpu.memory_space<vmem>>, vector<8x128xf32>
      tpu.vector_store %arg7[%c0_11, %c0_12], %13 {strides = array<i32>} : memref<8x128xf32, #tpu.memory_space<vmem>>, vector<8x128xf32>,
    } else {
    }
    %c0 = arith.constant 0 : index
    %c0_1 = arith.constant 0 : index
    %3 = vector.load %arg7[%c0, %c0_1] : memref<8x128xf32, #tpu.memory_space<vmem>>, vector<8x128xf32>
    %c0_2 = arith.constant 0 : index
    %c0_3 = arith.constant 0 : index
    %4 = vector.load %arg3[%c0_2, %c0_3] : memref<8x128xf32, #tpu.memory_space<vmem>>, vector<8x128xf32>
    %5 = arith.truncf %4 : vector<8x128xf32> to vector<8x128xbf16>
    %c0_4 = arith.constant 0 : index
    %c0_5 = arith.constant 0 : index
    %6 = vector.load %arg4[%c0_4, %c0_5] : memref<128x128xbf16, #tpu.memory_space<vmem>>, vector<128x128xbf16>
    %cst = arith.constant dense<0.000000e+00> : vector<8x128xf32>
    %7 = tpu.matmul %5, %6, %cst {dimension_numbers = #tpu.dot_dimension_numbers<[1], [0], [0], [1], [0, 0, 1, 1], [], []>} : vector<8x128xbf16>, vector<128x128xbf16>, vector<8x128xf32> -> vector<8x128xf32>
    %8 = arith.addf %3, %7 : vector<8x128xf32>
    %c0_6 = arith.constant 0 : index
    %c0_7 = arith.constant 0 : index
    %9 = vector.load %arg7[%c0_6, %c0_7] : memref<8x128xf32, #tpu.memory_space<vmem>>, vector<8x128xf32>
    tpu.vector_store %arg7[%c0_6, %c0_7], %8 {strides = array<i32>} : memref<8x128xf32, #tpu.memory_space<vmem>>, vector<8x128xf32>,
    %c0_i32_8 = arith.constant 0 : i32
    %10 = arith.cmpi eq, %arg2, %c0_i32_8 : i32
    %11 = arith.extui %10 : i1 to i32
    %c0_i32_9 = arith.constant 0 : i32
    %12 = arith.cmpi ne, %11, %c0_i32_9 : i32
    scf.if %12 {
      %c0_10 = arith.constant 0 : index
      %c0_11 = arith.constant 0 : index
      %13 = vector.load %arg7[%c0_10, %c0_11] : memref<8x128xf32, #tpu.memory_space<vmem>>, vector<8x128xf32>
      %c0_12 = arith.constant 0 : index
      %c0_13 = arith.constant 0 : index
      %14 = vector.load %arg5[%c0_12, %c0_13] : memref<1x128xf32, #tpu.memory_space<vmem>>, vector<1x128xf32>
      %15 = vector.broadcast %14 : vector<1x128xf32> to vector<8x128xf32>
      %16 = arith.addf %13, %15 : vector<8x128xf32>
      %17 = arith.truncf %16 : vector<8x128xf32> to vector<8x128xbf16>
      %c0_14 = arith.constant 0 : index
      %c0_15 = arith.constant 0 : index
      %18 = vector.load %arg6[%c0_14, %c0_15] : memref<8x128xbf16, #tpu.memory_space<vmem>>, vector<8x128xbf16>
      tpu.vector_store %arg6[%c0_14, %c0_15], %17 {strides = array<i32>} : memref<8x128xbf16, #tpu.memory_space<vmem>>, vector<8x128xbf16>,
    } else {
    }
    return
  }
  func.func @transform_0(%arg0: i32, %arg1: i32, %arg2: i32) -> (i32, i32) {
    %c0_i32 = arith.constant 0 : i32
    return %arg0, %arg2 : i32, i32
  }
  func.func @transform_1(%arg0: i32, %arg1: i32, %arg2: i32) -> (i32, i32) {
    %c0_i32 = arith.constant 0 : i32
    return %arg2, %arg1 : i32, i32
  }
  func.func @transform_2(%arg0: i32, %arg1: i32, %arg2: i32) -> (i32, i32) {
    %c0_i32 = arith.constant 0 : i32
    %c0_i32_0 = arith.constant 0 : i32
    return %c0_i32, %arg1 : i32, i32
  }
  func.func @transform_3(%arg0: i32, %arg1: i32, %arg2: i32) -> (i32, i32) {
    %c0_i32 = arith.constant 0 : i32
    return %arg0, %arg1 : i32, i32
  }
}

module attributes {stable_mosaic.version = 11 : i64} {
  func.func @_mha_kernel(%arg0: i32, %arg1: i32, %arg2: memref<8x128xbf16, #tpu.memory_space<vmem>>, %arg3: memref<8x128xbf16, #tpu.memory_space<vmem>>, %arg4: memref<8x128xbf16, #tpu.memory_space<vmem>>, %arg5: memref<1x8xf32, #tpu.memory_space<vmem>>, %arg6: memref<8x128xbf16, #tpu.memory_space<vmem>>) attributes {dimension_semantics = [#tpu.dimension_semantics<parallel>, #tpu.dimension_semantics<parallel>], iteration_bounds = array<i64: 1, 1>, scalar_prefetch = 0 : i64, scratch_operands = 0 : i64, tpu.core_type = #tpu.core_type<tc>, window_params = [{transform_indices = @transform_0, window_bounds = array<i64: 8, 128>}, {transform_indices = @transform_1, window_bounds = array<i64: 8, 128>}, {transform_indices = @transform_2, window_bounds = array<i64: 8, 128>}, {pipeline_mode = #tpu.pipeline_mode<synchronous>, transform_indices = @transform_3, window_bounds = array<i64: 1, 8>}, {transform_indices = @transform_4, window_bounds = array<i64: 8, 128>}]} {
    %c0 = arith.constant 0 : index
    %c0_0 = arith.constant 0 : index
    %0 = vector.load %arg2[%c0, %c0_0] : memref<8x128xbf16, #tpu.memory_space<vmem>>, vector<8x16xbf16>
    %c0_1 = arith.constant 0 : index
    %c0_2 = arith.constant 0 : index
    %1 = vector.load %arg3[%c0_1, %c0_2] : memref<8x128xbf16, #tpu.memory_space<vmem>>, vector<8x16xbf16>
    %c0_3 = arith.constant 0 : index
    %c0_4 = arith.constant 0 : index
    %2 = vector.load %arg4[%c0_3, %c0_4] : memref<8x128xbf16, #tpu.memory_space<vmem>>, vector<8x16xbf16>
    %cst = arith.constant dense<0.000000e+00> : vector<8x8xf32>
    %3 = tpu.matmul %0, %1, %cst {dimension_numbers = #tpu.dot_dimension_numbers<[1], [1], [0], [0], [0, 0, 1, 0], [], []>} : vector<8x16xbf16>, vector<8x16xbf16>, vector<8x8xf32> -> vector<8x8xf32>
    %cst_5 = arith.constant 2.500000e-01 : f32
    %4 = vector.broadcast %cst_5 : f32 to vector<8x8xf32>
    %5 = arith.mulf %3, %4 : vector<8x8xf32>
    %c0_6 = arith.constant 0 : index
    %c0_7 = arith.constant 0 : index
    %6 = vector.load %arg5[%c0_6, %c0_7] : memref<1x8xf32, #tpu.memory_space<vmem>>, vector<1x8xf32>
    %7 = vector.broadcast %6 : vector<1x8xf32> to vector<8x8xf32>
    %8 = arith.addf %5, %7 : vector<8x8xf32>
    %cst_8 = arith.constant dense<0xFF800000> : vector<8xf32>
    %9 = vector.multi_reduction <maximumf>, %8, %cst_8 [1] : vector<8x8xf32> to vector<8xf32>
    %10 = vector.shape_cast %9 : vector<8xf32> to vector<8x1xf32>
    %11 = vector.broadcast %10 : vector<8x1xf32> to vector<8x8xf32>
    %12 = arith.subf %8, %11 : vector<8x8xf32>
    %13 = math.exp %12 : vector<8x8xf32>
    %cst_9 = arith.constant dense<0.000000e+00> : vector<8xf32>
    %14 = vector.multi_reduction <add>, %13, %cst_9 [1] : vector<8x8xf32> to vector<8xf32>
    %15 = vector.shape_cast %14 : vector<8xf32> to vector<8x1xf32>
    %16 = tpu.reciprocal %15 {approx = true} : vector<8x1xf32> -> vector<8x1xf32>
    %17 = vector.broadcast %16 : vector<8x1xf32> to vector<8x8xf32>
    %18 = arith.mulf %13, %17 : vector<8x8xf32>
    %19 = arith.truncf %18 : vector<8x8xf32> to vector<8x8xbf16>
    %cst_10 = arith.constant dense<0.000000e+00> : vector<8x16xf32>
    %20 = tpu.matmul %19, %2, %cst_10 {dimension_numbers = #tpu.dot_dimension_numbers<[1], [0], [0], [1], [0, 0, 1, 1], [], []>} : vector<8x8xbf16>, vector<8x16xbf16>, vector<8x16xf32> -> vector<8x16xf32>
    %c0_11 = arith.constant 0 : index
    %c16 = arith.constant 16 : index
    %21 = vector.load %arg2[%c0_11, %c16] : memref<8x128xbf16, #tpu.memory_space<vmem>>, vector<8x16xbf16>
    %c0_12 = arith.constant 0 : index
    %c16_13 = arith.constant 16 : index
    %22 = vector.load %arg3[%c0_12, %c16_13] : memref<8x128xbf16, #tpu.memory_space<vmem>>, vector<8x16xbf16>
    %c0_14 = arith.constant 0 : index
    %c16_15 = arith.constant 16 : index
    %23 = vector.load %arg4[%c0_14, %c16_15] : memref<8x128xbf16, #tpu.memory_space<vmem>>, vector<8x16xbf16>
    %cst_16 = arith.constant dense<0.000000e+00> : vector<8x8xf32>
    %24 = tpu.matmul %21, %22, %cst_16 {dimension_numbers = #tpu.dot_dimension_numbers<[1], [1], [0], [0], [0, 0, 1, 0], [], []>} : vector<8x16xbf16>, vector<8x16xbf16>, vector<8x8xf32> -> vector<8x8xf32>
    %cst_17 = arith.constant 2.500000e-01 : f32
    %25 = vector.broadcast %cst_17 : f32 to vector<8x8xf32>
    %26 = arith.mulf %24, %25 : vector<8x8xf32>
    %c0_18 = arith.constant 0 : index
    %c0_19 = arith.constant 0 : index
    %27 = vector.load %arg5[%c0_18, %c0_19] : memref<1x8xf32, #tpu.memory_space<vmem>>, vector<1x8xf32>
    %28 = vector.broadcast %27 : vector<1x8xf32> to vector<8x8xf32>
    %29 = arith.addf %26, %28 : vector<8x8xf32>
    %cst_20 = arith.constant dense<0xFF800000> : vector<8xf32>
    %30 = vector.multi_reduction <maximumf>, %29, %cst_20 [1] : vector<8x8xf32> to vector<8xf32>
    %31 = vector.shape_cast %30 : vector<8xf32> to vector<8x1xf32>
    %32 = vector.broadcast %31 : vector<8x1xf32> to vector<8x8xf32>
    %33 = arith.subf %29, %32 : vector<8x8xf32>
    %34 = math.exp %33 : vector<8x8xf32>
    %cst_21 = arith.constant dense<0.000000e+00> : vector<8xf32>
    %35 = vector.multi_reduction <add>, %34, %cst_21 [1] : vector<8x8xf32> to vector<8xf32>
    %36 = vector.shape_cast %35 : vector<8xf32> to vector<8x1xf32>
    %37 = tpu.reciprocal %36 {approx = true} : vector<8x1xf32> -> vector<8x1xf32>
    %38 = vector.broadcast %37 : vector<8x1xf32> to vector<8x8xf32>
    %39 = arith.mulf %34, %38 : vector<8x8xf32>
    %40 = arith.truncf %39 : vector<8x8xf32> to vector<8x8xbf16>
    %cst_22 = arith.constant dense<0.000000e+00> : vector<8x16xf32>
    %41 = tpu.matmul %40, %23, %cst_22 {dimension_numbers = #tpu.dot_dimension_numbers<[1], [0], [0], [1], [0, 0, 1, 1], [], []>} : vector<8x8xbf16>, vector<8x16xbf16>, vector<8x16xf32> -> vector<8x16xf32>
    %c0_23 = arith.constant 0 : index
    %c32 = arith.constant 32 : index
    %42 = vector.load %arg2[%c0_23, %c32] : memref<8x128xbf16, #tpu.memory_space<vmem>>, vector<8x16xbf16>
    %c0_24 = arith.constant 0 : index
    %c32_25 = arith.constant 32 : index
    %43 = vector.load %arg3[%c0_24, %c32_25] : memref<8x128xbf16, #tpu.memory_space<vmem>>, vector<8x16xbf16>
    %c0_26 = arith.constant 0 : index
    %c32_27 = arith.constant 32 : index
    %44 = vector.load %arg4[%c0_26, %c32_27] : memref<8x128xbf16, #tpu.memory_space<vmem>>, vector<8x16xbf16>
    %cst_28 = arith.constant dense<0.000000e+00> : vector<8x8xf32>
    %45 = tpu.matmul %42, %43, %cst_28 {dimension_numbers = #tpu.dot_dimension_numbers<[1], [1], [0], [0], [0, 0, 1, 0], [], []>} : vector<8x16xbf16>, vector<8x16xbf16>, vector<8x8xf32> -> vector<8x8xf32>
    %cst_29 = arith.constant 2.500000e-01 : f32
    %46 = vector.broadcast %cst_29 : f32 to vector<8x8xf32>
    %47 = arith.mulf %45, %46 : vector<8x8xf32>
    %c0_30 = arith.constant 0 : index
    %c0_31 = arith.constant 0 : index
    %48 = vector.load %arg5[%c0_30, %c0_31] : memref<1x8xf32, #tpu.memory_space<vmem>>, vector<1x8xf32>
    %49 = vector.broadcast %48 : vector<1x8xf32> to vector<8x8xf32>
    %50 = arith.addf %47, %49 : vector<8x8xf32>
    %cst_32 = arith.constant dense<0xFF800000> : vector<8xf32>
    %51 = vector.multi_reduction <maximumf>, %50, %cst_32 [1] : vector<8x8xf32> to vector<8xf32>
    %52 = vector.shape_cast %51 : vector<8xf32> to vector<8x1xf32>
    %53 = vector.broadcast %52 : vector<8x1xf32> to vector<8x8xf32>
    %54 = arith.subf %50, %53 : vector<8x8xf32>
    %55 = math.exp %54 : vector<8x8xf32>
    %cst_33 = arith.constant dense<0.000000e+00> : vector<8xf32>
    %56 = vector.multi_reduction <add>, %55, %cst_33 [1] : vector<8x8xf32> to vector<8xf32>
    %57 = vector.shape_cast %56 : vector<8xf32> to vector<8x1xf32>
    %58 = tpu.reciprocal %57 {approx = true} : vector<8x1xf32> -> vector<8x1xf32>
    %59 = vector.broadcast %58 : vector<8x1xf32> to vector<8x8xf32>
    %60 = arith.mulf %55, %59 : vector<8x8xf32>
    %61 = arith.truncf %60 : vector<8x8xf32> to vector<8x8xbf16>
    %cst_34 = arith.constant dense<0.000000e+00> : vector<8x16xf32>
    %62 = tpu.matmul %61, %44, %cst_34 {dimension_numbers = #tpu.dot_dimension_numbers<[1], [0], [0], [1], [0, 0, 1, 1], [], []>} : vector<8x8xbf16>, vector<8x16xbf16>, vector<8x16xf32> -> vector<8x16xf32>
    %c0_35 = arith.constant 0 : index
    %c48 = arith.constant 48 : index
    %63 = vector.load %arg2[%c0_35, %c48] : memref<8x128xbf16, #tpu.memory_space<vmem>>, vector<8x16xbf16>
    %c0_36 = arith.constant 0 : index
    %c48_37 = arith.constant 48 : index
    %64 = vector.load %arg3[%c0_36, %c48_37] : memref<8x128xbf16, #tpu.memory_space<vmem>>, vector<8x16xbf16>
    %c0_38 = arith.constant 0 : index
    %c48_39 = arith.constant 48 : index
    %65 = vector.load %arg4[%c0_38, %c48_39] : memref<8x128xbf16, #tpu.memory_space<vmem>>, vector<8x16xbf16>
    %cst_40 = arith.constant dense<0.000000e+00> : vector<8x8xf32>
    %66 = tpu.matmul %63, %64, %cst_40 {dimension_numbers = #tpu.dot_dimension_numbers<[1], [1], [0], [0], [0, 0, 1, 0], [], []>} : vector<8x16xbf16>, vector<8x16xbf16>, vector<8x8xf32> -> vector<8x8xf32>
    %cst_41 = arith.constant 2.500000e-01 : f32
    %67 = vector.broadcast %cst_41 : f32 to vector<8x8xf32>
    %68 = arith.mulf %66, %67 : vector<8x8xf32>
    %c0_42 = arith.constant 0 : index
    %c0_43 = arith.constant 0 : index
    %69 = vector.load %arg5[%c0_42, %c0_43] : memref<1x8xf32, #tpu.memory_space<vmem>>, vector<1x8xf32>
    %70 = vector.broadcast %69 : vector<1x8xf32> to vector<8x8xf32>
    %71 = arith.addf %68, %70 : vector<8x8xf32>
    %cst_44 = arith.constant dense<0xFF800000> : vector<8xf32>
    %72 = vector.multi_reduction <maximumf>, %71, %cst_44 [1] : vector<8x8xf32> to vector<8xf32>
    %73 = vector.shape_cast %72 : vector<8xf32> to vector<8x1xf32>
    %74 = vector.broadcast %73 : vector<8x1xf32> to vector<8x8xf32>
    %75 = arith.subf %71, %74 : vector<8x8xf32>
    %76 = math.exp %75 : vector<8x8xf32>
    %cst_45 = arith.constant dense<0.000000e+00> : vector<8xf32>
    %77 = vector.multi_reduction <add>, %76, %cst_45 [1] : vector<8x8xf32> to vector<8xf32>
    %78 = vector.shape_cast %77 : vector<8xf32> to vector<8x1xf32>
    %79 = tpu.reciprocal %78 {approx = true} : vector<8x1xf32> -> vector<8x1xf32>
    %80 = vector.broadcast %79 : vector<8x1xf32> to vector<8x8xf32>
    %81 = arith.mulf %76, %80 : vector<8x8xf32>
    %82 = arith.truncf %81 : vector<8x8xf32> to vector<8x8xbf16>
    %cst_46 = arith.constant dense<0.000000e+00> : vector<8x16xf32>
    %83 = tpu.matmul %82, %65, %cst_46 {dimension_numbers = #tpu.dot_dimension_numbers<[1], [0], [0], [1], [0, 0, 1, 1], [], []>} : vector<8x8xbf16>, vector<8x16xbf16>, vector<8x16xf32> -> vector<8x16xf32>
    %c0_47 = arith.constant 0 : index
    %c64 = arith.constant 64 : index
    %84 = vector.load %arg2[%c0_47, %c64] : memref<8x128xbf16, #tpu.memory_space<vmem>>, vector<8x16xbf16>
    %c0_48 = arith.constant 0 : index
    %c64_49 = arith.constant 64 : index
    %85 = vector.load %arg3[%c0_48, %c64_49] : memref<8x128xbf16, #tpu.memory_space<vmem>>, vector<8x16xbf16>
    %c0_50 = arith.constant 0 : index
    %c64_51 = arith.constant 64 : index
    %86 = vector.load %arg4[%c0_50, %c64_51] : memref<8x128xbf16, #tpu.memory_space<vmem>>, vector<8x16xbf16>
    %cst_52 = arith.constant dense<0.000000e+00> : vector<8x8xf32>
    %87 = tpu.matmul %84, %85, %cst_52 {dimension_numbers = #tpu.dot_dimension_numbers<[1], [1], [0], [0], [0, 0, 1, 0], [], []>} : vector<8x16xbf16>, vector<8x16xbf16>, vector<8x8xf32> -> vector<8x8xf32>
    %cst_53 = arith.constant 2.500000e-01 : f32
    %88 = vector.broadcast %cst_53 : f32 to vector<8x8xf32>
    %89 = arith.mulf %87, %88 : vector<8x8xf32>
    %c0_54 = arith.constant 0 : index
    %c0_55 = arith.constant 0 : index
    %90 = vector.load %arg5[%c0_54, %c0_55] : memref<1x8xf32, #tpu.memory_space<vmem>>, vector<1x8xf32>
    %91 = vector.broadcast %90 : vector<1x8xf32> to vector<8x8xf32>
    %92 = arith.addf %89, %91 : vector<8x8xf32>
    %cst_56 = arith.constant dense<0xFF800000> : vector<8xf32>
    %93 = vector.multi_reduction <maximumf>, %92, %cst_56 [1] : vector<8x8xf32> to vector<8xf32>
    %94 = vector.shape_cast %93 : vector<8xf32> to vector<8x1xf32>
    %95 = vector.broadcast %94 : vector<8x1xf32> to vector<8x8xf32>
    %96 = arith.subf %92, %95 : vector<8x8xf32>
    %97 = math.exp %96 : vector<8x8xf32>
    %cst_57 = arith.constant dense<0.000000e+00> : vector<8xf32>
    %98 = vector.multi_reduction <add>, %97, %cst_57 [1] : vector<8x8xf32> to vector<8xf32>
    %99 = vector.shape_cast %98 : vector<8xf32> to vector<8x1xf32>
    %100 = tpu.reciprocal %99 {approx = true} : vector<8x1xf32> -> vector<8x1xf32>
    %101 = vector.broadcast %100 : vector<8x1xf32> to vector<8x8xf32>
    %102 = arith.mulf %97, %101 : vector<8x8xf32>
    %103 = arith.truncf %102 : vector<8x8xf32> to vector<8x8xbf16>
    %cst_58 = arith.constant dense<0.000000e+00> : vector<8x16xf32>
    %104 = tpu.matmul %103, %86, %cst_58 {dimension_numbers = #tpu.dot_dimension_numbers<[1], [0], [0], [1], [0, 0, 1, 1], [], []>} : vector<8x8xbf16>, vector<8x16xbf16>, vector<8x16xf32> -> vector<8x16xf32>
    %c0_59 = arith.constant 0 : index
    %c80 = arith.constant 80 : index
    %105 = vector.load %arg2[%c0_59, %c80] : memref<8x128xbf16, #tpu.memory_space<vmem>>, vector<8x16xbf16>
    %c0_60 = arith.constant 0 : index
    %c80_61 = arith.constant 80 : index
    %106 = vector.load %arg3[%c0_60, %c80_61] : memref<8x128xbf16, #tpu.memory_space<vmem>>, vector<8x16xbf16>
    %c0_62 = arith.constant 0 : index
    %c80_63 = arith.constant 80 : index
    %107 = vector.load %arg4[%c0_62, %c80_63] : memref<8x128xbf16, #tpu.memory_space<vmem>>, vector<8x16xbf16>
    %cst_64 = arith.constant dense<0.000000e+00> : vector<8x8xf32>
    %108 = tpu.matmul %105, %106, %cst_64 {dimension_numbers = #tpu.dot_dimension_numbers<[1], [1], [0], [0], [0, 0, 1, 0], [], []>} : vector<8x16xbf16>, vector<8x16xbf16>, vector<8x8xf32> -> vector<8x8xf32>
    %cst_65 = arith.constant 2.500000e-01 : f32
    %109 = vector.broadcast %cst_65 : f32 to vector<8x8xf32>
    %110 = arith.mulf %108, %109 : vector<8x8xf32>
    %c0_66 = arith.constant 0 : index
    %c0_67 = arith.constant 0 : index
    %111 = vector.load %arg5[%c0_66, %c0_67] : memref<1x8xf32, #tpu.memory_space<vmem>>, vector<1x8xf32>
    %112 = vector.broadcast %111 : vector<1x8xf32> to vector<8x8xf32>
    %113 = arith.addf %110, %112 : vector<8x8xf32>
    %cst_68 = arith.constant dense<0xFF800000> : vector<8xf32>
    %114 = vector.multi_reduction <maximumf>, %113, %cst_68 [1] : vector<8x8xf32> to vector<8xf32>
    %115 = vector.shape_cast %114 : vector<8xf32> to vector<8x1xf32>
    %116 = vector.broadcast %115 : vector<8x1xf32> to vector<8x8xf32>
    %117 = arith.subf %113, %116 : vector<8x8xf32>
    %118 = math.exp %117 : vector<8x8xf32>
    %cst_69 = arith.constant dense<0.000000e+00> : vector<8xf32>
    %119 = vector.multi_reduction <add>, %118, %cst_69 [1] : vector<8x8xf32> to vector<8xf32>
    %120 = vector.shape_cast %119 : vector<8xf32> to vector<8x1xf32>
    %121 = tpu.reciprocal %120 {approx = true} : vector<8x1xf32> -> vector<8x1xf32>
    %122 = vector.broadcast %121 : vector<8x1xf32> to vector<8x8xf32>
    %123 = arith.mulf %118, %122 : vector<8x8xf32>
    %124 = arith.truncf %123 : vector<8x8xf32> to vector<8x8xbf16>
    %cst_70 = arith.constant dense<0.000000e+00> : vector<8x16xf32>
    %125 = tpu.matmul %124, %107, %cst_70 {dimension_numbers = #tpu.dot_dimension_numbers<[1], [0], [0], [1], [0, 0, 1, 1], [], []>} : vector<8x8xbf16>, vector<8x16xbf16>, vector<8x16xf32> -> vector<8x16xf32>
    %c0_71 = arith.constant 0 : index
    %c96 = arith.constant 96 : index
    %126 = vector.load %arg2[%c0_71, %c96] : memref<8x128xbf16, #tpu.memory_space<vmem>>, vector<8x16xbf16>
    %c0_72 = arith.constant 0 : index
    %c96_73 = arith.constant 96 : index
    %127 = vector.load %arg3[%c0_72, %c96_73] : memref<8x128xbf16, #tpu.memory_space<vmem>>, vector<8x16xbf16>
    %c0_74 = arith.constant 0 : index
    %c96_75 = arith.constant 96 : index
    %128 = vector.load %arg4[%c0_74, %c96_75] : memref<8x128xbf16, #tpu.memory_space<vmem>>, vector<8x16xbf16>
    %cst_76 = arith.constant dense<0.000000e+00> : vector<8x8xf32>
    %129 = tpu.matmul %126, %127, %cst_76 {dimension_numbers = #tpu.dot_dimension_numbers<[1], [1], [0], [0], [0, 0, 1, 0], [], []>} : vector<8x16xbf16>, vector<8x16xbf16>, vector<8x8xf32> -> vector<8x8xf32>
    %cst_77 = arith.constant 2.500000e-01 : f32
    %130 = vector.broadcast %cst_77 : f32 to vector<8x8xf32>
    %131 = arith.mulf %129, %130 : vector<8x8xf32>
    %c0_78 = arith.constant 0 : index
    %c0_79 = arith.constant 0 : index
    %132 = vector.load %arg5[%c0_78, %c0_79] : memref<1x8xf32, #tpu.memory_space<vmem>>, vector<1x8xf32>
    %133 = vector.broadcast %132 : vector<1x8xf32> to vector<8x8xf32>
    %134 = arith.addf %131, %133 : vector<8x8xf32>
    %cst_80 = arith.constant dense<0xFF800000> : vector<8xf32>
    %135 = vector.multi_reduction <maximumf>, %134, %cst_80 [1] : vector<8x8xf32> to vector<8xf32>
    %136 = vector.shape_cast %135 : vector<8xf32> to vector<8x1xf32>
    %137 = vector.broadcast %136 : vector<8x1xf32> to vector<8x8xf32>
    %138 = arith.subf %134, %137 : vector<8x8xf32>
    %139 = math.exp %138 : vector<8x8xf32>
    %cst_81 = arith.constant dense<0.000000e+00> : vector<8xf32>
    %140 = vector.multi_reduction <add>, %139, %cst_81 [1] : vector<8x8xf32> to vector<8xf32>
    %141 = vector.shape_cast %140 : vector<8xf32> to vector<8x1xf32>
    %142 = tpu.reciprocal %141 {approx = true} : vector<8x1xf32> -> vector<8x1xf32>
    %143 = vector.broadcast %142 : vector<8x1xf32> to vector<8x8xf32>
    %144 = arith.mulf %139, %143 : vector<8x8xf32>
    %145 = arith.truncf %144 : vector<8x8xf32> to vector<8x8xbf16>
    %cst_82 = arith.constant dense<0.000000e+00> : vector<8x16xf32>
    %146 = tpu.matmul %145, %128, %cst_82 {dimension_numbers = #tpu.dot_dimension_numbers<[1], [0], [0], [1], [0, 0, 1, 1], [], []>} : vector<8x8xbf16>, vector<8x16xbf16>, vector<8x16xf32> -> vector<8x16xf32>
    %c0_83 = arith.constant 0 : index
    %c112 = arith.constant 112 : index
    %147 = vector.load %arg2[%c0_83, %c112] : memref<8x128xbf16, #tpu.memory_space<vmem>>, vector<8x16xbf16>
    %c0_84 = arith.constant 0 : index
    %c112_85 = arith.constant 112 : index
    %148 = vector.load %arg3[%c0_84, %c112_85] : memref<8x128xbf16, #tpu.memory_space<vmem>>, vector<8x16xbf16>
    %c0_86 = arith.constant 0 : index
    %c112_87 = arith.constant 112 : index
    %149 = vector.load %arg4[%c0_86, %c112_87] : memref<8x128xbf16, #tpu.memory_space<vmem>>, vector<8x16xbf16>
    %cst_88 = arith.constant dense<0.000000e+00> : vector<8x8xf32>
    %150 = tpu.matmul %147, %148, %cst_88 {dimension_numbers = #tpu.dot_dimension_numbers<[1], [1], [0], [0], [0, 0, 1, 0], [], []>} : vector<8x16xbf16>, vector<8x16xbf16>, vector<8x8xf32> -> vector<8x8xf32>
    %cst_89 = arith.constant 2.500000e-01 : f32
    %151 = vector.broadcast %cst_89 : f32 to vector<8x8xf32>
    %152 = arith.mulf %150, %151 : vector<8x8xf32>
    %c0_90 = arith.constant 0 : index
    %c0_91 = arith.constant 0 : index
    %153 = vector.load %arg5[%c0_90, %c0_91] : memref<1x8xf32, #tpu.memory_space<vmem>>, vector<1x8xf32>
    %154 = vector.broadcast %153 : vector<1x8xf32> to vector<8x8xf32>
    %155 = arith.addf %152, %154 : vector<8x8xf32>
    %cst_92 = arith.constant dense<0xFF800000> : vector<8xf32>
    %156 = vector.multi_reduction <maximumf>, %155, %cst_92 [1] : vector<8x8xf32> to vector<8xf32>
    %157 = vector.shape_cast %156 : vector<8xf32> to vector<8x1xf32>
    %158 = vector.broadcast %157 : vector<8x1xf32> to vector<8x8xf32>
    %159 = arith.subf %155, %158 : vector<8x8xf32>
    %160 = math.exp %159 : vector<8x8xf32>
    %cst_93 = arith.constant dense<0.000000e+00> : vector<8xf32>
    %161 = vector.multi_reduction <add>, %160, %cst_93 [1] : vector<8x8xf32> to vector<8xf32>
    %162 = vector.shape_cast %161 : vector<8xf32> to vector<8x1xf32>
    %163 = tpu.reciprocal %162 {approx = true} : vector<8x1xf32> -> vector<8x1xf32>
    %164 = vector.broadcast %163 : vector<8x1xf32> to vector<8x8xf32>
    %165 = arith.mulf %160, %164 : vector<8x8xf32>
    %166 = arith.truncf %165 : vector<8x8xf32> to vector<8x8xbf16>
    %cst_94 = arith.constant dense<0.000000e+00> : vector<8x16xf32>
    %167 = tpu.matmul %166, %149, %cst_94 {dimension_numbers = #tpu.dot_dimension_numbers<[1], [0], [0], [1], [0, 0, 1, 1], [], []>} : vector<8x8xbf16>, vector<8x16xbf16>, vector<8x16xf32> -> vector<8x16xf32>
    %168 = tpu.concatenate %20, %41, %62, %83, %104, %125, %146, %167 in 1 : vector<8x16xf32>, vector<8x16xf32>, vector<8x16xf32>, vector<8x16xf32>, vector<8x16xf32>, vector<8x16xf32>, vector<8x16xf32>, vector<8x16xf32> -> vector<8x128xf32>
    %169 = arith.truncf %168 : vector<8x128xf32> to vector<8x128xbf16>
    %c0_95 = arith.constant 0 : index
    %c0_96 = arith.constant 0 : index
    %170 = vector.load %arg6[%c0_95, %c0_96] : memref<8x128xbf16, #tpu.memory_space<vmem>>, vector<8x128xbf16>
    tpu.vector_store %arg6[%c0_95, %c0_96], %169 {strides = array<i32>} : memref<8x128xbf16, #tpu.memory_space<vmem>>, vector<8x128xbf16>,
    return
  }
  func.func @transform_0(%arg0: i32, %arg1: i32) -> (i32, i32) {
    %c0_i32 = arith.constant 0 : i32
    %0 = arith.addi %c0_i32, %arg0 : i32
    %c0_i32_0 = arith.constant 0 : i32
    return %arg1, %0 : i32, i32
  }
  func.func @transform_1(%arg0: i32, %arg1: i32) -> (i32, i32) {
    %c0_i32 = arith.constant 0 : i32
    %0 = arith.addi %c0_i32, %arg0 : i32
    %c0_i32_0 = arith.constant 0 : i32
    %c0_i32_1 = arith.constant 0 : i32
    return %c0_i32_0, %0 : i32, i32
  }
  func.func @transform_2(%arg0: i32, %arg1: i32) -> (i32, i32) {
    %c1_i32 = arith.constant 1 : i32
    %0 = arith.addi %c1_i32, %arg0 : i32
    %c0_i32 = arith.constant 0 : i32
    %c0_i32_0 = arith.constant 0 : i32
    return %c0_i32, %0 : i32, i32
  }
  func.func @transform_3(%arg0: i32, %arg1: i32) -> (i32, i32) {
    %c0_i32 = arith.constant 0 : i32
    %c0_i32_0 = arith.constant 0 : i32
    %c0_i32_1 = arith.constant 0 : i32
    return %c0_i32, %c0_i32_0 : i32, i32
  }
  func.func @transform_4(%arg0: i32, %arg1: i32) -> (i32, i32) {
    %c0_i32 = arith.constant 0 : i32
    return %arg1, %arg0 : i32, i32
  }
}

module attributes {stable_mosaic.version = 11 : i64} {
  func.func @_matmul_kernel(%arg0: i32, %arg1: i32, %arg2: i32, %arg3: memref<16x128xf32, #tpu.memory_space<vmem>>, %arg4: memref<128x128xbf16, #tpu.memory_space<vmem>>, %arg5: memref<1x128xf32, #tpu.memory_space<vmem>>, %arg6: memref<16x128xf32, #tpu.memory_space<vmem>>) attributes {dimension_semantics = [#tpu.dimension_semantics<parallel>, #tpu.dimension_semantics<parallel>, #tpu.dimension_semantics<arbitrary>], iteration_bounds = array<i64: 1, 1, 1>, scalar_prefetch = 0 : i64, scratch_operands = 0 : i64, tpu.core_type = #tpu.core_type<tc>, window_params = [{transform_indices = @transform_0, window_bounds = array<i64: 16, 128>}, {transform_indices = @transform_1, window_bounds = array<i64: 128, 128>}, {transform_indices = @transform_2, window_bounds = array<i64: 1, 128>}, {transform_indices = @transform_3, window_bounds = array<i64: 16, 128>}]} {
    %c0_i32 = arith.constant 0 : i32
    %0 = arith.cmpi eq, %arg2, %c0_i32 : i32
    %1 = arith.extui %0 : i1 to i32
    %c0_i32_0 = arith.constant 0 : i32
    %2 = arith.cmpi ne, %1, %c0_i32_0 : i32
    scf.if %2 {
      %cst_10 = arith.constant 0.000000e+00 : f32
      %13 = vector.broadcast %cst_10 : f32 to vector<16x128xf32>
      %c0_11 = arith.constant 0 : index
      %c0_12 = arith.constant 0 : index
      %14 = vector.load %arg6[%c0_11, %c0_12] : memref<16x128xf32, #tpu.memory_space<vmem>>, vector<16x128xf32>
      tpu.vector_store %arg6[%c0_11, %c0_12], %13 {strides = array<i32>} : memref<16x128xf32, #tpu.memory_space<vmem>>, vector<16x128xf32>,
    } else {
    }
    %c0 = arith.constant 0 : index
    %c0_1 = arith.constant 0 : index
    %3 = vector.load %arg6[%c0, %c0_1] : memref<16x128xf32, #tpu.memory_space<vmem>>, vector<16x128xf32>
    %c0_2 = arith.constant 0 : index
    %c0_3 = arith.constant 0 : index
    %4 = vector.load %arg3[%c0_2, %c0_3] : memref<16x128xf32, #tpu.memory_space<vmem>>, vector<16x128xf32>
    %5 = arith.truncf %4 : vector<16x128xf32> to vector<16x128xbf16>
    %c0_4 = arith.constant 0 : index
    %c0_5 = arith.constant 0 : index
    %6 = vector.load %arg4[%c0_4, %c0_5] : memref<128x128xbf16, #tpu.memory_space<vmem>>, vector<128x128xbf16>
    %cst = arith.constant dense<0.000000e+00> : vector<16x128xf32>
    %7 = tpu.matmul %5, %6, %cst {dimension_numbers = #tpu.dot_dimension_numbers<[1], [0], [0], [1], [0, 0, 1, 1], [], []>} : vector<16x128xbf16>, vector<128x128xbf16>, vector<16x128xf32> -> vector<16x128xf32>
    %8 = arith.addf %3, %7 : vector<16x128xf32>
    %c0_6 = arith.constant 0 : index
    %c0_7 = arith.constant 0 : index
    %9 = vector.load %arg6[%c0_6, %c0_7] : memref<16x128xf32, #tpu.memory_space<vmem>>, vector<16x128xf32>
    tpu.vector_store %arg6[%c0_6, %c0_7], %8 {strides = array<i32>} : memref<16x128xf32, #tpu.memory_space<vmem>>, vector<16x128xf32>,
    %c0_i32_8 = arith.constant 0 : i32
    %10 = arith.cmpi eq, %arg2, %c0_i32_8 : i32
    %11 = arith.extui %10 : i1 to i32
    %c0_i32_9 = arith.constant 0 : i32
    %12 = arith.cmpi ne, %11, %c0_i32_9 : i32
    scf.if %12 {
      %c0_10 = arith.constant 0 : index
      %c0_11 = arith.constant 0 : index
      %13 = vector.load %arg6[%c0_10, %c0_11] : memref<16x128xf32, #tpu.memory_space<vmem>>, vector<16x128xf32>
      %c0_12 = arith.constant 0 : index
      %c0_13 = arith.constant 0 : index
      %14 = vector.load %arg5[%c0_12, %c0_13] : memref<1x128xf32, #tpu.memory_space<vmem>>, vector<1x128xf32>
      %15 = vector.broadcast %14 : vector<1x128xf32> to vector<16x128xf32>
      %16 = arith.addf %13, %15 : vector<16x128xf32>
      %c0_14 = arith.constant 0 : index
      %c0_15 = arith.constant 0 : index
      %17 = vector.load %arg6[%c0_14, %c0_15] : memref<16x128xf32, #tpu.memory_space<vmem>>, vector<16x128xf32>
      tpu.vector_store %arg6[%c0_14, %c0_15], %16 {strides = array<i32>} : memref<16x128xf32, #tpu.memory_space<vmem>>, vector<16x128xf32>,
    } else {
    }
    return
  }
  func.func @transform_0(%arg0: i32, %arg1: i32, %arg2: i32) -> (i32, i32) {
    %c0_i32 = arith.constant 0 : i32
    return %arg0, %arg2 : i32, i32
  }
  func.func @transform_1(%arg0: i32, %arg1: i32, %arg2: i32) -> (i32, i32) {
    %c0_i32 = arith.constant 0 : i32
    return %arg2, %arg1 : i32, i32
  }
  func.func @transform_2(%arg0: i32, %arg1: i32, %arg2: i32) -> (i32, i32) {
    %c0_i32 = arith.constant 0 : i32
    %c0_i32_0 = arith.constant 0 : i32
    return %c0_i32, %arg1 : i32, i32
  }
  func.func @transform_3(%arg0: i32, %arg1: i32, %arg2: i32) -> (i32, i32) {
    %c0_i32 = arith.constant 0 : i32
    return %arg0, %arg1 : i32, i32
  }
}

</mosaic_0001>

<bundles_post_ra>
// kernel: _forward_impl.54
= control target key start
LH: loop header
LB: loop body
LE: loop exit
PB: predicated region body
PF: predicated region fallthrough
CT: control target
= control target key end

     0   :  { %s367_s1 = inlined_call_operand.vmem [shape: bf16[256,128], index: 1, kind: input, shape index: {}]   ;;  %s368_s0 = inlined_call_operand.vmem [shape: f32[16,256], index: 0, kind: input, shape index: {}]   ;;  %s369_s2 = inlined_call_operand.vmem [shape: f32[1,128], index: 2, kind: input, shape index: {}]   ;;  %s370_s3 = inlined_call_operand.vmem [shape: f32[16,128], index: 3, kind: output, shape index: {}]  }
   0x1   :  { %v262_v0 = vld [vmem:[%s367_s1 + $0x40] sm:$0xff]   ;;  %v264_v2 = vld [vmem:[%s367_s1 + $0x48] sm:$0xff]   ;;  %v266_v4 = vld [vmem:[%s367_s1 + $0x50] sm:$0xff]  }
   0x2   :  { %v263_v1 = vld [vmem:[%s367_s1] sm:$0xff]   ;;  %239 = vmatprep.subr.bf16.mxu0 %v262_v0  ;;  %v265_v3 = vld [vmem:[%s367_s1 + $0x8] sm:$0xff]   ;;  %v267_v5 = vld [vmem:[%s367_s1 + $0x10] sm:$0xff]  }
   0x3   :  { %240 = vmatpush3.bf16.msra.mxu0 %v263_v1  ;;  %v268_v6 = vld [vmem:[%s367_s1 + $0x58] sm:$0xff]   ;;  %v270_v8 = vld [vmem:[%s367_s1 + $0x60] sm:$0xff]   ;;  %v272_v10 = vld [vmem:[%s367_s1 + $0x68] sm:$0xff]  }
   0x4   :  { %241 = vmatprep.subr.bf16.mxu0 %v264_v2  ;;  %v269_v7 = vld [vmem:[%s367_s1 + $0x18] sm:$0xff]   ;;  %v271_v9 = vld [vmem:[%s367_s1 + $0x20] sm:$0xff]   ;;  %v24_v11 = vld [vmem:[%s368_s0 + $0x8] sm:$0xff] }
   0x5   :  { %v26_v12 = vld [vmem:[%s368_s0 + $0x18] sm:$0xff]  ;;  %v273_v14 = vld [vmem:[%s367_s1 + $0x28] sm:$0xff]   ;;  %v274_v15 = vld [vmem:[%s367_s1 + $0x70] sm:$0xff]  }
   0x6   :  { %v28_v13 = vpack.c.bf16 %v26_v12, %v24_v11  ;;  %v275_v16 = vld [vmem:[%s367_s1 + $0x30] sm:$0xff]   ;;  %v276_v17 = vld [vmem:[%s367_s1 + $0x78] sm:$0xff]   ;;  %v23_v19 = vld [vmem:[%s368_s0] sm:$0xff] }
   0x7   :  { %242 = vmatpush3.bf16.msra.mxu0 %v265_v3  ;;  %v277_v18 = vld [vmem:[%s367_s1 + $0x38] sm:$0xff]   ;;  %v25_v20 = vld [vmem:[%s368_s0 + $0x10] sm:$0xff]  ;;  %v238_v26 = vld [vmem:[%s369_s2] ss:$0 sm:$0xff] }
   0x8   :  { %243 = vmatprep.subr.bf16.mxu0 %v266_v4  ;;  %189 = vmatprep.mubr.bf16.mxu0 %v28_v13  ;;  %v27_v21 = vpack.c.bf16 %v25_v20, %v23_v19 }
   0xb   :  { %244 = vmatpush3.bf16.msra.mxu0 %v267_v5 }
   0xc   :  { %245 = vmatprep.subr.bf16.mxu0 %v268_v6 }
   0xf   :  { %246 = vmatpush3.bf16.msra.mxu0 %v269_v7 }
  0x10   :  { %247 = vmatprep.subr.bf16.mxu0 %v270_v8 }
  0x13   :  { %248 = vmatpush3.bf16.msra.mxu0 %v271_v9 }
  0x14   :  { %249 = vmatprep.subr.bf16.mxu0 %v272_v10 }
  0x17   :  { %250 = vmatpush3.bf16.msra.mxu0 %v273_v14 }
  0x18   :  { %251 = vmatprep.subr.bf16.mxu0 %v274_v15 }
  0x1b   :  { %252 = vmatpush3.bf16.msra.mxu0 %v275_v16 }
  0x1c   :  { %253 = vmatprep.subr.bf16.mxu0 %v276_v17 }
  0x1f   :  { %254 = vmatpush3.bf16.msra.mxu0 %v277_v18 }
  0x22   :  { %190 = vmatmul.mubr.bf16.vlgmr.msra.gmra.mrb[0].mxu0 %v27_v21 }
  0xf5   :  { %v255_v22 = vpop.f32.mrb[0].mxu0 }
  0xf6   :  { %v256_v23 = vpop.f32.mrb[1].mxu0 }
  0xf7   :  { %v257_v24 = vadd.f32 %v256_v23, %v255_v22  ;;  %v258_v25 = vpop.f32.mrb[2].mxu0 }
  0xf8   :  { %v259_v27 = vpop.f32.mrb[3].mxu0 }
  0xf9   :  { %v260_v28 = vadd.f32 %v259_v27, %v258_v25  ;;  %v214_v29 = vadd.f32 %v257_v24, %v238_v26 }
  0xfb   :  { %216 = vst [vmem:[%s370_s3] sm:$0xff] %v214_v29  ;;  %v215_v30 = vadd.f32 %v260_v28, %v238_v26 }
  0xfd   :  { %217 = vst [vmem:[%s370_s3 + $0x8] sm:$0xff] %v215_v30 }

// kernel: _forward_impl.57
= control target key start
LH: loop header
LB: loop body
LE: loop exit
PB: predicated region body
PF: predicated region fallthrough
CT: control target
= control target key end

     0   :  { %v223_v0 = vmov 0.0   ;;  %vm224_vm0 = vmmov 0   ;;  %s302_s1 = inlined_call_operand.vmem [shape: bf16[128,128], index: 1, kind: input, shape index: {}]   ;;  %s303_s0 = inlined_call_operand.vmem [shape: bf16[8,128], index: 0, kind: input, shape index: {}]   ;;  %s304_s2 = inlined_call_operand.vmem [shape: f32[1,128], index: 2, kind: input, shape index: {}]   ;;  %s305_s3 = inlined_call_operand.vmem [shape: f32[8,128], index: 3, kind: input, shape index: {}]   ;;  %s306_s4 = inlined_call_operand.vmem [shape: f32[1,128], index: 4, kind: input, shape index: {}]   ;;  %s307_s5 = inlined_call_operand.vmem [shape: f32[1,128], index: 5, kind: input, shape index: {}]   ;;  %s308_s6 = inlined_call_operand.vmem [shape: f32[8,128], index: 6, kind: output, shape index: {}]  }
   0x1   :  { %191 = vmatprep.subr.bf16.mxu0 %v223_v0  ;;  %v213_v1 = vld [vmem:[%s302_s1] sm:$0xff]   ;;  %207 = vmatprep.mubr.msk.bf16.mxu0 %vm224_vm0, %v223_v0  ;;  %v214_v2 = vld [vmem:[%s302_s1 + $0x8] sm:$0xff]   ;;  %v215_v3 = vld [vmem:[%s302_s1 + $0x10] sm:$0xff]  }
   0x2   :  { %192 = vmatpush3.bf16.msra.mxu0 %v213_v1  ;;  %v216_v4 = vld [vmem:[%s302_s1 + $0x18] sm:$0xff]   ;;  %v217_v5 = vld [vmem:[%s302_s1 + $0x20] sm:$0xff]   ;;  %v218_v6 = vld [vmem:[%s302_s1 + $0x28] sm:$0xff]  }
   0x3   :  { %193 = vmatprep.subr.bf16.mxu0 %v223_v0  ;;  %v219_v7 = vld [vmem:[%s302_s1 + $0x30] sm:$0xff]   ;;  %v220_v8 = vld [vmem:[%s302_s1 + $0x38] sm:$0xff]   ;;  %v24_v9 = vld [vmem:[%s303_s0] sm:$0xf] }
   0x4   :  { %v171_v10 = vld [vmem:[%s304_s2] ss:$0 sm:$0xff] }
   0x5   :  { %v136_v12 = vld [vmem:[%s305_s3] sm:$0xff] }
   0x6   :  { %194 = vmatpush3.bf16.msra.mxu0 %v214_v2  ;;  %v180_v26 = vld [vmem:[%s306_s4] ss:$0 sm:$0xff] }
   0x7   :  { %195 = vmatprep.subr.bf16.mxu0 %v223_v0  ;;  %v181_v28 = vld [vmem:[%s307_s5] ss:$0 sm:$0xff] }
   0xa   :  { %196 = vmatpush3.bf16.msra.mxu0 %v215_v3 }
   0xb   :  { %197 = vmatprep.subr.bf16.mxu0 %v223_v0 }
   0xe   :  { %198 = vmatpush3.bf16.msra.mxu0 %v216_v4 }
   0xf   :  { %199 = vmatprep.subr.bf16.mxu0 %v223_v0 }
  0x12   :  { %200 = vmatpush3.bf16.msra.mxu0 %v217_v5 }
  0x13   :  { %201 = vmatprep.subr.bf16.mxu0 %v223_v0 }
  0x16   :  { %202 = vmatpush3.bf16.msra.mxu0 %v218_v6 }
  0x17   :  { %203 = vmatprep.subr.bf16.mxu0 %v223_v0 }
  0x1a   :  { %204 = vmatpush3.bf16.msra.mxu0 %v219_v7 }
  0x1b   :  { %205 = vmatprep.subr.bf16.mxu0 %v223_v0 }
  0x1e   :  { %206 = vmatpush3.bf16.msra.mxu0 %v220_v8 }
  0x21   :  { %208 = vmatmul.mubr.bf16.vlgmr.msra.gmra.mrb[0].mxu0 %v24_v9 }
  0xf4   :  { %v130_v11 = vpop.f32.mrb[0].mxu0 }
  0xf5   :  { %v131_v13 = vadd.f32 %v171_v10, %v130_v11  ;;  %v209_v14 = vpop.f32.mrb[1].mxu0 }
  0xf6   :  { %v133_v15 = vpop.f32.mrb[2].mxu0 }
  0xf7   :  { %v210_v16 = vpop.f32.mrb[3].mxu0  ;;  %v137_v17 = vadd.f32 %v136_v12, %v131_v13 }
  0xf9   :  { %140 = vadd.xlane.f32.xlu0 %v137_v17 }
 0x186   :  { %v141_v18 = vpop.xlane.xlu0 %140 }
 0x187   :  { %v143_v19 = vmul.f32 0.0078125, %v141_v18 }
 0x189   :  { %v144_v20 = vsub.f32 %v137_v17, %v143_v19 }
 0x18b   :  { %v145_v21 = vmul.f32 %v144_v20, %v144_v20 }
 0x18d   :  { %146 = vadd.xlane.f32.xlu0 %v145_v21 }
 0x21a   :  { %v147_v22 = vpop.xlane.xlu0 %146 }
 0x21b   :  { %v148_v23 = vmul.f32 0.0078125, %v147_v22 }
 0x21d   :  { %v149_v24 = vadd.f32 1e-05, %v148_v23 }
 0x21f   :  { %221 = vrsqrt.f32 %v149_v24 }
 0x229   :  { %v222_v25 = vpop.eup %221 }
 0x22a   :  { %v151_v27 = vmul.f32 %v222_v25, %v144_v20 }
 0x22c   :  { %v158_v29 = vmul.f32 %v180_v26, %v151_v27 }
 0x22e   :  { %v165_v30 = vadd.f32 %v181_v28, %v158_v29 }
 0x230   :  { %166 = vst [vmem:[%s308_s6] sm:$0xff] %v165_v30 }

// kernel: _forward_impl.55
= control target key start
LH: loop header
LB: loop body
LE: loop exit
PB: predicated region body
PF: predicated region fallthrough
CT: control target
= control target key end

     0   :  { %s754_s12 = smov 0   ;;  %s756_s13 = smov 0   ;;  %s844_s0 = inlined_call_operand.vmem [shape: f32[8,128], index: 0, kind: input, shape index: {}]   ;;  %s845_s1 = inlined_call_operand.vmem [shape: bf16[128,384], index: 1, kind: input, shape index: {}]   ;;  %s846_s2 = inlined_call_operand.vmem [shape: f32[1,384], index: 2, kind: input, shape index: {}]   ;;  %s847_s3 = inlined_call_operand.vmem [shape: bf16[8,384], index: 3, kind: output, shape index: {}]  }
   0x1   :  { %s758_s14 = smov 0   ;;  %s760_s15 = smov 0  }
   0x2   :  { %s762_s16 = smov 0  }
   0x3 LB: > { %s28_s17 = sadd.s32 1, %s726_s15  ;;  %p76_p1 = scmp.ne.s32.totalorder %s718_s13, %s714_s12  ;;  %s730_s16 = sphi %s762_s16, %s13_s16   ;;  %s726_s15 = sphi %s760_s15, %s851_s15   ;;  %s722_s14 = sphi %s758_s14, %s850_s14   ;;  %s718_s13 = sphi %s756_s13, %s849_s13   ;;  %s714_s12 = sphi %s754_s12, %s848_s12  }
   0x4   : > { %p30_p0 = scmp.ge.s32.totalorder %s28_s17, 3  ;;  %p77_p2 = scmp.eq.s32.totalorder %s730_s16, 0 }
   0x5   : > { %s69_s19 = sadd.s32 1, %s718_s13  ;;  %p596_p5 = scmp.ge.s32.totalorder %s730_s16, 3 }
   0x6   : > { %s853_s17 = smov (%p30_p0, %s28_s17), 0  ;;  %p78_p3 = por %p77_p2, %p76_p1 }
   0x7   : > { %s65_s18 = ssub.s32 %s726_s15, %s853_s17  ;;  %166 = sbr.rel (%p596_p5) target bundleno = 28 (0x1c), region = 20 }
   0x8   : > { %p67_p4 = scmp.eq.s32.totalorder %s65_s18, 0 }
   0xa   : > { %s789_s20 = scalar_select %p67_p4, %s718_s13, %s69_s19  }
   0xe   : > { %169 = sbr.rel (!%p78_p3) target bundleno = 28 (0x1c), region = 24  ;;  %s171_s21 = sand.u32 (%p78_p3), 1, %s718_s13  }
   0xf   : > { %s598_s22 = sshll.u32 (%p78_p3), %s726_s15, 2  ;;  %s597_s23 = sshll.u32 (%p78_p3), %s171_s21, 6 }
  0x10   : > { %s797_s26 = scalar_lea.vmem (%p78_p3), %s845_s1, %s598_s22  ;;  %s173_s27 = scalar_lea.vmem (%p78_p3), [#allocation3], %s597_s23 }
  0x11   : > { %v194_v0 = vld [vmem:[%s797_s26] sm:$0xf] (%p78_p3)  ;;  %v196_v1 = vld [vmem:[%s797_s26 + $0xc] sm:$0xf] (%p78_p3)  ;;  %v198_v2 = vld [vmem:[%s797_s26 + $0x18] sm:$0xf] (%p78_p3) }
  0x12   : > { %195 = vst [vmem:[%s173_s27] sm:$0xf] (%p78_p3), %v194_v0  ;;  %197 = vst [vmem:[%s173_s27 + $0x4] sm:$0xf] (%p78_p3), %v196_v1  ;;  %v200_v3 = vld [vmem:[%s797_s26 + $0x24] sm:$0xf] (%p78_p3) }
  0x13   : > { %v202_v4 = vld [vmem:[%s797_s26 + $0x30] sm:$0xf] (%p78_p3)  ;;  %199 = vst [vmem:[%s173_s27 + $0x8] sm:$0xf] (%p78_p3), %v198_v2  ;;  %201 = vst [vmem:[%s173_s27 + $0xc] sm:$0xf] (%p78_p3), %v200_v3 }
  0x14   : > { %203 = vst [vmem:[%s173_s27 + $0x10] sm:$0xf] (%p78_p3), %v202_v4  ;;  %v204_v5 = vld [vmem:[%s797_s26 + $0x3c] sm:$0xf] (%p78_p3)  ;;  %v206_v6 = vld [vmem:[%s797_s26 + $0x48] sm:$0xf] (%p78_p3) }
  0x15   : > { %v208_v7 = vld [vmem:[%s797_s26 + $0x54] sm:$0xf]  ;;  %205 = vst [vmem:[%s173_s27 + $0x14] sm:$0xf] %v204_v5  ;;  %207 = vst [vmem:[%s173_s27 + $0x18] sm:$0xf] %v206_v6 }
  0x16   : > { %209 = vst [vmem:[%s173_s27 + $0x1c] sm:$0xf] %v208_v7  ;;  %v210_v8 = vld [vmem:[%s797_s26 + $0x60] sm:$0xf]  ;;  %v212_v9 = vld [vmem:[%s797_s26 + $0x6c] sm:$0xf] }
  0x17   : > { %v214_v10 = vld [vmem:[%s797_s26 + $0x78] sm:$0xf]  ;;  %211 = vst [vmem:[%s173_s27 + $0x20] sm:$0xf] %v210_v8  ;;  %213 = vst [vmem:[%s173_s27 + $0x24] sm:$0xf] %v212_v9 }
  0x18   : > { %215 = vst [vmem:[%s173_s27 + $0x28] sm:$0xf] %v214_v10  ;;  %v216_v11 = vld [vmem:[%s797_s26 + $0x84] sm:$0xf]  ;;  %v218_v12 = vld [vmem:[%s797_s26 + $0x90] sm:$0xf] }
  0x19   : > { %v220_v13 = vld [vmem:[%s797_s26 + $0x9c] sm:$0xf]  ;;  %217 = vst [vmem:[%s173_s27 + $0x2c] sm:$0xf] %v216_v11  ;;  %219 = vst [vmem:[%s173_s27 + $0x30] sm:$0xf] %v218_v12 }
  0x1a   : > { %221 = vst [vmem:[%s173_s27 + $0x34] sm:$0xf] %v220_v13  ;;  %v222_v14 = vld [vmem:[%s797_s26 + $0xa8] sm:$0xf]  ;;  %v224_v15 = vld [vmem:[%s797_s26 + $0xb4] sm:$0xf] }
  0x1b   : > { %223 = vst [vmem:[%s173_s27 + $0x38] sm:$0xf] %v222_v14  ;;  %225 = vst [vmem:[%s173_s27 + $0x3c] sm:$0xf] %v224_v15 }
  0x1c PF: > { %p599_p6 = scmp.ge.s32.totalorder %s730_s16, 1  ;;  %p285_p7 = scmp.lt.s32.totalorder %s730_s16, 4 }
  0x1e   : > { %p286_p8 = pnand %p599_p6, %p285_p7 }
  0x1f   : > { %s292_s28 = sand.u32 (!%p286_p8), 1, %s714_s12   ;;  %v732_v16 = vmov (!%p286_p8), 0.0   ;;  %vm733_vm0 = vmmov (!%p286_p8), 0   ;;  %v354_v25 = vld [vmem:[%s844_s0] sm:$0xff] (!%p286_p8)  ;;  %p336_p9 = scmp.lt.s32.totalorder (!%p286_p8), %s722_s14, 2 }
  0x20   : > { %289 = sbr.rel (%p286_p8) target bundleno = 283 (0x11b), region = 69  ;;  %622 = vmatprep.subr.bf16.mxu0 (!%p286_p8), %v732_v16  ;;  %s600_s29 = sshll.u32 (!%p286_p8), %s292_s28, 6  ;;  %638 = vmatprep.mubr.msk.bf16.mxu0 (!%p286_p8), %vm733_vm0, %v732_v16  ;;  %v355_v26 = vpack.c.bf16 (!%p286_p8), %v354_v25, %v354_v25 }
  0x21   : > { %s294_s30 = scalar_lea.vmem (!%p286_p8), [#allocation3], %s600_s29 }
  0x22   : > { %v684_v17 = vld [vmem:[%s294_s30] sm:$0xff] (!%p286_p8)   ;;  %v685_v18 = vld [vmem:[%s294_s30 + $0x8] sm:$0xff] (!%p286_p8)   ;;  %v686_v19 = vld [vmem:[%s294_s30 + $0x10] sm:$0xff] (!%p286_p8)  }
  0x23   : > { %623 = vmatpush3.bf16.msra.mxu0 (!%p286_p8), %v684_v17  ;;  %v687_v20 = vld [vmem:[%s294_s30 + $0x18] sm:$0xff] (!%p286_p8)   ;;  %v688_v21 = vld [vmem:[%s294_s30 + $0x20] sm:$0xff] (!%p286_p8)   ;;  %v689_v22 = vld [vmem:[%s294_s30 + $0x28] sm:$0xff] (!%p286_p8)  }
  0x24   : > { %624 = vmatprep.subr.bf16.mxu0 (!%p286_p8), %v732_v16  ;;  %v690_v23 = vld [vmem:[%s294_s30 + $0x30] sm:$0xff] (!%p286_p8)   ;;  %v691_v24 = vld [vmem:[%s294_s30 + $0x38] sm:$0xff] (!%p286_p8)  }
  0x27   : > { %625 = vmatpush3.bf16.msra.mxu0 %v685_v18  ;;  %s855_s14 = smov (!%p336_p9, %s722_s14), 2 }
  0x28   : > { %626 = vmatprep.subr.bf16.mxu0 %v732_v16  ;;  %s338_s8 = scalar_lea.vmem %s846_s2, %s855_s14  ;;  %s601_s9 = sshll.u32 %s855_s14, 2 }
  0x29   : > { %v610_v27 = vld [vmem:[%s338_s8] ss:$0 sm:$0xff]  ;;  %s346_s12 = scalar_lea.vmem %s847_s3, %s601_s9 }
  0x2b   : > { %627 = vmatpush3.bf16.msra.mxu0 %v686_v19 }
  0x2c   : > { %628 = vmatprep.subr.bf16.mxu0 %v732_v16 }
  0x2f   : > { %629 = vmatpush3.bf16.msra.mxu0 %v687_v20 }
  0x30   : > { %630 = vmatprep.subr.bf16.mxu0 %v732_v16 }
  0x33   : > { %631 = vmatpush3.bf16.msra.mxu0 %v688_v21 }
  0x34   : > { %632 = vmatprep.subr.bf16.mxu0 %v732_v16 }
  0x37   : > { %633 = vmatpush3.bf16.msra.mxu0 %v689_v22 }
  0x38   : > { %634 = vmatprep.subr.bf16.mxu0 %v732_v16 }
  0x3b   : > { %635 = vmatpush3.bf16.msra.mxu0 %v690_v23 }
  0x3c   : > { %636 = vmatprep.subr.bf16.mxu0 %v732_v16 }
  0x3f   : > { %637 = vmatpush3.bf16.msra.mxu0 %v691_v24 }
  0x42   : > { %639 = vmatmul.mubr.bf16.vlgmr.msra.gmra.mrb[0].mxu0 %v355_v26 }
 0x115   : > { %v454_v28 = vpop.f32.mrb[0].mxu0 }
 0x116   : > { %v473_v29 = vadd.f32 %v610_v27, %v454_v28  ;;  %v640_v30 = vpop.f32.mrb[1].mxu0 }
 0x117   : > { %v457_v31 = vpop.f32.mrb[2].mxu0 }
 0x118   : > { %v474_v32 = vpack.c.bf16 %v473_v29, %v473_v29  ;;  %v641_v33 = vpop.f32.mrb[3].mxu0 }
 0x11a   : > { %475 = vst [vmem:[%s346_s12] sm:$0xf] %v474_v32 }
 0x11b PF: > { %s13_s16 = sadd.s32 1, %s730_s16   ;;  %s848_s12 = smov %s718_s13 }
 0x11c   : > { %p10_p10 = scmp.ge.s32.totalorder %s13_s16, 5   ;;  %s849_s13 = smov %s789_s20 }
 0x11d   : > { %s850_s14 = smov %s726_s15  ;;  %s851_s15 = smov %s853_s17 }
 0x11e   :  { %12 = sbr.rel (!%p10_p10) target bundleno = 3 (0x3), region = 122 }

// kernel: _forward_impl.56
= control target key start
LH: loop header
LB: loop body
LE: loop exit
PB: predicated region body
PF: predicated region fallthrough
CT: control target
= control target key end

     0   :  { %vm55_vm0 = vcmask 130048   ;;  %v1217_v0 = vmov 0.0   ;;  %vm1218_vm1 = vmmov 0   ;;  %vm111_vm2 = vcmask 64512   ;;  %s1220_s20 = smov 96   ;;  %s1222_s21 = smov 64   ;;  %s1421_s1 = inlined_call_operand.vmem [shape: bf16[8,384], index: 1, kind: input, shape index: {}, may-alias: {0,1,2}]   ;;  %s1422_s0 = inlined_call_operand.vmem [shape: bf16[8,384], index: 0, kind: input, shape index: {}, may-alias: {0,1,2}]   ;;  %s1423_s3 = inlined_call_operand.vmem [shape: f32[1,8], index: 3, kind: input, shape index: {}]   ;;  %s1424_s2 = inlined_call_operand.vmem [shape: bf16[8,384], index: 2, kind: input, shape index: {}, may-alias: {0,1,2}]   ;;  %s1425_s4 = inlined_call_operand.vmem [shape: bf16[8,128], index: 4, kind: output, shape index: {}]  }
   0x1   :  { %1077 = vmatprep.subr.bf16.mxu0 %v1217_v0  ;;  %v1023_v1 = vld [vmem:[%s1421_s1 + $0x4] sm:$0xf]  ;;  %1079 = vmatprep.mubr.msk.bf16.mxu0 %vm1218_vm1, %v1217_v0  ;;  %v52_v3 = vld [vmem:[%s1422_s0] sm:$0xf]  ;;  %s1219_s0 = smov 112   ;;  %s1223_s22 = smov 48  }
   0x2   :  { %v60_v2 = vsel %vm55_vm0, %v1023_v1, 0  ;;  %1083 = vmatprep.subr.bf16.mxu1 %v1217_v0  ;;  %1085 = vmatprep.mubr.msk.bf16.mxu1 %vm1218_vm1, %v1217_v0  ;;  %v1271_v5 = vld [vmem:[%s1423_s3] ss:$0 sm:$0xff]  ;;  %v1029_v12 = vcombine.low %v1023_v1, %v1023_v1  ;;  %v1028_v13 = vcombine.low %v52_v3, %v52_v3  ;;  %s1221_s3 = smov 80   ;;  %s1224_s23 = smov 32   ;;  %vm127_vm3 = vcmask 1043456  }
   0x3   :  { %1078 = vmatpush3.bf16.xpose.msra.mxu0 %v60_v2  ;;  %s1225_s24 = smov 16   ;;  %v1289_v19 = vld [vmem:[%s1424_s2 + $0x8] sm:$0xf]  ;;  %vm993_vm4 = vcmask 261120   ;;  %vm995_vm5 = vcmask 392192   ;;  %vm997_vm6 = vcmask 523264  }
   0x4   :  { %1095 = vmatprep.subr.bf16.mxu0 %v1217_v0  ;;  %179 = vrot.lane.b32.xlu1 %v1029_v12, %s1219_s0  ;;  %v129_v20 = vsel %vm127_vm3, %v1289_v19, 0  ;;  %vm999_vm7 = vcmask 654336   ;;  %vm1001_vm8 = vcmask 785408   ;;  %vm1003_vm9 = vcmask 916480  }
   0x5   :  { %1084 = vmatpush3.bf16.msra.mxu1 %v129_v20 }
   0x6   :  { %1089 = vmatprep.subr.bf16.mxu1 %v1217_v0 }
   0x8   :  { %174 = vrot.lane.b32.xlu1 %v1028_v13, %s1219_s0 }
   0xa   :  { %1080 = vmatmul.mubr.msk.bf16.vlgmr.msra.gmra.mrb[0].mxu0 %vm55_vm0, %v52_v3 }
   0xb   :  { %1097 = vmatprep.mubr.msk.bf16.mxu0 %vm1218_vm1, %v1217_v0 }
   0xc   :  { %292 = vrot.lane.b32.xlu1 %v1028_v13, %s1220_s20 }
  0x10   :  { %406 = vrot.lane.b32.xlu1 %v1029_v12, %s1221_s3 }
  0x14   :  { %404 = vrot.lane.b32.xlu1 %v1028_v13, %s1221_s3 }
  0x18   :  { %518 = vrot.lane.b32.xlu1 %v1029_v12, %s1222_s21 }
  0x1c   :  { %516 = vrot.lane.b32.xlu1 %v1028_v13, %s1222_s21 }
  0x20   :  { %630 = vrot.lane.b32.xlu1 %v1029_v12, %s1223_s22 }
  0x24   :  { %742 = vrot.lane.b32.xlu1 %v1029_v12, %s1224_s23 }
  0x28   :  { %854 = vrot.lane.b32.xlu1 %v1029_v12, %s1225_s24 }
  0x76   :  { %v180_v22 = vpop.permute.xlu1 %179 }
  0x77   :  { %v185_v27 = vsel %vm55_vm0, %v180_v22, 0 }
  0x7a   :  { %v175_v23 = vpop.permute.xlu1 %174 }
  0x7e   :  { %v293_v26 = vpop.permute.xlu1 %292 }
  0x82   :  { %v407_v30 = vpop.permute.xlu1 %406 }
  0x83   :  { %v412_v33 = vsel %vm55_vm0, %v407_v30, 0 }
  0x86   :  { %v405_v32 = vpop.permute.xlu1 %404 }
  0x8a   :  { %v519_v34 = vpop.permute.xlu1 %518 }
  0x8b   :  { %v524_v36 = vsel %vm55_vm0, %v519_v34, 0 }
  0x8e   :  { %v517_v35 = vpop.permute.xlu1 %516 }
  0x92   :  { %v631_v37 = vpop.permute.xlu1 %630 }
  0x93   :  { %v636_v38 = vsel %vm55_vm0, %v631_v37, 0 }
  0x96   :  { %v743_v39 = vpop.permute.xlu1 %742 }
  0x97   :  { %v748_v41 = vsel %vm55_vm0, %v743_v39, 0 }
  0x9a   :  { %v855_v42 = vpop.permute.xlu1 %854 }
  0x9b   :  { %v860_v44 = vsel %vm55_vm0, %v855_v42, 0 }
  0xdd   :  { %v96_v4 = vpop.f32.mrb[0].mxu0 }
  0xde   :  { %v102_v6 = vmul.f32 0.25, %v96_v4  ;;  %v1081_v7 = vpop.f32.mrb[1].mxu0 }
  0xdf   :  { %v99_v8 = vpop.f32.mrb[2].mxu0 }
  0xe0   :  { %v1082_v9 = vpop.f32.mrb[3].mxu0  ;;  %v110_v10 = vadd.f32 %v1271_v5, %v102_v6 }
  0xe2   :  { %v112_v11 = vsel %vm111_vm2, %v110_v10, -inf }
  0xe3   :  { %113 = vmax.xlane.f32.xlu0 %v112_v11 }
 0x170   :  { %v114_v14 = vpop.xlane.xlu0 %113 }
 0x171   :  { %v115_v15 = vsub.f32 %v110_v10, %v114_v14 }
 0x173   :  { %v116_v16 = vmul.f32 1.442695, %v115_v15 }
 0x175   :  { %1185 = vpow2.f32 %v116_v16 }
 0x17f   :  { %v1186_v17 = vpop.eup %1185 }
 0x180   :  { %v118_v18 = vsel %vm111_vm2, %v1186_v17, 0.0 }
 0x181   :  { %119 = vadd.xlane.f32.xlu0 %v118_v18 }
 0x197   :  { %294 = vrot.lane.b32.xlu0 %v1029_v12, %s1220_s20 }
 0x19b   :  { %628 = vrot.lane.b32.xlu0 %v1028_v13, %s1223_s22 }
 0x19f   :  { %740 = vrot.lane.b32.xlu0 %v1028_v13, %s1224_s23 }
 0x1a3   :  { %852 = vrot.lane.b32.xlu0 %v1028_v13, %s1225_s24 }
 0x20e   :  { %v120_v21 = vpop.xlane.xlu0 %119 }
 0x20f   :  { %1187 = vrcp.f32 %v120_v21 }
 0x212   :  { %v295_v29 = vpop.permute.xlu0 %294 }
 0x213   :  { %v300_v31 = vsel %vm55_vm0, %v295_v29, 0 }
 0x216   :  { %v629_v40 = vpop.permute.xlu0 %628 }
 0x219   :  { %v1188_v24 = vpop.eup %1187 }
 0x21a   :  { %v122_v25 = vmul.f32 %v1188_v24, %v1186_v17  ;;  %v741_v43 = vpop.permute.xlu0 %740 }
 0x21c   :  { %v123_v28 = vpack.c.bf16 %v122_v25, %v122_v25 }
 0x21e   :  { %1086 = vmatmul.mubr.msk.bf16.vlgmr.msra.gmra.mrb[0].mxu1 %vm111_vm2, %v123_v28  ;;  %v853_v45 = vpop.permute.xlu0 %852 }
 0x21f   :  { %1090 = vmatpush3.bf16.xpose.msra.mxu1 %v185_v27  ;;  %1091 = vmatprep.mubr.msk.bf16.mxu1 %vm1218_vm1, %v1217_v0 }
 0x220   :  { %1101 = vmatprep.subr.bf16.mxu1 %v1217_v0 }
 0x226   :  { %1092 = vmatmul.mubr.msk.bf16.vlgmr.msra.gmra.mrb[4].mxu1 %vm55_vm0, %v175_v23 }
 0x227   :  { %1102 = vmatpush3.bf16.xpose.msra.mxu1 %v300_v31  ;;  %1103 = vmatprep.mubr.msk.bf16.mxu1 %vm1218_vm1, %v1217_v0 }
 0x228   :  { %1113 = vmatprep.subr.bf16.mxu1 %v1217_v0 }
 0x22e   :  { %1104 = vmatmul.mubr.msk.bf16.vlgmr.msra.gmra.mrb[8].mxu1 %vm55_vm0, %v293_v26 }
 0x22f   :  { %1114 = vmatpush3.bf16.xpose.msra.mxu1 %v412_v33  ;;  %1115 = vmatprep.mubr.msk.bf16.mxu1 %vm1218_vm1, %v1217_v0 }
 0x230   :  { %1125 = vmatprep.subr.bf16.mxu1 %v1217_v0 }
 0x236   :  { %1116 = vmatmul.mubr.msk.bf16.vlgmr.msra.gmra.mrb[12].mxu1 %vm55_vm0, %v405_v32 }
 0x237   :  { %1126 = vmatpush3.bf16.xpose.msra.mxu1 %v524_v36  ;;  %1127 = vmatprep.mubr.msk.bf16.mxu1 %vm1218_vm1, %v1217_v0 }
 0x238   :  { %1137 = vmatprep.subr.bf16.mxu1 %v1217_v0 }
 0x23e   :  { %1128 = vmatmul.mubr.msk.bf16.vlgmr.msra.gmra.mrb[16].mxu1 %vm55_vm0, %v517_v35 }
 0x23f   :  { %1138 = vmatpush3.bf16.xpose.msra.mxu1 %v636_v38  ;;  %1139 = vmatprep.mubr.msk.bf16.mxu1 %vm1218_vm1, %v1217_v0  ;;  %v1031_v38 = vcombine.low %v1289_v19, %v1289_v19 }
 0x240   :  { %1149 = vmatprep.subr.bf16.mxu1 %v1217_v0 }
 0x246   :  { %1140 = vmatmul.mubr.msk.bf16.vlgmr.msra.gmra.mrb[20].mxu1 %vm55_vm0, %v629_v40 }
 0x247   :  { %1150 = vmatpush3.bf16.xpose.msra.mxu1 %v748_v41  ;;  %1151 = vmatprep.mubr.msk.bf16.mxu1 %vm1218_vm1, %v1217_v0 }
 0x248   :  { %1161 = vmatprep.subr.bf16.mxu1 %v1217_v0 }
 0x24e   :  { %1152 = vmatmul.mubr.msk.bf16.vlgmr.msra.gmra.mrb[24].mxu1 %vm55_vm0, %v741_v43 }
 0x24f   :  { %1162 = vmatpush3.bf16.xpose.msra.mxu1 %v860_v44  ;;  %1163 = vmatprep.mubr.msk.bf16.mxu1 %vm1218_vm1, %v1217_v0 }
 0x256   :  { %1164 = vmatmul.mubr.msk.bf16.vlgmr.msra.gmra.mrb[28].mxu1 %vm55_vm0, %v853_v45 }
 0x2f1   :  { %v1333_v46 = vpop.f32.mrb[0].mxu1 }
 0x2f2   :  { %v1087_v47 = vpop.f32.mrb[1].mxu1 }
 0x2f3   :  { %v168_v48 = vpop.f32.mrb[2].mxu1 }
 0x2f4   :  { %v1088_v49 = vpop.f32.mrb[3].mxu1 }
 0x2f9   :  { %v221_v50 = vpop.f32.mrb[4].mxu1 }
 0x2fa   :  { %v227_v51 = vmul.f32 0.25, %v221_v50  ;;  %v1093_v52 = vpop.f32.mrb[5].mxu1 }
 0x2fb   :  { %v224_v53 = vpop.f32.mrb[6].mxu1 }
 0x2fc   :  { %v1094_v54 = vpop.f32.mrb[7].mxu1  ;;  %v228_v55 = vadd.f32 %v1271_v5, %v227_v51 }
 0x2fe   :  { %v229_v56 = vsel %vm111_vm2, %v228_v55, -inf }
 0x2ff   :  { %230 = vmax.xlane.f32.xlu1 %v229_v56 }
 0x301   :  { %v336_v57 = vpop.f32.mrb[8].mxu1 }
 0x302   :  { %v342_v58 = vmul.f32 0.25, %v336_v57  ;;  %v1105_v59 = vpop.f32.mrb[9].mxu1 }
 0x303   :  { %v339_v60 = vpop.f32.mrb[10].mxu1 }
 0x304   :  { %v1106_v61 = vpop.f32.mrb[11].mxu1  ;;  %v343_v62 = vadd.f32 %v1271_v5, %v342_v58 }
 0x306   :  { %v344_v63 = vsel %vm111_vm2, %v343_v62, -inf }
 0x307   :  { %345 = vmax.xlane.f32.xlu0 %v344_v63 }
 0x309   :  { %v448_v1 = vpop.f32.mrb[12].mxu1 }
 0x30a   :  { %v454_v2 = vmul.f32 0.25, %v448_v1  ;;  %v1117_v3 = vpop.f32.mrb[13].mxu1 }
 0x30b   :  { %v451_v4 = vpop.f32.mrb[14].mxu1 }
 0x30c   :  { %v455_v6 = vadd.f32 %v1271_v5, %v454_v2  ;;  %v1118_v7 = vpop.f32.mrb[15].mxu1 }
 0x30e   :  { %v456_v8 = vsel %vm111_vm2, %v455_v6, -inf }
 0x30f   :  { %457 = vmax.xlane.f32.xlu0 %v456_v8 }
 0x311   :  { %v560_v9 = vpop.f32.mrb[16].mxu1 }
 0x312   :  { %v566_v10 = vmul.f32 0.25, %v560_v9  ;;  %v1129_v11 = vpop.f32.mrb[17].mxu1 }
 0x313   :  { %v563_v12 = vpop.f32.mrb[18].mxu1 }
 0x314   :  { %v567_v13 = vadd.f32 %v1271_v5, %v566_v10  ;;  %v1130_v14 = vpop.f32.mrb[19].mxu1 }
 0x316   :  { %v568_v15 = vsel %vm111_vm2, %v567_v13, -inf }
 0x317   :  { %569 = vmax.xlane.f32.xlu1 %v568_v15 }
 0x319   :  { %v672_v16 = vpop.f32.mrb[20].mxu1 }
 0x31a   :  { %v678_v17 = vmul.f32 0.25, %v672_v16  ;;  %v1141_v18 = vpop.f32.mrb[21].mxu1 }
 0x31b   :  { %v675_v20 = vpop.f32.mrb[22].mxu1 }
 0x31c   :  { %v679_v21 = vadd.f32 %v1271_v5, %v678_v17  ;;  %v1142_v22 = vpop.f32.mrb[23].mxu1 }
 0x31e   :  { %v680_v23 = vsel %vm111_vm2, %v679_v21, -inf }
 0x31f   :  { %681 = vmax.xlane.f32.xlu0 %v680_v23 }
 0x321   :  { %v784_v24 = vpop.f32.mrb[24].mxu1 }
 0x322   :  { %v790_v25 = vmul.f32 0.25, %v784_v24  ;;  %v1153_v26 = vpop.f32.mrb[25].mxu1 }
 0x323   :  { %v787_v27 = vpop.f32.mrb[26].mxu1 }
 0x324   :  { %v791_v28 = vadd.f32 %v1271_v5, %v790_v25  ;;  %v1154_v29 = vpop.f32.mrb[27].mxu1 }
 0x326   :  { %v792_v30 = vsel %vm111_vm2, %v791_v28, -inf }
 0x327   :  { %793 = vmax.xlane.f32.xlu1 %v792_v30 }
 0x329   :  { %v896_v31 = vpop.f32.mrb[28].mxu1 }
 0x32a   :  { %v902_v32 = vmul.f32 0.25, %v896_v31  ;;  %v1165_v33 = vpop.f32.mrb[29].mxu1 }
 0x32b   :  { %v899_v34 = vpop.f32.mrb[30].mxu1 }
 0x32c   :  { %v903_v35 = vadd.f32 %v1271_v5, %v902_v32  ;;  %v1166_v36 = vpop.f32.mrb[31].mxu1 }
 0x32e   :  { %v904_v37 = vsel %vm111_vm2, %v903_v35, -inf }
 0x32f   :  { %905 = vmax.xlane.f32.xlu0 %v904_v37 }
 0x338   :  { %244 = vrot.lane.b32.xlu1 %v1031_v38, %s1219_s0 }
 0x345   :  { %356 = vrot.lane.b32.xlu0 %v1031_v38, %s1220_s20 }
 0x38c   :  { %v231_v39 = vpop.xlane.xlu1 %230 }
 0x38d   :  { %v232_v40 = vsub.f32 %v228_v55, %v231_v39 }
 0x38f   :  { %v233_v41 = vmul.f32 1.442695, %v232_v40 }
 0x391   :  { %1189 = vpow2.f32 %v233_v41 }
 0x394   :  { %v346_v42 = vpop.xlane.xlu0 %345 }
 0x395   :  { %v347_v43 = vsub.f32 %v343_v62, %v346_v42 }
 0x397   :  { %v348_v44 = vmul.f32 1.442695, %v347_v43 }
 0x399   :  { %1191 = vpow2.f32 %v348_v44 }
 0x39b   :  { %v1190_v5 = vpop.eup %1189 }
 0x39c   :  { %v458_v45 = vpop.xlane.xlu0 %457  ;;  %v235_v47 = vsel %vm111_vm2, %v1190_v5, 0.0 }
 0x39d   :  { %v459_v48 = vsub.f32 %v455_v6, %v458_v45  ;;  %236 = vadd.xlane.f32.xlu1 %v235_v47 }
 0x39f   :  { %v460_v49 = vmul.f32 1.442695, %v459_v48 }
 0x3a1   :  { %1193 = vpow2.f32 %v460_v49 }
 0x3a3   :  { %v1192_v19 = vpop.eup %1191 }
 0x3a4   :  { %v350_v50 = vsel %vm111_vm2, %v1192_v19, 0.0  ;;  %v570_v53 = vpop.xlane.xlu1 %569 }
 0x3a5   :  { %351 = vadd.xlane.f32.xlu0 %v350_v50  ;;  %v571_v57 = vsub.f32 %v567_v13, %v570_v53 }
 0x3a7   :  { %v572_v59 = vmul.f32 1.442695, %v571_v57 }
 0x3a9   :  { %1195 = vpow2.f32 %v572_v59 }
 0x3ab   :  { %v1355_v51 = vpop.eup %1193 }
 0x3ac   :  { %v462_v52 = vsel %vm111_vm2, %v1355_v51, 0.0  ;;  %v682_v58 = vpop.xlane.xlu0 %681 }
 0x3ad   :  { %463 = vadd.xlane.f32.xlu1 %v462_v52  ;;  %v683_v60 = vsub.f32 %v679_v21, %v682_v58 }
 0x3af   :  { %v684_v63 = vmul.f32 1.442695, %v683_v60 }
 0x3b1   :  { %1197 = vpow2.f32 %v684_v63 }
 0x3b3   :  { %v1196_v4 = vpop.eup %1195 }
 0x3b4   :  { %v794_v54 = vpop.xlane.xlu1 %793  ;;  %v574_v6 = vsel %vm111_vm2, %v1196_v4, 0.0 }
 0x3b5   :  { %v795_v62 = vsub.f32 %v791_v28, %v794_v54 }
 0x3b7   :  { %v796_v2 = vmul.f32 1.442695, %v795_v62 }
 0x3b8   :  { %v245_v55 = vpop.permute.xlu1 %244 }
 0x3b9   :  { %v250_v56 = vsel %vm127_vm3, %v245_v55, 0  ;;  %1199 = vpow2.f32 %v796_v2 }
 0x3ba   :  { %1096 = vmatpush3.bf16.msra.mxu0 %v250_v56 }
 0x3bb   :  { %468 = vrot.lane.b32.xlu0 %v1031_v38, %s1221_s3  ;;  %1107 = vmatprep.subr.bf16.mxu0 %v1217_v0  ;;  %v1198_v7 = vpop.eup %1197 }
 0x3bc   :  { %v906_v61 = vpop.xlane.xlu0 %905  ;;  %v686_v9 = vsel %vm111_vm2, %v1198_v7, 0.0 }
 0x3bd   :  { %v907_v1 = vsub.f32 %v903_v35, %v906_v61 }
 0x3be   :  { %580 = vrot.lane.b32.xlu1 %v1031_v38, %s1222_s21 }
 0x3bf   :  { %v908_v3 = vmul.f32 1.442695, %v907_v1 }
 0x3c0   :  { %v357_v14 = vpop.permute.xlu0 %356 }
 0x3c1   :  { %1201 = vpow2.f32 %v908_v3  ;;  %v362_v20 = vsel %vm127_vm3, %v357_v14, 0 }
 0x3c3   :  { %v1364_v8 = vpop.eup %1199 }
 0x3c4   :  { %v798_v11 = vsel %vm111_vm2, %v1364_v8, 0.0 }
 0x3cb   :  { %v1367_v10 = vpop.eup %1201 }
 0x3cc   :  { %v910_v12 = vsel %vm111_vm2, %v1367_v10, 0.0 }
 0x3da   :  { %575 = vadd.xlane.f32.xlu0 %v574_v6 }
 0x3de   :  { %687 = vadd.xlane.f32.xlu0 %v686_v9 }
 0x3e2   :  { %799 = vadd.xlane.f32.xlu1 %v798_v11  ;;  %911 = vadd.xlane.f32.xlu0 %v910_v12 }
 0x3f3   :  { %804 = vrot.lane.b32.xlu1 %v1031_v38, %s1224_s23 }
 0x3f7   :  { %916 = vrot.lane.b32.xlu1 %v1031_v38, %s1225_s24 }
 0x3f8   :  { %692 = vrot.lane.b32.xlu0 %v1031_v38, %s1223_s22 }
 0x42a   :  { %v237_v13 = vpop.xlane.xlu1 %236 }
 0x42b   :  { %1203 = vrcp.f32 %v237_v13 }
 0x432   :  { %v352_v15 = vpop.xlane.xlu0 %351 }
 0x433   :  { %1205 = vrcp.f32 %v352_v15 }
 0x435   :  { %v1204_v16 = vpop.eup %1203 }
 0x436   :  { %v239_v17 = vmul.f32 %v1204_v16, %v1190_v5  ;;  %v469_v24 = vpop.permute.xlu0 %468 }
 0x437   :  { %v474_v26 = vsel %vm127_vm3, %v469_v24, 0 }
 0x438   :  { %v240_v18 = vpack.c.bf16 %v239_v17, %v239_v17 }
 0x43a   :  { %1098 = vmatmul.mubr.msk.bf16.vlgmr.msra.gmra.mrb[4].mxu0 %vm111_vm2, %v240_v18  ;;  %v464_v21 = vpop.xlane.xlu1 %463 }
 0x43b   :  { %1207 = vrcp.f32 %v464_v21  ;;  %1108 = vmatpush3.bf16.msra.mxu0 %v362_v20  ;;  %1109 = vmatprep.mubr.msk.bf16.mxu0 %vm1218_vm1, %v1217_v0 }
 0x43c   :  { %1119 = vmatprep.subr.bf16.mxu0 %v1217_v0 }
 0x43d   :  { %v1206_v22 = vpop.eup %1205 }
 0x43e   :  { %v354_v23 = vmul.f32 %v1206_v22, %v1192_v19  ;;  %v581_v29 = vpop.permute.xlu1 %580 }
 0x43f   :  { %v586_v31 = vsel %vm127_vm3, %v581_v29, 0 }
 0x440   :  { %v355_v25 = vpack.c.bf16 %v354_v23, %v354_v23 }
 0x442   :  { %1110 = vmatmul.mubr.msk.bf16.vlgmr.msra.gmra.mrb[8].mxu0 %vm111_vm2, %v355_v25 }
 0x443   :  { %1120 = vmatpush3.bf16.msra.mxu0 %v474_v26  ;;  %1121 = vmatprep.mubr.msk.bf16.mxu0 %vm1218_vm1, %v1217_v0 }
 0x444   :  { %1131 = vmatprep.subr.bf16.mxu0 %v1217_v0 }
 0x445   :  { %v1208_v27 = vpop.eup %1207 }
 0x446   :  { %v466_v28 = vmul.f32 %v1208_v27, %v1355_v51 }
 0x448   :  { %v467_v30 = vpack.c.bf16 %v466_v28, %v466_v28 }
 0x44a   :  { %1122 = vmatmul.mubr.msk.bf16.vlgmr.msra.gmra.mrb[12].mxu0 %vm111_vm2, %v467_v30 }
 0x44b   :  { %1132 = vmatpush3.bf16.msra.mxu0 %v586_v31  ;;  %1133 = vmatprep.mubr.msk.bf16.mxu0 %vm1218_vm1, %v1217_v0 }
 0x44c   :  { %1143 = vmatprep.subr.bf16.mxu0 %v1217_v0 }
 0x467   :  { %v576_v32 = vpop.xlane.xlu0 %575 }
 0x468   :  { %1209 = vrcp.f32 %v576_v32 }
 0x46b   :  { %v688_v33 = vpop.xlane.xlu0 %687 }
 0x46c   :  { %1211 = vrcp.f32 %v688_v33 }
 0x46f   :  { %v912_v34 = vpop.xlane.xlu0 %911  ;;  %v800_v35 = vpop.xlane.xlu1 %799 }
 0x470   :  { %1213 = vrcp.f32 %v800_v35 }
 0x471   :  { %1215 = vrcp.f32 %v912_v34 }
 0x472   :  { %v1210_v36 = vpop.eup %1209 }
 0x473   :  { %v578_v37 = vmul.f32 %v1210_v36, %v1196_v4  ;;  %v693_v38 = vpop.permute.xlu0 %692  ;;  %v805_v43 = vpop.permute.xlu1 %804 }
 0x474   :  { %v698_v39 = vsel %vm127_vm3, %v693_v38, 0  ;;  %v810_v44 = vsel %vm127_vm3, %v805_v43, 0 }
 0x475   :  { %v579_v40 = vpack.c.bf16 %v578_v37, %v578_v37 }
 0x476   :  { %v1212_v41 = vpop.eup %1211 }
 0x477   :  { %1134 = vmatmul.mubr.msk.bf16.vlgmr.msra.gmra.mrb[16].mxu0 %vm111_vm2, %v579_v40  ;;  %v690_v42 = vmul.f32 %v1212_v41, %v1198_v7  ;;  %v917_v48 = vpop.permute.xlu1 %916 }
 0x478   :  { %1144 = vmatpush3.bf16.msra.mxu0 %v698_v39  ;;  %1145 = vmatprep.mubr.msk.bf16.mxu0 %vm1218_vm1, %v1217_v0  ;;  %v922_v49 = vsel %vm127_vm3, %v917_v48, 0 }
 0x479   :  { %1155 = vmatprep.subr.bf16.mxu0 %v1217_v0  ;;  %v691_v5 = vpack.c.bf16 %v690_v42, %v690_v42 }
 0x47a   :  { %v1214_v45 = vpop.eup %1213 }
 0x47b   :  { %v802_v47 = vmul.f32 %v1214_v45, %v1364_v8  ;;  %v1216_v50 = vpop.eup %1215 }
 0x47c   :  { %v914_v51 = vmul.f32 %v1216_v50, %v1367_v10 }
 0x47d   :  { %v803_v19 = vpack.c.bf16 %v802_v47, %v802_v47 }
 0x47e   :  { %v915_v52 = vpack.c.bf16 %v914_v51, %v914_v51 }
 0x47f   :  { %1146 = vmatmul.mubr.msk.bf16.vlgmr.msra.gmra.mrb[20].mxu0 %vm111_vm2, %v691_v5 }
 0x480   :  { %1156 = vmatpush3.bf16.msra.mxu0 %v810_v44  ;;  %1157 = vmatprep.mubr.msk.bf16.mxu0 %vm1218_vm1, %v1217_v0 }
 0x481   :  { %1167 = vmatprep.subr.bf16.mxu0 %v1217_v0 }
 0x487   :  { %1158 = vmatmul.mubr.msk.bf16.vlgmr.msra.gmra.mrb[24].mxu0 %vm111_vm2, %v803_v19 }
 0x488   :  { %1168 = vmatpush3.bf16.msra.mxu0 %v922_v49  ;;  %1169 = vmatprep.mubr.msk.bf16.mxu0 %vm1218_vm1, %v1217_v0 }
 0x48f   :  { %1170 = vmatmul.mubr.msk.bf16.vlgmr.msra.gmra.mrb[28].mxu0 %vm111_vm2, %v915_v52 }
 0x50d   :  { %v286_v53 = vpop.f32.mrb[4].mxu0 }
 0x50e   :  { %965 = vrot.lane.b32.xlu1 %v286_v53, %s1225_s24  ;;  %v1099_v54 = vpop.f32.mrb[5].mxu0 }
 0x50f   :  { %v289_v55 = vpop.f32.mrb[6].mxu0 }
 0x510   :  { %v1100_v56 = vpop.f32.mrb[7].mxu0 }
 0x515   :  { %v398_v57 = vpop.f32.mrb[8].mxu0 }
 0x516   :  { %969 = vrot.lane.b32.xlu1 %v398_v57, %s1224_s23  ;;  %v1111_v58 = vpop.f32.mrb[9].mxu0 }
 0x517   :  { %v401_v59 = vpop.f32.mrb[10].mxu0 }
 0x518   :  { %v1112_v60 = vpop.f32.mrb[11].mxu0 }
 0x51d   :  { %v510_v61 = vpop.f32.mrb[12].mxu0 }
 0x51e   :  { %973 = vrot.lane.b32.xlu0 %v510_v61, %s1223_s22  ;;  %v1123_v0 = vpop.f32.mrb[13].mxu0 }
 0x51f   :  { %v513_v62 = vpop.f32.mrb[14].mxu0 }
 0x520   :  { %v1124_v63 = vpop.f32.mrb[15].mxu0 }
 0x54a   :  { %v622_v1 = vpop.f32.mrb[16].mxu0 }
 0x54b   :  { %977 = vrot.lane.b32.xlu1 %v622_v1, %s1222_s21  ;;  %v1135_v2 = vpop.f32.mrb[17].mxu0 }
 0x54c   :  { %v625_v3 = vpop.f32.mrb[18].mxu0 }
 0x54d   :  { %v1136_v4 = vpop.f32.mrb[19].mxu0 }
 0x552   :  { %v734_v6 = vpop.f32.mrb[20].mxu0 }
 0x553   :  { %981 = vrot.lane.b32.xlu0 %v734_v6, %s1221_s3  ;;  %v1147_v7 = vpop.f32.mrb[21].mxu0 }
 0x554   :  { %v737_v8 = vpop.f32.mrb[22].mxu0 }
 0x555   :  { %v1148_v9 = vpop.f32.mrb[23].mxu0 }
 0x55a   :  { %v846_v10 = vpop.f32.mrb[24].mxu0 }
 0x55b   :  { %985 = vrot.lane.b32.xlu1 %v846_v10, %s1220_s20  ;;  %v1159_v11 = vpop.f32.mrb[25].mxu0 }
 0x55c   :  { %v849_v12 = vpop.f32.mrb[26].mxu0 }
 0x55d   :  { %v1160_v13 = vpop.f32.mrb[27].mxu0 }
 0x562   :  { %v958_v14 = vpop.f32.mrb[28].mxu0 }
 0x563   :  { %989 = vrot.lane.b32.xlu0 %v958_v14, %s1219_s0  ;;  %v1171_v15 = vpop.f32.mrb[29].mxu0 }
 0x564   :  { %v961_v16 = vpop.f32.mrb[30].mxu0 }
 0x565   :  { %v1172_v17 = vpop.f32.mrb[31].mxu0 }
 0x580   :  { %v966_v18 = vpop.permute.xlu1 %965 }
 0x581   :  { %v992_v23 = vsel %vm55_vm0, %v1333_v46, %v966_v18 }
 0x588   :  { %v970_v20 = vpop.permute.xlu1 %969 }
 0x589   :  { %v994_v24 = vsel %vm993_vm4, %v992_v23, %v970_v20 }
 0x590   :  { %v974_v21 = vpop.permute.xlu0 %973 }
 0x591   :  { %v996_v26 = vsel %vm995_vm5, %v994_v24, %v974_v21 }
 0x5bd   :  { %v978_v22 = vpop.permute.xlu1 %977 }
 0x5be   :  { %v998_v28 = vsel %vm997_vm6, %v996_v26, %v978_v22 }
 0x5c5   :  { %v982_v25 = vpop.permute.xlu0 %981 }
 0x5c6   :  { %v1000_v29 = vsel %vm999_vm7, %v998_v28, %v982_v25 }
 0x5cd   :  { %v986_v27 = vpop.permute.xlu1 %985 }
 0x5ce   :  { %v1002_v30 = vsel %vm1001_vm8, %v1000_v29, %v986_v27 }
 0x5d5   :  { %v990_v31 = vpop.permute.xlu0 %989 }
 0x5d6   :  { %v1004_v32 = vsel %vm1003_vm9, %v1002_v30, %v990_v31 }
 0x5d7   :  { %v1005_v33 = vpack.c.bf16 %v1004_v32, %v1004_v32 }
 0x5d9   :  { %1006 = vst [vmem:[%s1425_s4] sm:$0xf] %v1005_v33 }

// kernel: _forward_impl.63
= control target key start
LH: loop header
LB: loop body
LE: loop exit
PB: predicated region body
PF: predicated region fallthrough
CT: control target
= control target key end

     0   :  { %s84_s0 = inlined_call_operand.vmem [shape: f32[8,128], index: 0, kind: input, shape index: {}]   ;;  %s85_s1 = inlined_call_operand.vmem [shape: f32[1,128], index: 1, kind: input, shape index: {}]   ;;  %s86_s2 = inlined_call_operand.vmem [shape: f32[1,128], index: 2, kind: input, shape index: {}]   ;;  %s87_s3 = inlined_call_operand.vmem [shape: f32[8,128], index: 3, kind: output, shape index: {}]  }
   0x1   :  { %v14_v0 = vld [vmem:[%s84_s0] sm:$0xff] }
   0x2   :  { %17 = vadd.xlane.f32.xlu0 %v14_v0  ;;  %v48_v9 = vld [vmem:[%s85_s1] ss:$0 sm:$0xff] }
   0x3   :  { %v49_v11 = vld [vmem:[%s86_s2] ss:$0 sm:$0xff] }
  0x8f   :  { %v18_v1 = vpop.xlane.xlu0 %17 }
  0x90   :  { %v20_v2 = vmul.f32 0.0078125, %v18_v1 }
  0x92   :  { %v21_v3 = vsub.f32 %v14_v0, %v20_v2 }
  0x94   :  { %v22_v4 = vmul.f32 %v21_v3, %v21_v3 }
  0x96   :  { %23 = vadd.xlane.f32.xlu0 %v22_v4 }
 0x123   :  { %v24_v5 = vpop.xlane.xlu0 %23 }
 0x124   :  { %v25_v6 = vmul.f32 0.0078125, %v24_v5 }
 0x126   :  { %v26_v7 = vadd.f32 1e-05, %v25_v6 }
 0x128   :  { %50 = vrsqrt.f32 %v26_v7 }
 0x132   :  { %v51_v8 = vpop.eup %50 }
 0x133   :  { %v28_v10 = vmul.f32 %v51_v8, %v21_v3 }
 0x135   :  { %v35_v12 = vmul.f32 %v48_v9, %v28_v10 }
 0x137   :  { %v42_v13 = vadd.f32 %v49_v11, %v35_v12 }
 0x139   :  { %43 = vst [vmem:[%s87_s3] sm:$0xff] %v42_v13 }

// kernel: _forward_impl.68
= control target key start
LH: loop header
LB: loop body
LE: loop exit
PB: predicated region body
PF: predicated region fallthrough
CT: control target
= control target key end

     0   :  { %v241_v1 = vmov 0   ;;  %v173_v19 = vlaneseq  ;;  %s319_s1 = inlined_call_operand.vmem [shape: bf16[128,256], index: 1, kind: input, shape index: {}]   ;;  %s320_s0 = inlined_call_operand.vmem [shape: f32[8,128], index: 0, kind: input, shape index: {}]   ;;  %s321_s2 = inlined_call_operand.vmem [shape: f32[1,256], index: 2, kind: input, shape index: {}]   ;;  %s322_s3 = inlined_call_operand.vmem [shape: bf16[8,256], index: 3, kind: output, shape index: {}]  }
   0x1   :  { %v217_v0 = vld [vmem:[%s319_s1 + $0x4] ss:$8 sps:$4 sm:$0xff]   ;;  %153 = vmatprep.mubr.bf16.mxu0 %v241_v1  ;;  %v219_v2 = vld [vmem:[%s319_s1] ss:$8 sps:$4 sm:$0xff]   ;;  %v220_v3 = vld [vmem:[%s319_s1 + $0x14] ss:$8 sps:$4 sm:$0xff]  }
   0x2   :  { %121 = vmatprep.subr.bf16.mxu0 %v217_v0  ;;  %v222_v4 = vld [vmem:[%s319_s1 + $0x10] ss:$8 sps:$4 sm:$0xff]   ;;  %v223_v5 = vld [vmem:[%s319_s1 + $0x24] ss:$8 sps:$4 sm:$0xff]   ;;  %v225_v6 = vld [vmem:[%s319_s1 + $0x20] ss:$8 sps:$4 sm:$0xff]  }
   0x3   :  { %122 = vmatpush1.bf16.msra.mxu0 %v219_v2  ;;  %v226_v7 = vld [vmem:[%s319_s1 + $0x34] ss:$8 sps:$4 sm:$0xff]   ;;  %v228_v8 = vld [vmem:[%s319_s1 + $0x30] ss:$8 sps:$4 sm:$0xff]   ;;  %v229_v9 = vld [vmem:[%s319_s1 + $0x44] ss:$8 sps:$4 sm:$0xff]  }
   0x4   :  { %123 = vmatprep.subr.bf16.mxu0 %v220_v3  ;;  %v231_v10 = vld [vmem:[%s319_s1 + $0x40] ss:$8 sps:$4 sm:$0xff]   ;;  %v232_v11 = vld [vmem:[%s319_s1 + $0x54] ss:$8 sps:$4 sm:$0xff]   ;;  %v234_v12 = vld [vmem:[%s319_s1 + $0x50] ss:$8 sps:$4 sm:$0xff]  }
   0x5   :  { %v235_v13 = vld [vmem:[%s319_s1 + $0x64] ss:$8 sps:$4 sm:$0xff]   ;;  %v237_v14 = vld [vmem:[%s319_s1 + $0x60] ss:$8 sps:$4 sm:$0xff]   ;;  %v238_v15 = vld [vmem:[%s319_s1 + $0x74] ss:$8 sps:$4 sm:$0xff]  }
   0x6   :  { %v240_v16 = vld [vmem:[%s319_s1 + $0x70] ss:$8 sps:$4 sm:$0xff]   ;;  %v23_v17 = vld [vmem:[%s320_s0] sm:$0xff]  ;;  %v174_v20 = vshrl.u32 %v173_v19, 7 }
   0x7   :  { %124 = vmatpush1.bf16.msra.mxu0 %v222_v4  ;;  %v24_v18 = vpack.c.bf16 %v23_v17, %v23_v17  ;;  %v171_v22 = vld [vmem:[%s321_s2] sm:$0x3] }
   0x8   :  { %125 = vmatprep.subr.bf16.mxu0 %v223_v5  ;;  %v175_v21 = vsub.s32 0, %v174_v20  ;;  %v179_v23 = vsub.s32 1, %v174_v20 }
   0xa   :  { %v176_v24 = vrot.slane %v171_v22, %v175_v21  ;;  %v180_v25 = vrot.slane %v171_v22, %v179_v23 }
   0xb   :  { %126 = vmatpush1.bf16.msra.mxu0 %v225_v6 }
   0xc   :  { %127 = vmatprep.subr.bf16.mxu0 %v226_v7 }
   0xf   :  { %128 = vmatpush1.bf16.msra.mxu0 %v228_v8 }
  0x10   :  { %129 = vmatprep.subr.bf16.mxu0 %v229_v9 }
  0x13   :  { %130 = vmatpush1.bf16.msra.mxu0 %v231_v10 }
  0x14   :  { %131 = vmatprep.subr.bf16.mxu0 %v232_v11 }
  0x17   :  { %132 = vmatpush1.bf16.msra.mxu0 %v234_v12 }
  0x18   :  { %133 = vmatprep.subr.bf16.mxu0 %v235_v13 }
  0x1b   :  { %134 = vmatpush1.bf16.msra.mxu0 %v237_v14 }
  0x1c   :  { %135 = vmatprep.subr.bf16.mxu0 %v238_v15 }
  0x1f   :  { %136 = vmatpush1.bf16.msra.mxu0 %v240_v16 }
  0x22   :  { %154 = vmatmul.mubr.bf16.vlgmr.msra.gmra.mrb[0].mxu0 %v24_v18 }
  0xf5   :  { %v155_v26 = vpop.f32.mrb[0].mxu0 }
  0xf6   :  { %v183_v27 = vadd.f32 %v176_v24, %v155_v26  ;;  %v157_v28 = vpop.f32.mrb[1].mxu0 }
  0xf7   :  { %v184_v29 = vadd.f32 %v180_v25, %v157_v28  ;;  %v159_v30 = vpop.f32.mrb[2].mxu0 }
  0xf8   :  { %v160_v31 = vpop.f32.mrb[3].mxu0 }
  0xf9   :  { %v215_v32 = vpack.c.bf16 %v184_v29, %v183_v27 }
  0xfb   :  { %193 = vst [vmem:[%s322_s3] sm:$0xff] %v215_v32 }

// kernel: _forward_impl.67
= control target key start
LH: loop header
LB: loop body
LE: loop exit
PB: predicated region body
PF: predicated region fallthrough
CT: control target
= control target key end

     0   :  { %v195_v0 = vmov 0.0   ;;  %vm196_vm0 = vmmov 0   ;;  %s250_s1 = inlined_call_operand.vmem [shape: bf16[128,128], index: 1, kind: input, shape index: {}]   ;;  %s251_s0 = inlined_call_operand.vmem [shape: f32[8,128], index: 0, kind: input, shape index: {}]   ;;  %s252_s2 = inlined_call_operand.vmem [shape: f32[1,128], index: 2, kind: input, shape index: {}]   ;;  %s253_s3 = inlined_call_operand.vmem [shape: bf16[8,128], index: 3, kind: output, shape index: {}]  }
   0x1   :  { %165 = vmatprep.subr.bf16.mxu0 %v195_v0  ;;  %v187_v1 = vld [vmem:[%s250_s1] sm:$0xff]   ;;  %181 = vmatprep.mubr.msk.bf16.mxu0 %vm196_vm0, %v195_v0  ;;  %v188_v2 = vld [vmem:[%s250_s1 + $0x8] sm:$0xff]   ;;  %v189_v3 = vld [vmem:[%s250_s1 + $0x10] sm:$0xff]  }
   0x2   :  { %166 = vmatpush3.bf16.msra.mxu0 %v187_v1  ;;  %v190_v4 = vld [vmem:[%s250_s1 + $0x18] sm:$0xff]   ;;  %v191_v5 = vld [vmem:[%s250_s1 + $0x20] sm:$0xff]   ;;  %v192_v6 = vld [vmem:[%s250_s1 + $0x28] sm:$0xff]  }
   0x3   :  { %167 = vmatprep.subr.bf16.mxu0 %v195_v0  ;;  %v193_v7 = vld [vmem:[%s250_s1 + $0x30] sm:$0xff]   ;;  %v194_v8 = vld [vmem:[%s250_s1 + $0x38] sm:$0xff]   ;;  %v21_v9 = vld [vmem:[%s251_s0] sm:$0xff] }
   0x4   :  { %v22_v10 = vpack.c.bf16 %v21_v9, %v21_v9  ;;  %v155_v11 = vld [vmem:[%s252_s2] ss:$0 sm:$0xff] }
   0x6   :  { %168 = vmatpush3.bf16.msra.mxu0 %v188_v2 }
   0x7   :  { %169 = vmatprep.subr.bf16.mxu0 %v195_v0 }
   0xa   :  { %170 = vmatpush3.bf16.msra.mxu0 %v189_v3 }
   0xb   :  { %171 = vmatprep.subr.bf16.mxu0 %v195_v0 }
   0xe   :  { %172 = vmatpush3.bf16.msra.mxu0 %v190_v4 }
   0xf   :  { %173 = vmatprep.subr.bf16.mxu0 %v195_v0 }
  0x12   :  { %174 = vmatpush3.bf16.msra.mxu0 %v191_v5 }
  0x13   :  { %175 = vmatprep.subr.bf16.mxu0 %v195_v0 }
  0x16   :  { %176 = vmatpush3.bf16.msra.mxu0 %v192_v6 }
  0x17   :  { %177 = vmatprep.subr.bf16.mxu0 %v195_v0 }
  0x1a   :  { %178 = vmatpush3.bf16.msra.mxu0 %v193_v7 }
  0x1b   :  { %179 = vmatprep.subr.bf16.mxu0 %v195_v0 }
  0x1e   :  { %180 = vmatpush3.bf16.msra.mxu0 %v194_v8 }
  0x21   :  { %182 = vmatmul.mubr.bf16.vlgmr.msra.gmra.mrb[0].mxu0 %v22_v10 }
  0xf4   :  { %v121_v12 = vpop.f32.mrb[0].mxu0 }
  0xf5   :  { %v140_v13 = vadd.f32 %v155_v11, %v121_v12  ;;  %v183_v14 = vpop.f32.mrb[1].mxu0 }
  0xf6   :  { %v124_v15 = vpop.f32.mrb[2].mxu0 }
  0xf7   :  { %v141_v16 = vpack.c.bf16 %v140_v13, %v140_v13  ;;  %v184_v17 = vpop.f32.mrb[3].mxu0 }
  0xf9   :  { %142 = vst [vmem:[%s253_s3] sm:$0xf] %v141_v16 }

// kernel: _forward_impl.58
= control target key start
LH: loop header
LB: loop body
LE: loop exit
PB: predicated region body
PF: predicated region fallthrough
CT: control target
= control target key end

     0   :  { %v491_v1 = vmov 0   ;;  %v47_v35 = vlaneseq  ;;  %s646_s1 = inlined_call_operand.vmem [shape: bf16[128,256], index: 1, kind: input, shape index: {}]   ;;  %s647_s3 = inlined_call_operand.vmem [shape: bf16[256,128], index: 3, kind: input, shape index: {}]   ;;  %s648_s0 = inlined_call_operand.vmem [shape: f32[8,128], index: 0, kind: input, shape index: {}]   ;;  %s649_s2 = inlined_call_operand.vmem [shape: f32[1,256], index: 2, kind: input, shape index: {}]   ;;  %s650_s4 = inlined_call_operand.vmem [shape: f32[1,128], index: 4, kind: input, shape index: {}]   ;;  %s651_s5 = inlined_call_operand.vmem [shape: f32[1,128], index: 5, kind: input, shape index: {}]   ;;  %s652_s6 = inlined_call_operand.vmem [shape: f32[1,128], index: 6, kind: input, shape index: {}]   ;;  %s653_s7 = inlined_call_operand.vmem [shape: f32[8,128], index: 7, kind: output, shape index: {}]  }
   0x1   :  { %v449_v0 = vld [vmem:[%s646_s1 + $0x4] ss:$8 sps:$4 sm:$0xff]   ;;  %169 = vmatprep.mubr.bf16.mxu0 %v491_v1  ;;  %v451_v2 = vld [vmem:[%s646_s1] ss:$8 sps:$4 sm:$0xff]   ;;  %v452_v3 = vld [vmem:[%s646_s1 + $0x14] ss:$8 sps:$4 sm:$0xff]  }
   0x2   :  { %137 = vmatprep.subr.bf16.mxu0 %v449_v0  ;;  %v454_v4 = vld [vmem:[%s646_s1 + $0x10] ss:$8 sps:$4 sm:$0xff]   ;;  %v455_v5 = vld [vmem:[%s646_s1 + $0x24] ss:$8 sps:$4 sm:$0xff]   ;;  %v457_v6 = vld [vmem:[%s646_s1 + $0x20] ss:$8 sps:$4 sm:$0xff]  }
   0x3   :  { %138 = vmatpush1.bf16.msra.mxu0 %v451_v2  ;;  %v458_v7 = vld [vmem:[%s646_s1 + $0x34] ss:$8 sps:$4 sm:$0xff]   ;;  %v460_v8 = vld [vmem:[%s646_s1 + $0x30] ss:$8 sps:$4 sm:$0xff]   ;;  %v461_v9 = vld [vmem:[%s646_s1 + $0x44] ss:$8 sps:$4 sm:$0xff]  }
   0x4   :  { %139 = vmatprep.subr.bf16.mxu0 %v452_v3  ;;  %v473_v10 = vld [vmem:[%s647_s3 + $0x40] sm:$0xff]   ;;  %v475_v13 = vld [vmem:[%s647_s3 + $0x48] sm:$0xff]   ;;  %v477_v15 = vld [vmem:[%s647_s3 + $0x50] sm:$0xff]   ;;  %v48_v36 = vshrl.u32 %v47_v35, 7 }
   0x5   :  { %v474_v11 = vld [vmem:[%s647_s3] sm:$0xff]   ;;  %426 = vmatprep.subr.bf16.mxu1 %v473_v10  ;;  %v476_v14 = vld [vmem:[%s647_s3 + $0x8] sm:$0xff]   ;;  %v464_v16 = vld [vmem:[%s646_s1 + $0x54] ss:$8 sps:$4 sm:$0xff]  }
   0x6   :  { %v463_v12 = vld [vmem:[%s646_s1 + $0x40] ss:$8 sps:$4 sm:$0xff]   ;;  %427 = vmatpush3.bf16.msra.mxu1 %v474_v11  ;;  %v466_v17 = vld [vmem:[%s646_s1 + $0x50] ss:$8 sps:$4 sm:$0xff]   ;;  %v467_v20 = vld [vmem:[%s646_s1 + $0x64] ss:$8 sps:$4 sm:$0xff]  }
   0x7   :  { %140 = vmatpush1.bf16.msra.mxu0 %v454_v4  ;;  %428 = vmatprep.subr.bf16.mxu1 %v475_v13  ;;  %v478_v18 = vld [vmem:[%s647_s3 + $0x10] sm:$0xff]   ;;  %v479_v19 = vld [vmem:[%s647_s3 + $0x58] sm:$0xff]   ;;  %v469_v21 = vld [vmem:[%s646_s1 + $0x60] ss:$8 sps:$4 sm:$0xff]   ;;  %v49_v37 = vsub.s32 0, %v48_v36  ;;  %v53_v39 = vsub.s32 1, %v48_v36 }
   0x8   :  { %141 = vmatprep.subr.bf16.mxu0 %v455_v5  ;;  %v470_v22 = vld [vmem:[%s646_s1 + $0x74] ss:$8 sps:$4 sm:$0xff]   ;;  %v481_v24 = vld [vmem:[%s647_s3 + $0x60] sm:$0xff]   ;;  %v472_v26 = vld [vmem:[%s646_s1 + $0x70] ss:$8 sps:$4 sm:$0xff]  }
   0x9   :  { %v480_v23 = vld [vmem:[%s647_s3 + $0x18] sm:$0xff]   ;;  %v482_v25 = vld [vmem:[%s647_s3 + $0x20] sm:$0xff]   ;;  %v483_v28 = vld [vmem:[%s647_s3 + $0x68] sm:$0xff]  }
   0xa   :  { %429 = vmatpush3.bf16.msra.mxu1 %v476_v14  ;;  %v27_v27 = vld [vmem:[%s648_s0] sm:$0xff]  ;;  %v484_v30 = vld [vmem:[%s647_s3 + $0x28] sm:$0xff]   ;;  %v485_v31 = vld [vmem:[%s647_s3 + $0x70] sm:$0xff]  }
   0xb   :  { %142 = vmatpush1.bf16.msra.mxu0 %v457_v6  ;;  %430 = vmatprep.subr.bf16.mxu1 %v477_v15  ;;  %v28_v29 = vpack.c.bf16 %v27_v27, %v27_v27  ;;  %v486_v32 = vld [vmem:[%s647_s3 + $0x30] sm:$0xff]   ;;  %v487_v33 = vld [vmem:[%s647_s3 + $0x78] sm:$0xff]   ;;  %v45_v38 = vld [vmem:[%s649_s2] sm:$0x3] }
   0xc   :  { %143 = vmatprep.subr.bf16.mxu0 %v458_v7  ;;  %v488_v34 = vld [vmem:[%s647_s3 + $0x38] sm:$0xff]   ;;  %v50_v40 = vrot.slane %v45_v38, %v49_v37  ;;  %v54_v41 = vrot.slane %v45_v38, %v53_v39  ;;  %v407_v53 = vld [vmem:[%s650_s4] ss:$0 sm:$0xff] }
   0xd   :  { %v424_v4 = vld [vmem:[%s651_s5] ss:$0 sm:$0xff] }
   0xe   :  { %431 = vmatpush3.bf16.msra.mxu1 %v478_v18  ;;  %v425_v6 = vld [vmem:[%s652_s6] ss:$0 sm:$0xff] }
   0xf   :  { %144 = vmatpush1.bf16.msra.mxu0 %v460_v8  ;;  %432 = vmatprep.subr.bf16.mxu1 %v479_v19 }
  0x10   :  { %145 = vmatprep.subr.bf16.mxu0 %v461_v9 }
  0x12   :  { %433 = vmatpush3.bf16.msra.mxu1 %v480_v23 }
  0x13   :  { %146 = vmatpush1.bf16.msra.mxu0 %v463_v12  ;;  %434 = vmatprep.subr.bf16.mxu1 %v481_v24 }
  0x14   :  { %147 = vmatprep.subr.bf16.mxu0 %v464_v16 }
  0x16   :  { %435 = vmatpush3.bf16.msra.mxu1 %v482_v25 }
  0x17   :  { %148 = vmatpush1.bf16.msra.mxu0 %v466_v17  ;;  %436 = vmatprep.subr.bf16.mxu1 %v483_v28 }
  0x18   :  { %149 = vmatprep.subr.bf16.mxu0 %v467_v20 }
  0x1a   :  { %437 = vmatpush3.bf16.msra.mxu1 %v484_v30 }
  0x1b   :  { %150 = vmatpush1.bf16.msra.mxu0 %v469_v21  ;;  %438 = vmatprep.subr.bf16.mxu1 %v485_v31 }
  0x1c   :  { %151 = vmatprep.subr.bf16.mxu0 %v470_v22 }
  0x1e   :  { %439 = vmatpush3.bf16.msra.mxu1 %v486_v32 }
  0x1f   :  { %152 = vmatpush1.bf16.msra.mxu0 %v472_v26  ;;  %440 = vmatprep.subr.bf16.mxu1 %v487_v33 }
  0x22   :  { %170 = vmatmul.mubr.bf16.vlgmr.msra.gmra.mrb[0].mxu0 %v28_v29  ;;  %441 = vmatpush3.bf16.msra.mxu1 %v488_v34 }
  0xf5   :  { %v171_v42 = vpop.f32.mrb[0].mxu0 }
  0xf6   :  { %v172_v43 = vadd.f32 %v171_v42, %v50_v40  ;;  %v173_v44 = vpop.f32.mrb[1].mxu0 }
  0xf7   :  { %v174_v45 = vadd.f32 %v173_v44, %v54_v41  ;;  %v175_v46 = vpop.f32.mrb[2].mxu0 }
  0xf8   :  { %v178_v47 = vmax.f32 %v172_v43, 0.0  ;;  %v176_v48 = vpop.f32.mrb[3].mxu0 }
  0xf9   :  { %v179_v49 = vmax.f32 %v174_v45, 0.0 }
  0xfa   :  { %v180_v51 = vpack.c.bf16 %v178_v47, %v178_v47 }
  0xfb   :  { %v181_v50 = vpack.c.bf16 %v179_v49, %v179_v49 }
  0xfd   :  { %349 = vmatprep.mubr.bf16.mxu1 %v181_v50 }
  0xfe   :  { %350 = vmatmul.mubr.bf16.vlgmr.msra.gmra.mrb[0].mxu1 %v180_v51 }
 0x1d1   :  { %v442_v52 = vpop.f32.mrb[0].mxu1 }
 0x1d2   :  { %v443_v54 = vpop.f32.mrb[1].mxu1 }
 0x1d3   :  { %v444_v55 = vadd.f32 %v443_v54, %v442_v52  ;;  %v445_v56 = vpop.f32.mrb[2].mxu1 }
 0x1d4   :  { %v446_v57 = vpop.f32.mrb[3].mxu1 }
 0x1d5   :  { %v352_v58 = vadd.f32 %v444_v55, %v407_v53 }
 0x1d7   :  { %v357_v59 = vadd.f32 %v352_v58, %v27_v27 }
 0x1d9   :  { %360 = vadd.xlane.f32.xlu0 %v357_v59 }
 0x266   :  { %v361_v60 = vpop.xlane.xlu0 %360 }
 0x267   :  { %v363_v61 = vmul.f32 0.0078125, %v361_v60 }
 0x269   :  { %v364_v62 = vsub.f32 %v357_v59, %v363_v61 }
 0x26b   :  { %v365_v63 = vmul.f32 %v364_v62, %v364_v62 }
 0x26d   :  { %366 = vadd.xlane.f32.xlu0 %v365_v63 }
 0x2fa   :  { %v367_v0 = vpop.xlane.xlu0 %366 }
 0x2fb   :  { %v368_v1 = vmul.f32 0.0078125, %v367_v0 }
 0x2fd   :  { %v369_v2 = vadd.f32 1e-05, %v368_v1 }
 0x2ff   :  { %489 = vrsqrt.f32 %v369_v2 }
 0x309   :  { %v490_v3 = vpop.eup %489 }
 0x30a   :  { %v371_v5 = vmul.f32 %v490_v3, %v364_v62 }
 0x30c   :  { %v378_v7 = vmul.f32 %v424_v4, %v371_v5 }
 0x30e   :  { %v385_v8 = vadd.f32 %v425_v6, %v378_v7 }
 0x310   :  { %386 = vst [vmem:[%s653_s7] sm:$0xff] %v385_v8 }

// kernel: _forward_impl.106
= control target key start
LH: loop header
LB: loop body
LE: loop exit
PB: predicated region body
PF: predicated region fallthrough
CT: control target
= control target key end

     0   :  { %v203_v0 = vmov 0.0   ;;  %vm204_vm0 = vmmov 0   ;;  %s264_s1 = inlined_call_operand.vmem [shape: bf16[128,128], index: 1, kind: input, shape index: {}]   ;;  %s265_s0 = inlined_call_operand.vmem [shape: f32[16,128], index: 0, kind: input, shape index: {}]   ;;  %s266_s2 = inlined_call_operand.vmem [shape: f32[1,128], index: 2, kind: input, shape index: {}]   ;;  %s267_s3 = inlined_call_operand.vmem [shape: f32[16,128], index: 3, kind: output, shape index: {}]  }
   0x1   :  { %173 = vmatprep.subr.bf16.mxu0 %v203_v0  ;;  %v195_v1 = vld [vmem:[%s264_s1] sm:$0xff]   ;;  %189 = vmatprep.mubr.msk.bf16.mxu0 %vm204_vm0, %v203_v0  ;;  %v196_v2 = vld [vmem:[%s264_s1 + $0x8] sm:$0xff]   ;;  %v197_v3 = vld [vmem:[%s264_s1 + $0x10] sm:$0xff]  }
   0x2   :  { %174 = vmatpush3.bf16.msra.mxu0 %v195_v1  ;;  %v198_v4 = vld [vmem:[%s264_s1 + $0x18] sm:$0xff]   ;;  %v199_v5 = vld [vmem:[%s264_s1 + $0x20] sm:$0xff]   ;;  %v200_v6 = vld [vmem:[%s264_s1 + $0x28] sm:$0xff]  }
   0x3   :  { %175 = vmatprep.subr.bf16.mxu0 %v203_v0  ;;  %v201_v7 = vld [vmem:[%s264_s1 + $0x30] sm:$0xff]   ;;  %v202_v8 = vld [vmem:[%s264_s1 + $0x38] sm:$0xff]   ;;  %v23_v9 = vld [vmem:[%s265_s0] sm:$0xff] }
   0x4   :  { %v24_v10 = vld [vmem:[%s265_s0 + $0x8] sm:$0xff]  ;;  %v163_v13 = vld [vmem:[%s266_s2] ss:$0 sm:$0xff] }
   0x5   :  { %v25_v11 = vpack.c.bf16 %v24_v10, %v23_v9 }
   0x6   :  { %176 = vmatpush3.bf16.msra.mxu0 %v196_v2 }
   0x7   :  { %177 = vmatprep.subr.bf16.mxu0 %v203_v0 }
   0xa   :  { %178 = vmatpush3.bf16.msra.mxu0 %v197_v3 }
   0xb   :  { %179 = vmatprep.subr.bf16.mxu0 %v203_v0 }
   0xe   :  { %180 = vmatpush3.bf16.msra.mxu0 %v198_v4 }
   0xf   :  { %181 = vmatprep.subr.bf16.mxu0 %v203_v0 }
  0x12   :  { %182 = vmatpush3.bf16.msra.mxu0 %v199_v5 }
  0x13   :  { %183 = vmatprep.subr.bf16.mxu0 %v203_v0 }
  0x16   :  { %184 = vmatpush3.bf16.msra.mxu0 %v200_v6 }
  0x17   :  { %185 = vmatprep.subr.bf16.mxu0 %v203_v0 }
  0x1a   :  { %186 = vmatpush3.bf16.msra.mxu0 %v201_v7 }
  0x1b   :  { %187 = vmatprep.subr.bf16.mxu0 %v203_v0 }
  0x1e   :  { %188 = vmatpush3.bf16.msra.mxu0 %v202_v8 }
  0x21   :  { %190 = vmatmul.mubr.bf16.vlgmr.msra.gmra.mrb[0].mxu0 %v25_v11 }
  0xf4   :  { %v124_v12 = vpop.f32.mrb[0].mxu0 }
  0xf5   :  { %v191_v14 = vpop.f32.mrb[1].mxu0  ;;  %v147_v16 = vadd.f32 %v163_v13, %v124_v12 }
  0xf6   :  { %v127_v15 = vpop.f32.mrb[2].mxu0 }
  0xf7   :  { %v192_v17 = vpop.f32.mrb[3].mxu0  ;;  %149 = vst [vmem:[%s267_s3] sm:$0xff] %v147_v16  ;;  %v148_v18 = vadd.f32 %v163_v13, %v127_v15 }
  0xf9   :  { %150 = vst [vmem:[%s267_s3 + $0x8] sm:$0xff] %v148_v18 }

// kernel: _forward_impl.69
= control target key start
LH: loop header
LB: loop body
LE: loop exit
PB: predicated region body
PF: predicated region fallthrough
CT: control target
= control target key end

     0   :  { %vm38_vm0 = vcmask 130048   ;;  %v1193_v0 = vmov 0.0   ;;  %vm1194_vm1 = vmmov 0   ;;  %vm94_vm2 = vcmask 64512   ;;  %s1196_s20 = smov 96   ;;  %s1198_s21 = smov 64   ;;  %s1397_s1 = inlined_call_operand.vmem [shape: bf16[8,256], index: 1, kind: input, shape index: {}, may-alias: {1,2}]   ;;  %s1398_s0 = inlined_call_operand.vmem [shape: bf16[8,128], index: 0, kind: input, shape index: {}]   ;;  %s1399_s3 = inlined_call_operand.vmem [shape: f32[1,8], index: 3, kind: input, shape index: {}]   ;;  %s1400_s2 = inlined_call_operand.vmem [shape: bf16[8,256], index: 2, kind: input, shape index: {}, may-alias: {1,2}]   ;;  %s1401_s4 = inlined_call_operand.vmem [shape: bf16[8,128], index: 4, kind: output, shape index: {}]  }
   0x1   :  { %1053 = vmatprep.subr.bf16.mxu0 %v1193_v0  ;;  %v36_v1 = vld [vmem:[%s1397_s1] sm:$0xf]  ;;  %1055 = vmatprep.mubr.msk.bf16.mxu0 %vm1194_vm1, %v1193_v0  ;;  %s1199_s22 = smov 48   ;;  %s1200_s23 = smov 32   ;;  %vm110_vm3 = vcmask 1043456   ;;  %vm976_vm4 = vcmask 261120  }
   0x2   :  { %v43_v2 = vsel %vm38_vm0, %v36_v1, 0  ;;  %1059 = vmatprep.subr.bf16.mxu1 %v1193_v0  ;;  %1061 = vmatprep.mubr.msk.bf16.mxu1 %vm1194_vm1, %v1193_v0  ;;  %v35_v3 = vld [vmem:[%s1398_s0] sm:$0xf]  ;;  %v1005_v12 = vcombine.low %v36_v1, %v36_v1  ;;  %s1195_s0 = smov 112   ;;  %s1201_s24 = smov 16   ;;  %vm978_vm5 = vcmask 392192  }
   0x3   :  { %1054 = vmatpush3.bf16.xpose.msra.mxu0 %v43_v2  ;;  %v1247_v5 = vld [vmem:[%s1399_s3] ss:$0 sm:$0xff]  ;;  %v1004_v13 = vcombine.low %v35_v3, %v35_v3  ;;  %s1197_s3 = smov 80   ;;  %v1265_v19 = vld [vmem:[%s1400_s2 + $0x4] sm:$0xf]  ;;  %vm980_vm6 = vcmask 523264  }
   0x4   :  { %1071 = vmatprep.subr.bf16.mxu0 %v1193_v0  ;;  %162 = vrot.lane.b32.xlu1 %v1005_v12, %s1195_s0  ;;  %v112_v20 = vsel %vm110_vm3, %v1265_v19, 0  ;;  %vm982_vm7 = vcmask 654336   ;;  %vm984_vm8 = vcmask 785408   ;;  %vm986_vm9 = vcmask 916480  }
   0x5   :  { %1060 = vmatpush3.bf16.msra.mxu1 %v112_v20 }
   0x6   :  { %1065 = vmatprep.subr.bf16.mxu1 %v1193_v0 }
   0x8   :  { %157 = vrot.lane.b32.xlu1 %v1004_v13, %s1195_s0 }
   0xa   :  { %1056 = vmatmul.mubr.msk.bf16.vlgmr.msra.gmra.mrb[0].mxu0 %vm38_vm0, %v35_v3 }
   0xb   :  { %1073 = vmatprep.mubr.msk.bf16.mxu0 %vm1194_vm1, %v1193_v0 }
   0xc   :  { %275 = vrot.lane.b32.xlu1 %v1004_v13, %s1196_s20 }
  0x10   :  { %389 = vrot.lane.b32.xlu1 %v1005_v12, %s1197_s3 }
  0x14   :  { %387 = vrot.lane.b32.xlu1 %v1004_v13, %s1197_s3 }
  0x18   :  { %501 = vrot.lane.b32.xlu1 %v1005_v12, %s1198_s21 }
  0x1c   :  { %499 = vrot.lane.b32.xlu1 %v1004_v13, %s1198_s21 }
  0x20   :  { %613 = vrot.lane.b32.xlu1 %v1005_v12, %s1199_s22 }
  0x24   :  { %725 = vrot.lane.b32.xlu1 %v1005_v12, %s1200_s23 }
  0x28   :  { %837 = vrot.lane.b32.xlu1 %v1005_v12, %s1201_s24 }
  0x76   :  { %v163_v22 = vpop.permute.xlu1 %162 }
  0x77   :  { %v168_v27 = vsel %vm38_vm0, %v163_v22, 0 }
  0x7a   :  { %v158_v23 = vpop.permute.xlu1 %157 }
  0x7e   :  { %v276_v26 = vpop.permute.xlu1 %275 }
  0x82   :  { %v390_v30 = vpop.permute.xlu1 %389 }
  0x83   :  { %v395_v33 = vsel %vm38_vm0, %v390_v30, 0 }
  0x86   :  { %v388_v32 = vpop.permute.xlu1 %387 }
  0x8a   :  { %v502_v34 = vpop.permute.xlu1 %501 }
  0x8b   :  { %v507_v36 = vsel %vm38_vm0, %v502_v34, 0 }
  0x8e   :  { %v500_v35 = vpop.permute.xlu1 %499 }
  0x92   :  { %v614_v37 = vpop.permute.xlu1 %613 }
  0x93   :  { %v619_v38 = vsel %vm38_vm0, %v614_v37, 0 }
  0x96   :  { %v726_v39 = vpop.permute.xlu1 %725 }
  0x97   :  { %v731_v41 = vsel %vm38_vm0, %v726_v39, 0 }
  0x9a   :  { %v838_v42 = vpop.permute.xlu1 %837 }
  0x9b   :  { %v843_v44 = vsel %vm38_vm0, %v838_v42, 0 }
  0xdd   :  { %v79_v4 = vpop.f32.mrb[0].mxu0 }
  0xde   :  { %v85_v6 = vmul.f32 0.25, %v79_v4  ;;  %v1057_v7 = vpop.f32.mrb[1].mxu0 }
  0xdf   :  { %v82_v8 = vpop.f32.mrb[2].mxu0 }
  0xe0   :  { %v1058_v9 = vpop.f32.mrb[3].mxu0  ;;  %v93_v10 = vadd.f32 %v1247_v5, %v85_v6 }
  0xe2   :  { %v95_v11 = vsel %vm94_vm2, %v93_v10, -inf }
  0xe3   :  { %96 = vmax.xlane.f32.xlu0 %v95_v11 }
 0x170   :  { %v97_v14 = vpop.xlane.xlu0 %96 }
 0x171   :  { %v98_v15 = vsub.f32 %v93_v10, %v97_v14 }
 0x173   :  { %v99_v16 = vmul.f32 1.442695, %v98_v15 }
 0x175   :  { %1161 = vpow2.f32 %v99_v16 }
 0x17f   :  { %v1162_v17 = vpop.eup %1161 }
 0x180   :  { %v101_v18 = vsel %vm94_vm2, %v1162_v17, 0.0 }
 0x181   :  { %102 = vadd.xlane.f32.xlu0 %v101_v18 }
 0x197   :  { %277 = vrot.lane.b32.xlu0 %v1005_v12, %s1196_s20 }
 0x19b   :  { %611 = vrot.lane.b32.xlu0 %v1004_v13, %s1199_s22 }
 0x19f   :  { %723 = vrot.lane.b32.xlu0 %v1004_v13, %s1200_s23 }
 0x1a3   :  { %835 = vrot.lane.b32.xlu0 %v1004_v13, %s1201_s24 }
 0x20e   :  { %v103_v21 = vpop.xlane.xlu0 %102 }
 0x20f   :  { %1163 = vrcp.f32 %v103_v21 }
 0x212   :  { %v278_v29 = vpop.permute.xlu0 %277 }
 0x213   :  { %v283_v31 = vsel %vm38_vm0, %v278_v29, 0 }
 0x216   :  { %v612_v40 = vpop.permute.xlu0 %611 }
 0x219   :  { %v1164_v24 = vpop.eup %1163 }
 0x21a   :  { %v105_v25 = vmul.f32 %v1164_v24, %v1162_v17  ;;  %v724_v43 = vpop.permute.xlu0 %723 }
 0x21c   :  { %v106_v28 = vpack.c.bf16 %v105_v25, %v105_v25 }
 0x21e   :  { %1062 = vmatmul.mubr.msk.bf16.vlgmr.msra.gmra.mrb[0].mxu1 %vm94_vm2, %v106_v28  ;;  %v836_v45 = vpop.permute.xlu0 %835 }
 0x21f   :  { %1066 = vmatpush3.bf16.xpose.msra.mxu1 %v168_v27  ;;  %1067 = vmatprep.mubr.msk.bf16.mxu1 %vm1194_vm1, %v1193_v0 }
 0x220   :  { %1077 = vmatprep.subr.bf16.mxu1 %v1193_v0 }
 0x226   :  { %1068 = vmatmul.mubr.msk.bf16.vlgmr.msra.gmra.mrb[4].mxu1 %vm38_vm0, %v158_v23 }
 0x227   :  { %1078 = vmatpush3.bf16.xpose.msra.mxu1 %v283_v31  ;;  %1079 = vmatprep.mubr.msk.bf16.mxu1 %vm1194_vm1, %v1193_v0 }
 0x228   :  { %1089 = vmatprep.subr.bf16.mxu1 %v1193_v0 }
 0x22e   :  { %1080 = vmatmul.mubr.msk.bf16.vlgmr.msra.gmra.mrb[8].mxu1 %vm38_vm0, %v276_v26 }
 0x22f   :  { %1090 = vmatpush3.bf16.xpose.msra.mxu1 %v395_v33  ;;  %1091 = vmatprep.mubr.msk.bf16.mxu1 %vm1194_vm1, %v1193_v0 }
 0x230   :  { %1101 = vmatprep.subr.bf16.mxu1 %v1193_v0 }
 0x236   :  { %1092 = vmatmul.mubr.msk.bf16.vlgmr.msra.gmra.mrb[12].mxu1 %vm38_vm0, %v388_v32 }
 0x237   :  { %1102 = vmatpush3.bf16.xpose.msra.mxu1 %v507_v36  ;;  %1103 = vmatprep.mubr.msk.bf16.mxu1 %vm1194_vm1, %v1193_v0 }
 0x238   :  { %1113 = vmatprep.subr.bf16.mxu1 %v1193_v0 }
 0x23e   :  { %1104 = vmatmul.mubr.msk.bf16.vlgmr.msra.gmra.mrb[16].mxu1 %vm38_vm0, %v500_v35 }
 0x23f   :  { %1114 = vmatpush3.bf16.xpose.msra.mxu1 %v619_v38  ;;  %1115 = vmatprep.mubr.msk.bf16.mxu1 %vm1194_vm1, %v1193_v0  ;;  %v1007_v38 = vcombine.low %v1265_v19, %v1265_v19 }
 0x240   :  { %1125 = vmatprep.subr.bf16.mxu1 %v1193_v0 }
 0x246   :  { %1116 = vmatmul.mubr.msk.bf16.vlgmr.msra.gmra.mrb[20].mxu1 %vm38_vm0, %v612_v40 }
 0x247   :  { %1126 = vmatpush3.bf16.xpose.msra.mxu1 %v731_v41  ;;  %1127 = vmatprep.mubr.msk.bf16.mxu1 %vm1194_vm1, %v1193_v0 }
 0x248   :  { %1137 = vmatprep.subr.bf16.mxu1 %v1193_v0 }
 0x24e   :  { %1128 = vmatmul.mubr.msk.bf16.vlgmr.msra.gmra.mrb[24].mxu1 %vm38_vm0, %v724_v43 }
 0x24f   :  { %1138 = vmatpush3.bf16.xpose.msra.mxu1 %v843_v44  ;;  %1139 = vmatprep.mubr.msk.bf16.mxu1 %vm1194_vm1, %v1193_v0 }
 0x256   :  { %1140 = vmatmul.mubr.msk.bf16.vlgmr.msra.gmra.mrb[28].mxu1 %vm38_vm0, %v836_v45 }
 0x2f1   :  { %v1309_v46 = vpop.f32.mrb[0].mxu1 }
 0x2f2   :  { %v1063_v47 = vpop.f32.mrb[1].mxu1 }
 0x2f3   :  { %v151_v48 = vpop.f32.mrb[2].mxu1 }
 0x2f4   :  { %v1064_v49 = vpop.f32.mrb[3].mxu1 }
 0x2f9   :  { %v204_v50 = vpop.f32.mrb[4].mxu1 }
 0x2fa   :  { %v210_v51 = vmul.f32 0.25, %v204_v50  ;;  %v1069_v52 = vpop.f32.mrb[5].mxu1 }
 0x2fb   :  { %v207_v53 = vpop.f32.mrb[6].mxu1 }
 0x2fc   :  { %v1070_v54 = vpop.f32.mrb[7].mxu1  ;;  %v211_v55 = vadd.f32 %v1247_v5, %v210_v51 }
 0x2fe   :  { %v212_v56 = vsel %vm94_vm2, %v211_v55, -inf }
 0x2ff   :  { %213 = vmax.xlane.f32.xlu1 %v212_v56 }
 0x301   :  { %v319_v57 = vpop.f32.mrb[8].mxu1 }
 0x302   :  { %v325_v58 = vmul.f32 0.25, %v319_v57  ;;  %v1081_v59 = vpop.f32.mrb[9].mxu1 }
 0x303   :  { %v322_v60 = vpop.f32.mrb[10].mxu1 }
 0x304   :  { %v1082_v61 = vpop.f32.mrb[11].mxu1  ;;  %v326_v62 = vadd.f32 %v1247_v5, %v325_v58 }
 0x306   :  { %v327_v63 = vsel %vm94_vm2, %v326_v62, -inf }
 0x307   :  { %328 = vmax.xlane.f32.xlu0 %v327_v63 }
 0x309   :  { %v431_v1 = vpop.f32.mrb[12].mxu1 }
 0x30a   :  { %v437_v2 = vmul.f32 0.25, %v431_v1  ;;  %v1093_v3 = vpop.f32.mrb[13].mxu1 }
 0x30b   :  { %v434_v4 = vpop.f32.mrb[14].mxu1 }
 0x30c   :  { %v438_v6 = vadd.f32 %v1247_v5, %v437_v2  ;;  %v1094_v7 = vpop.f32.mrb[15].mxu1 }
 0x30e   :  { %v439_v8 = vsel %vm94_vm2, %v438_v6, -inf }
 0x30f   :  { %440 = vmax.xlane.f32.xlu0 %v439_v8 }
 0x311   :  { %v543_v9 = vpop.f32.mrb[16].mxu1 }
 0x312   :  { %v549_v10 = vmul.f32 0.25, %v543_v9  ;;  %v1105_v11 = vpop.f32.mrb[17].mxu1 }
 0x313   :  { %v546_v12 = vpop.f32.mrb[18].mxu1 }
 0x314   :  { %v550_v13 = vadd.f32 %v1247_v5, %v549_v10  ;;  %v1106_v14 = vpop.f32.mrb[19].mxu1 }
 0x316   :  { %v551_v15 = vsel %vm94_vm2, %v550_v13, -inf }
 0x317   :  { %552 = vmax.xlane.f32.xlu1 %v551_v15 }
 0x319   :  { %v655_v16 = vpop.f32.mrb[20].mxu1 }
 0x31a   :  { %v661_v17 = vmul.f32 0.25, %v655_v16  ;;  %v1117_v18 = vpop.f32.mrb[21].mxu1 }
 0x31b   :  { %v658_v20 = vpop.f32.mrb[22].mxu1 }
 0x31c   :  { %v662_v21 = vadd.f32 %v1247_v5, %v661_v17  ;;  %v1118_v22 = vpop.f32.mrb[23].mxu1 }
 0x31e   :  { %v663_v23 = vsel %vm94_vm2, %v662_v21, -inf }
 0x31f   :  { %664 = vmax.xlane.f32.xlu0 %v663_v23 }
 0x321   :  { %v767_v24 = vpop.f32.mrb[24].mxu1 }
 0x322   :  { %v773_v25 = vmul.f32 0.25, %v767_v24  ;;  %v1129_v26 = vpop.f32.mrb[25].mxu1 }
 0x323   :  { %v770_v27 = vpop.f32.mrb[26].mxu1 }
 0x324   :  { %v774_v28 = vadd.f32 %v1247_v5, %v773_v25  ;;  %v1130_v29 = vpop.f32.mrb[27].mxu1 }
 0x326   :  { %v775_v30 = vsel %vm94_vm2, %v774_v28, -inf }
 0x327   :  { %776 = vmax.xlane.f32.xlu1 %v775_v30 }
 0x329   :  { %v879_v31 = vpop.f32.mrb[28].mxu1 }
 0x32a   :  { %v885_v32 = vmul.f32 0.25, %v879_v31  ;;  %v1141_v33 = vpop.f32.mrb[29].mxu1 }
 0x32b   :  { %v882_v34 = vpop.f32.mrb[30].mxu1 }
 0x32c   :  { %v886_v35 = vadd.f32 %v1247_v5, %v885_v32  ;;  %v1142_v36 = vpop.f32.mrb[31].mxu1 }
 0x32e   :  { %v887_v37 = vsel %vm94_vm2, %v886_v35, -inf }
 0x32f   :  { %888 = vmax.xlane.f32.xlu0 %v887_v37 }
 0x338   :  { %227 = vrot.lane.b32.xlu1 %v1007_v38, %s1195_s0 }
 0x345   :  { %339 = vrot.lane.b32.xlu0 %v1007_v38, %s1196_s20 }
 0x38c   :  { %v214_v39 = vpop.xlane.xlu1 %213 }
 0x38d   :  { %v215_v40 = vsub.f32 %v211_v55, %v214_v39 }
 0x38f   :  { %v216_v41 = vmul.f32 1.442695, %v215_v40 }
 0x391   :  { %1165 = vpow2.f32 %v216_v41 }
 0x394   :  { %v329_v42 = vpop.xlane.xlu0 %328 }
 0x395   :  { %v330_v43 = vsub.f32 %v326_v62, %v329_v42 }
 0x397   :  { %v331_v44 = vmul.f32 1.442695, %v330_v43 }
 0x399   :  { %1167 = vpow2.f32 %v331_v44 }
 0x39b   :  { %v1166_v5 = vpop.eup %1165 }
 0x39c   :  { %v441_v45 = vpop.xlane.xlu0 %440  ;;  %v218_v47 = vsel %vm94_vm2, %v1166_v5, 0.0 }
 0x39d   :  { %v442_v48 = vsub.f32 %v438_v6, %v441_v45  ;;  %219 = vadd.xlane.f32.xlu1 %v218_v47 }
 0x39f   :  { %v443_v49 = vmul.f32 1.442695, %v442_v48 }
 0x3a1   :  { %1169 = vpow2.f32 %v443_v49 }
 0x3a3   :  { %v1168_v19 = vpop.eup %1167 }
 0x3a4   :  { %v333_v50 = vsel %vm94_vm2, %v1168_v19, 0.0  ;;  %v553_v53 = vpop.xlane.xlu1 %552 }
 0x3a5   :  { %334 = vadd.xlane.f32.xlu0 %v333_v50  ;;  %v554_v57 = vsub.f32 %v550_v13, %v553_v53 }
 0x3a7   :  { %v555_v59 = vmul.f32 1.442695, %v554_v57 }
 0x3a9   :  { %1171 = vpow2.f32 %v555_v59 }
 0x3ab   :  { %v1331_v51 = vpop.eup %1169 }
 0x3ac   :  { %v445_v52 = vsel %vm94_vm2, %v1331_v51, 0.0  ;;  %v665_v58 = vpop.xlane.xlu0 %664 }
 0x3ad   :  { %446 = vadd.xlane.f32.xlu1 %v445_v52  ;;  %v666_v60 = vsub.f32 %v662_v21, %v665_v58 }
 0x3af   :  { %v667_v63 = vmul.f32 1.442695, %v666_v60 }
 0x3b1   :  { %1173 = vpow2.f32 %v667_v63 }
 0x3b3   :  { %v1172_v4 = vpop.eup %1171 }
 0x3b4   :  { %v777_v54 = vpop.xlane.xlu1 %776  ;;  %v557_v6 = vsel %vm94_vm2, %v1172_v4, 0.0 }
 0x3b5   :  { %v778_v62 = vsub.f32 %v774_v28, %v777_v54 }
 0x3b7   :  { %v779_v2 = vmul.f32 1.442695, %v778_v62 }
 0x3b8   :  { %v228_v55 = vpop.permute.xlu1 %227 }
 0x3b9   :  { %v233_v56 = vsel %vm110_vm3, %v228_v55, 0  ;;  %1175 = vpow2.f32 %v779_v2 }
 0x3ba   :  { %1072 = vmatpush3.bf16.msra.mxu0 %v233_v56 }
 0x3bb   :  { %451 = vrot.lane.b32.xlu0 %v1007_v38, %s1197_s3  ;;  %1083 = vmatprep.subr.bf16.mxu0 %v1193_v0  ;;  %v1174_v7 = vpop.eup %1173 }
 0x3bc   :  { %v889_v61 = vpop.xlane.xlu0 %888  ;;  %v669_v9 = vsel %vm94_vm2, %v1174_v7, 0.0 }
 0x3bd   :  { %v890_v1 = vsub.f32 %v886_v35, %v889_v61 }
 0x3be   :  { %563 = vrot.lane.b32.xlu1 %v1007_v38, %s1198_s21 }
 0x3bf   :  { %v891_v3 = vmul.f32 1.442695, %v890_v1 }
 0x3c0   :  { %v340_v14 = vpop.permute.xlu0 %339 }
 0x3c1   :  { %1177 = vpow2.f32 %v891_v3  ;;  %v345_v20 = vsel %vm110_vm3, %v340_v14, 0 }
 0x3c3   :  { %v1340_v8 = vpop.eup %1175 }
 0x3c4   :  { %v781_v11 = vsel %vm94_vm2, %v1340_v8, 0.0 }
 0x3cb   :  { %v1343_v10 = vpop.eup %1177 }
 0x3cc   :  { %v893_v12 = vsel %vm94_vm2, %v1343_v10, 0.0 }
 0x3da   :  { %558 = vadd.xlane.f32.xlu0 %v557_v6 }
 0x3de   :  { %670 = vadd.xlane.f32.xlu0 %v669_v9 }
 0x3e2   :  { %782 = vadd.xlane.f32.xlu1 %v781_v11  ;;  %894 = vadd.xlane.f32.xlu0 %v893_v12 }
 0x3f3   :  { %787 = vrot.lane.b32.xlu1 %v1007_v38, %s1200_s23 }
 0x3f7   :  { %899 = vrot.lane.b32.xlu1 %v1007_v38, %s1201_s24 }
 0x3f8   :  { %675 = vrot.lane.b32.xlu0 %v1007_v38, %s1199_s22 }
 0x42a   :  { %v220_v13 = vpop.xlane.xlu1 %219 }
 0x42b   :  { %1179 = vrcp.f32 %v220_v13 }
 0x432   :  { %v335_v15 = vpop.xlane.xlu0 %334 }
 0x433   :  { %1181 = vrcp.f32 %v335_v15 }
 0x435   :  { %v1180_v16 = vpop.eup %1179 }
 0x436   :  { %v222_v17 = vmul.f32 %v1180_v16, %v1166_v5  ;;  %v452_v24 = vpop.permute.xlu0 %451 }
 0x437   :  { %v457_v26 = vsel %vm110_vm3, %v452_v24, 0 }
 0x438   :  { %v223_v18 = vpack.c.bf16 %v222_v17, %v222_v17 }
 0x43a   :  { %1074 = vmatmul.mubr.msk.bf16.vlgmr.msra.gmra.mrb[4].mxu0 %vm94_vm2, %v223_v18  ;;  %v447_v21 = vpop.xlane.xlu1 %446 }
 0x43b   :  { %1183 = vrcp.f32 %v447_v21  ;;  %1084 = vmatpush3.bf16.msra.mxu0 %v345_v20  ;;  %1085 = vmatprep.mubr.msk.bf16.mxu0 %vm1194_vm1, %v1193_v0 }
 0x43c   :  { %1095 = vmatprep.subr.bf16.mxu0 %v1193_v0 }
 0x43d   :  { %v1182_v22 = vpop.eup %1181 }
 0x43e   :  { %v337_v23 = vmul.f32 %v1182_v22, %v1168_v19  ;;  %v564_v29 = vpop.permute.xlu1 %563 }
 0x43f   :  { %v569_v31 = vsel %vm110_vm3, %v564_v29, 0 }
 0x440   :  { %v338_v25 = vpack.c.bf16 %v337_v23, %v337_v23 }
 0x442   :  { %1086 = vmatmul.mubr.msk.bf16.vlgmr.msra.gmra.mrb[8].mxu0 %vm94_vm2, %v338_v25 }
 0x443   :  { %1096 = vmatpush3.bf16.msra.mxu0 %v457_v26  ;;  %1097 = vmatprep.mubr.msk.bf16.mxu0 %vm1194_vm1, %v1193_v0 }
 0x444   :  { %1107 = vmatprep.subr.bf16.mxu0 %v1193_v0 }
 0x445   :  { %v1184_v27 = vpop.eup %1183 }
 0x446   :  { %v449_v28 = vmul.f32 %v1184_v27, %v1331_v51 }
 0x448   :  { %v450_v30 = vpack.c.bf16 %v449_v28, %v449_v28 }
 0x44a   :  { %1098 = vmatmul.mubr.msk.bf16.vlgmr.msra.gmra.mrb[12].mxu0 %vm94_vm2, %v450_v30 }
 0x44b   :  { %1108 = vmatpush3.bf16.msra.mxu0 %v569_v31  ;;  %1109 = vmatprep.mubr.msk.bf16.mxu0 %vm1194_vm1, %v1193_v0 }
 0x44c   :  { %1119 = vmatprep.subr.bf16.mxu0 %v1193_v0 }
 0x467   :  { %v559_v32 = vpop.xlane.xlu0 %558 }
 0x468   :  { %1185 = vrcp.f32 %v559_v32 }
 0x46b   :  { %v671_v33 = vpop.xlane.xlu0 %670 }
 0x46c   :  { %1187 = vrcp.f32 %v671_v33 }
 0x46f   :  { %v895_v34 = vpop.xlane.xlu0 %894  ;;  %v783_v35 = vpop.xlane.xlu1 %782 }
 0x470   :  { %1189 = vrcp.f32 %v783_v35 }
 0x471   :  { %1191 = vrcp.f32 %v895_v34 }
 0x472   :  { %v1186_v36 = vpop.eup %1185 }
 0x473   :  { %v561_v37 = vmul.f32 %v1186_v36, %v1172_v4  ;;  %v676_v38 = vpop.permute.xlu0 %675  ;;  %v788_v43 = vpop.permute.xlu1 %787 }
 0x474   :  { %v681_v39 = vsel %vm110_vm3, %v676_v38, 0  ;;  %v793_v44 = vsel %vm110_vm3, %v788_v43, 0 }
 0x475   :  { %v562_v40 = vpack.c.bf16 %v561_v37, %v561_v37 }
 0x476   :  { %v1188_v41 = vpop.eup %1187 }
 0x477   :  { %1110 = vmatmul.mubr.msk.bf16.vlgmr.msra.gmra.mrb[16].mxu0 %vm94_vm2, %v562_v40  ;;  %v673_v42 = vmul.f32 %v1188_v41, %v1174_v7  ;;  %v900_v48 = vpop.permute.xlu1 %899 }
 0x478   :  { %1120 = vmatpush3.bf16.msra.mxu0 %v681_v39  ;;  %1121 = vmatprep.mubr.msk.bf16.mxu0 %vm1194_vm1, %v1193_v0  ;;  %v905_v49 = vsel %vm110_vm3, %v900_v48, 0 }
 0x479   :  { %1131 = vmatprep.subr.bf16.mxu0 %v1193_v0  ;;  %v674_v5 = vpack.c.bf16 %v673_v42, %v673_v42 }
 0x47a   :  { %v1190_v45 = vpop.eup %1189 }
 0x47b   :  { %v785_v47 = vmul.f32 %v1190_v45, %v1340_v8  ;;  %v1192_v50 = vpop.eup %1191 }
 0x47c   :  { %v897_v51 = vmul.f32 %v1192_v50, %v1343_v10 }
 0x47d   :  { %v786_v19 = vpack.c.bf16 %v785_v47, %v785_v47 }
 0x47e   :  { %v898_v52 = vpack.c.bf16 %v897_v51, %v897_v51 }
 0x47f   :  { %1122 = vmatmul.mubr.msk.bf16.vlgmr.msra.gmra.mrb[20].mxu0 %vm94_vm2, %v674_v5 }
 0x480   :  { %1132 = vmatpush3.bf16.msra.mxu0 %v793_v44  ;;  %1133 = vmatprep.mubr.msk.bf16.mxu0 %vm1194_vm1, %v1193_v0 }
 0x481   :  { %1143 = vmatprep.subr.bf16.mxu0 %v1193_v0 }
 0x487   :  { %1134 = vmatmul.mubr.msk.bf16.vlgmr.msra.gmra.mrb[24].mxu0 %vm94_vm2, %v786_v19 }
 0x488   :  { %1144 = vmatpush3.bf16.msra.mxu0 %v905_v49  ;;  %1145 = vmatprep.mubr.msk.bf16.mxu0 %vm1194_vm1, %v1193_v0 }
 0x48f   :  { %1146 = vmatmul.mubr.msk.bf16.vlgmr.msra.gmra.mrb[28].mxu0 %vm94_vm2, %v898_v52 }
 0x50d   :  { %v269_v53 = vpop.f32.mrb[4].mxu0 }
 0x50e   :  { %948 = vrot.lane.b32.xlu1 %v269_v53, %s1201_s24  ;;  %v1075_v54 = vpop.f32.mrb[5].mxu0 }
 0x50f   :  { %v272_v55 = vpop.f32.mrb[6].mxu0 }
 0x510   :  { %v1076_v56 = vpop.f32.mrb[7].mxu0 }
 0x515   :  { %v381_v57 = vpop.f32.mrb[8].mxu0 }
 0x516   :  { %952 = vrot.lane.b32.xlu1 %v381_v57, %s1200_s23  ;;  %v1087_v58 = vpop.f32.mrb[9].mxu0 }
 0x517   :  { %v384_v59 = vpop.f32.mrb[10].mxu0 }
 0x518   :  { %v1088_v60 = vpop.f32.mrb[11].mxu0 }
 0x51d   :  { %v493_v61 = vpop.f32.mrb[12].mxu0 }
 0x51e   :  { %956 = vrot.lane.b32.xlu0 %v493_v61, %s1199_s22  ;;  %v1099_v0 = vpop.f32.mrb[13].mxu0 }
 0x51f   :  { %v496_v62 = vpop.f32.mrb[14].mxu0 }
 0x520   :  { %v1100_v63 = vpop.f32.mrb[15].mxu0 }
 0x54a   :  { %v605_v1 = vpop.f32.mrb[16].mxu0 }
 0x54b   :  { %960 = vrot.lane.b32.xlu1 %v605_v1, %s1198_s21  ;;  %v1111_v2 = vpop.f32.mrb[17].mxu0 }
 0x54c   :  { %v608_v3 = vpop.f32.mrb[18].mxu0 }
 0x54d   :  { %v1112_v4 = vpop.f32.mrb[19].mxu0 }
 0x552   :  { %v717_v6 = vpop.f32.mrb[20].mxu0 }
 0x553   :  { %964 = vrot.lane.b32.xlu0 %v717_v6, %s1197_s3  ;;  %v1123_v7 = vpop.f32.mrb[21].mxu0 }
 0x554   :  { %v720_v8 = vpop.f32.mrb[22].mxu0 }
 0x555   :  { %v1124_v9 = vpop.f32.mrb[23].mxu0 }
 0x55a   :  { %v829_v10 = vpop.f32.mrb[24].mxu0 }
 0x55b   :  { %968 = vrot.lane.b32.xlu1 %v829_v10, %s1196_s20  ;;  %v1135_v11 = vpop.f32.mrb[25].mxu0 }
 0x55c   :  { %v832_v12 = vpop.f32.mrb[26].mxu0 }
 0x55d   :  { %v1136_v13 = vpop.f32.mrb[27].mxu0 }
 0x562   :  { %v941_v14 = vpop.f32.mrb[28].mxu0 }
 0x563   :  { %972 = vrot.lane.b32.xlu0 %v941_v14, %s1195_s0  ;;  %v1147_v15 = vpop.f32.mrb[29].mxu0 }
 0x564   :  { %v944_v16 = vpop.f32.mrb[30].mxu0 }
 0x565   :  { %v1148_v17 = vpop.f32.mrb[31].mxu0 }
 0x580   :  { %v949_v18 = vpop.permute.xlu1 %948 }
 0x581   :  { %v975_v23 = vsel %vm38_vm0, %v1309_v46, %v949_v18 }
 0x588   :  { %v953_v20 = vpop.permute.xlu1 %952 }
 0x589   :  { %v977_v24 = vsel %vm976_vm4, %v975_v23, %v953_v20 }
 0x590   :  { %v957_v21 = vpop.permute.xlu0 %956 }
 0x591   :  { %v979_v26 = vsel %vm978_vm5, %v977_v24, %v957_v21 }
 0x5bd   :  { %v961_v22 = vpop.permute.xlu1 %960 }
 0x5be   :  { %v981_v28 = vsel %vm980_vm6, %v979_v26, %v961_v22 }
 0x5c5   :  { %v965_v25 = vpop.permute.xlu0 %964 }
 0x5c6   :  { %v983_v29 = vsel %vm982_vm7, %v981_v28, %v965_v25 }
 0x5cd   :  { %v969_v27 = vpop.permute.xlu1 %968 }
 0x5ce   :  { %v985_v30 = vsel %vm984_vm8, %v983_v29, %v969_v27 }
 0x5d5   :  { %v973_v31 = vpop.permute.xlu0 %972 }
 0x5d6   :  { %v987_v32 = vsel %vm986_vm9, %v985_v30, %v973_v31 }
 0x5d7   :  { %v988_v33 = vpack.c.bf16 %v987_v32, %v987_v32 }
 0x5d9   :  { %989 = vst [vmem:[%s1401_s4] sm:$0xf] %v988_v33 }

</bundles_post_ra>
